<compile_context>
chip_gen: v5e
topology: v5e:2x2
jax: 0.10.0
libtpu: 0.0.40
codegen_flags: <defaults>
</compile_context>

<pallas_src>
import jax
import jax.numpy as jnp
from jax import lax
from jax.experimental import pallas as pl
from jax.experimental.pallas import tpu as pltpu  # noqa: F401

# ----------------------------- config (small) -------------------------------
B = 2
IMG_C, IMG_H, IMG_W = 3, 16, 16
PATCH = 4
HF = WF = IMG_H // PATCH          # config['h_feature'] = config['w_feature'] = 4
P = HF * WF                       # 16 patches (image tokens w/o CLS)
S_IMG = P + 1
VISION_WIDTH = 48                 # != hidden  => "large" path
HID = 32                          # bert hidden == config['internal_dim']
T = 8                             # question length
STEPS = 3                         # config['controller_nodes']
D_STACK = 4                       # NMN attention-stack depth
MODULE_NAMES = ["_NoOp", "_Find", "_Transform", "_And", "_Answer"]   # NMN_5
M = len(MODULE_NAMES)
VOCAB = 64
PD = IMG_C * PATCH * PATCH        # 48 flattened patch dim
SD = T + 1 + P                    # decoder-side rows per batch
BT = B * T
BP = B * P
BD = B * D_STACK

F32 = jnp.float32
BF16 = jnp.bfloat16

# ---- patch+CLS slab (bf16, width PD): rows 0..B*P-1 patches, row B*P cls ----
ROW_CLS = B * P
PATCH_ROWS = B * P + 8            # pad to multiple of 8

# ---- activation slab (f32, width HID) ----
ACT_TXT = 0                       # (BT, HID)
ACT_QMASK = 16                    # (B, BT)   block-diag * context_mask
ACT_FMASK = 24                    # (BT, BP)  block-diag fusion mask
ACT_SMASK = 40                    # (B, BP)   block-diag spatial mask
ACT_ROWS = 48

# ---- bf16 weight-matrix slab (width 48), all offsets multiple of 16 ----
W_PATCH = 0                       # (PD, VISION_WIDTH)
W_VISN = 48                       # (VISION_WIDTH, HID)
W_Q, W_K, W_V, W_O = 96, 128, 160, 192
W_STEP = 224                      # STEPS blocks of HID rows
W_CQ_C, W_CQ_Q = 320, 352
W_FIND, W_T1, W_T2 = 384, 416, 448
W_ANS_C, W_ANS_F = 480, 512
W_MOD = 544                       # (HID, M)
WMAT_ROWS, WMAT_COLS = 576, 48

# ---- f32 vector/misc slab (width 48) ----
V_PATCH_B = 0
V_VISN_B, V_VISN_G, V_VISN_BETA = 1, 2, 3
V_BQ, V_BK, V_BV, V_BO = 4, 5, 6, 7
V_FUS_G, V_FUS_BETA = 8, 9
V_INIT_CTRL = 10
V_B_STEP = 11                     # STEPS rows
V_B_CQ = 14
V_B_MOD = 15
V_W_ATT = 16
V_B_ATT = 17
V_B_T = 18
V_B_ANS = 19
V_VALID = 24                      # (BD, M)   validity tiled over batch
V_S_UP = 32                       # (BD, BD)  block-diag shift-up
V_S_DN = 40                       # (BD, BD)  block-diag shift-down
V_RMAT = 48                       # (BD, B)   batch -> stack-row expander
V_CLS_SEL = 56                    # (B, BT)   selects q_out CLS row per batch
V_EYE_BD = 64                     # (BD, BD)
V_EYE_BP = 72                     # (BP, BP)
VEC_ROWS, VEC_COLS = 104, 48

# ---- decoder-side output slab: per-batch 32-row aligned block ----
DEC_STRIDE = 32
DEC_Q, DEC_IMG, DEC_MEM = 0, 8, 24

# ---- packed per-step misc output (lane offsets inside a 128-wide slab) ----
MISC_W = 128
OFF_QATTN = 0                     # width BT  (block-diag, extracted in wrapper)
OFF_MLOG = 16                     # width M
OFF_PTR = 24                      # width BD  (block-diag)
OFF_IATTN = 32                    # width BP  (block-diag)

NEG = -1e30


# ------------------------------ fused kernel ---------------------------------
def albef_fused_kernel(patch_ref, act_ref, wm_ref, vec_ref,
                       dec_ref, misc_ref, stack_ref):
    # --- slab accessors: slice the refs at the point of use (no hoisting) ---
    def Wm(off, rows=HID, cols=HID):
        return wm_ref[off:off + rows, 0:cols]                 # bf16 block

    def Vrow(row, cols=HID):
        return vec_ref[row:row + 1, 0:cols]                   # f32 (1, cols)

    def Vblk(row, rows, cols):
        return vec_ref[row:row + rows, 0:cols]                # f32 block

    def mmb(a, off, rows, cols):
        # bf16 MXU matmul against a weight block of the bf16 slab, f32 accum
        return jnp.dot(a.astype(BF16), Wm(off, rows, cols),
                       preferred_element_type=F32)

    def scores(a, bmat):
        # contract last dims: (m, k) x (n, k) -> (m, n), bf16 operands
        return lax.dot_general(a.astype(BF16), bmat.astype(BF16),
                               (((1,), (1,)), ((), ())),
                               preferred_element_type=F32)

    def ln(x, grow, brow):
        mu = jnp.mean(x, axis=-1, keepdims=True)
        var = jnp.mean((x - mu) ** 2, axis=-1, keepdims=True)
        return (x - mu) * lax.rsqrt(var + 1e-12) * grow + brow

    def softmax_lane(x, exact=False):
        mx = jnp.max(x, axis=-1, keepdims=True)
        e = jnp.exp(x - mx)
        s = jnp.sum(e, axis=-1, keepdims=True)
        if exact:
            return e / s
        return e * pl.reciprocal(s, approx=True)

    def row_to_col(row, eye):
        # (1, n) -> (n, 1) via VPU mul + lane reduce (no transpose)
        return jnp.sum(eye * row, axis=1, keepdims=True)

    def col_from_blockdiag(full, eye):
        # (B, n) block-diagonal -> (n, 1) column
        return row_to_col(jnp.sum(full, axis=0, keepdims=True), eye)

    # zero the outputs whose pad rows/lanes are never written
    dec_ref[...] = jnp.zeros(dec_ref.shape, F32)
    misc_ref[...] = jnp.zeros(misc_ref.shape, F32)

    scale = 1.0 / (HID ** 0.5)

    # ---- visual encoder stand-in + "large" path (CLS rides in the slab) ----
    # TODO(synk): stand-in for the external CLIP visual transformer (patch
    # embedding only); the CLS token is one extra row of the patch slab.
    pe = jnp.dot(patch_ref[...], Wm(W_PATCH, PD, VISION_WIDTH),
                 preferred_element_type=F32) + Vrow(V_PATCH_B, VISION_WIDTH)
    vis = ln(mmb(pe, W_VISN, VISION_WIDTH, HID) + Vrow(V_VISN_B),
             Vrow(V_VISN_G), Vrow(V_VISN_BETA))               # (PATCH_ROWS, HID)
    img_all = vis[0:BP, :]                                    # nocls embeds (BP, HID)

    # ---- fusion cross-attention, batched over B with block-diag masking ----
    # TODO(synk): stand-in for BertModel mode='fusion' (one cross-attn layer).
    txt = act_ref[ACT_TXT:ACT_TXT + BT, 0:HID]                # (BT, HID)
    q_all = mmb(txt, W_Q, HID, HID) + Vrow(V_BQ)
    k_all = mmb(vis, W_K, HID, HID) + Vrow(V_BK)              # patches + CLS share K/V
    v_all = mmb(vis, W_V, HID, HID) + Vrow(V_BV)
    k_pat, v_pat = k_all[0:BP, :], v_all[0:BP, :]
    k_cls, v_cls = k_all[ROW_CLS:ROW_CLS + 1, :], v_all[ROW_CLS:ROW_CLS + 1, :]

    fmask = act_ref[ACT_FMASK:ACT_FMASK + BT, 0:BP]           # (BT, BP)
    s_pat = jnp.where(fmask > 0, scores(q_all, k_pat) * scale, NEG)
    s_cls = jnp.sum(q_all * k_cls, axis=-1, keepdims=True) * scale
    mx = jnp.maximum(jnp.max(s_pat, axis=-1, keepdims=True), s_cls)
    e_pat = jnp.exp(s_pat - mx)
    e_cls = jnp.exp(s_cls - mx)
    inv = pl.reciprocal(jnp.sum(e_pat, axis=-1, keepdims=True) + e_cls,
                        approx=True)
    ctx = (jnp.dot(e_pat.astype(BF16), v_pat.astype(BF16),
                   preferred_element_type=F32) + e_cls * v_cls) * inv
    q_out = ln(txt + mmb(ctx, W_O, HID, HID) + Vrow(V_BO),
               Vrow(V_FUS_G), Vrow(V_FUS_BETA))               # (BT, HID)

    # per-batch CLS row of the fused question output, via a selector matmul
    cls_hidden = jnp.dot(Vblk(V_CLS_SEL, B, BT).astype(BF16),
                         q_out.astype(BF16),
                         preferred_element_type=F32)          # (B, HID)

    qmask = act_ref[ACT_QMASK:ACT_QMASK + B, 0:BT]            # (B, BT)
    smask = act_ref[ACT_SMASK:ACT_SMASK + B, 0:BP]            # (B, BP)

    # ---- controller / NMN state, batched across B (block-diag layout) ----
    control = Vrow(V_INIT_CTRL) + jnp.zeros((B, HID), F32)    # (B, HID)
    mem = jnp.zeros((B, HID), F32)
    stack = jnp.zeros((BD, BP), F32)                          # block-diag stack
    ptr = (lax.broadcasted_iota(jnp.int32, (B, BD), 1)
           == D_STACK * lax.broadcasted_iota(jnp.int32, (B, BD), 0)).astype(F32)
    iattn_full = jnp.zeros((B, BP), F32)

    for step in range(STEPS):                                 # unrolled (STEPS=3)
        # -------- Controller (Stack-NMN style) --------
        qi = mmb(cls_hidden, W_STEP + step * HID, HID, HID) + Vrow(V_B_STEP + step)
        cq = (mmb(control, W_CQ_C, HID, HID) + mmb(qi, W_CQ_Q, HID, HID)
              + Vrow(V_B_CQ))                                 # (B, HID)
        mlogit = mmb(cq, W_MOD, HID, M) + Vrow(V_B_MOD, M)    # (B, M)
        mprobs = softmax_lane(mlogit, exact=True)
        att_l = scores(cq * Vrow(V_W_ATT), q_out) + vec_ref[V_B_ATT:V_B_ATT + 1, 0:1]
        att_l = jnp.where(qmask > 0, att_l, NEG)
        qattn_full = softmax_lane(att_l)                      # (B, BT) block-diag
        new_ctrl = jnp.dot(qattn_full.astype(BF16), q_out.astype(BF16),
                           preferred_element_type=F32)        # (B, HID)

        # -------- module-validity renormalisation (ALBEF.forward) --------
        vprobs = mprobs * jnp.dot(ptr, Vblk(V_VALID, BD, M),
                                  preferred_element_type=F32)
        vprobs = vprobs / jnp.sum(vprobs, axis=-1, keepdims=True)

        # -------- NMN_5 soft modules (simplified, block-diag lane layout) --------
        # TODO(synk): exact NMN_5 internals are external; simplified Stack-NMN.
        eye_bd = Vblk(V_EYE_BD, BD, BD)
        rmat = Vblk(V_RMAT, BD, B)
        att_cur = jnp.dot(ptr, stack, preferred_element_type=F32)        # (B, BP)
        feat_cur = jnp.dot(att_cur.astype(BF16), img_all.astype(BF16),
                           preferred_element_type=F32)                   # (B, HID)

        # _Find : push a new attention
        c_f = mmb(new_ctrl, W_FIND, HID, HID)
        find_att = softmax_lane(jnp.where(smask > 0, scores(c_f, img_all), NEG))
        ptr_find = jnp.dot(ptr, Vblk(V_S_UP, BD, BD), preferred_element_type=F32)
        pc_find = col_from_blockdiag(ptr_find, eye_bd)                   # (BD, 1)
        fb_find = jnp.dot(rmat, find_att, preferred_element_type=F32)    # (BD, BP)
        stack_find = stack + pc_find * (fb_find - stack)

        # _Transform : rewrite the current attention
        proj = (mmb(feat_cur, W_T1, HID, HID) + mmb(new_ctrl, W_T2, HID, HID)
                + Vrow(V_B_T))
        tr_att = softmax_lane(jnp.where(smask > 0, scores(proj, img_all), NEG))
        pc_cur = col_from_blockdiag(ptr, eye_bd)
        fb_tr = jnp.dot(rmat, tr_att, preferred_element_type=F32)
        stack_tr = stack + pc_cur * (fb_tr - stack)

        # _And : pop two, push the elementwise min
        ptr_dn = jnp.dot(ptr, Vblk(V_S_DN, BD, BD), preferred_element_type=F32)
        att2 = jnp.dot(ptr_dn, stack, preferred_element_type=F32)        # (B, BP)
        pc_dn = col_from_blockdiag(ptr_dn, eye_bd)
        fb_and = jnp.dot(rmat, jnp.minimum(att_cur, att2),
                         preferred_element_type=F32)
        stack_and = stack + pc_dn * (fb_and - stack)

        # _Answer : write memory from the attended feature
        mem_ans = jnp.tanh(mmb(new_ctrl, W_ANS_C, HID, HID)
                           + mmb(feat_cur, W_ANS_F, HID, HID) + Vrow(V_B_ANS))

        p_noop = vprobs[:, 0:1]
        p_find = vprobs[:, 1:2]
        p_tr = vprobs[:, 2:3]
        p_and = vprobs[:, 3:4]
        p_ans = vprobs[:, 4:5]
        # per-batch module probs broadcast onto the BD stack rows (one matmul)
        pbd = jnp.dot(rmat, vprobs, preferred_element_type=F32)          # (BD, M)

        stack = ((pbd[:, 0:1] + pbd[:, 4:5]) * stack + pbd[:, 1:2] * stack_find
                 + pbd[:, 2:3] * stack_tr + pbd[:, 3:4] * stack_and)
        ptr = (p_noop + p_tr + p_ans) * ptr + p_find * ptr_find + p_and * ptr_dn
        mem = (1.0 - p_ans) * mem + p_ans * mem_ans
        control = new_ctrl
        iattn_full = jnp.dot(ptr, stack, preferred_element_type=F32)     # (B, BP)

        # -------- per-step outputs: one batched store per quantity --------
        r0 = step * B
        misc_ref[r0:r0 + B, OFF_QATTN:OFF_QATTN + BT] = qattn_full
        misc_ref[r0:r0 + B, OFF_MLOG:OFF_MLOG + M] = mlogit
        misc_ref[r0:r0 + B, OFF_PTR:OFF_PTR + BD] = ptr
        misc_ref[r0:r0 + B, OFF_IATTN:OFF_IATTN + BP] = iattn_full
        stack_ref[step * BD:(step + 1) * BD, :] = stack

    # -------- decoder side (planA + concat_last_layer), aligned layout --------
    w_sp = softmax_lane(jnp.where(smask > 0, iattn_full, NEG))           # (B, BP)
    wcol = row_to_col(jnp.sum(w_sp, axis=0, keepdims=True),
                      Vblk(V_EYE_BP, BP, BP))                            # (BP, 1)
    weighted = wcol * img_all                                            # (BP, HID)

    for b in range(B):                                                   # B=2
        base = b * DEC_STRIDE
        dec_ref[base + DEC_Q:base + DEC_Q + T, :] = q_out[b * T:(b + 1) * T, :]
        dec_ref[base + DEC_IMG:base + DEC_IMG + P, :] = weighted[b * P:(b + 1) * P, :]
        dec_ref[base + DEC_MEM:base + DEC_MEM + 1, :] = mem[b:b + 1, :]


# --------------------------------- glue --------------------------------------
def extract_patches(image):
    # NCHW -> (B, P, C*ph*pw)
    x = image.reshape(B, IMG_C, HF, PATCH, WF, PATCH)
    x = x.transpose(0, 2, 4, 1, 3, 5)
    return x.reshape(B, P, PD)


def _put(slab, row, arr):
    r, c = arr.shape
    return slab.at[row:row + r, 0:c].set(arr)


def albef_forward(image, input_ids, attn_mask, p):
    # ---- host-side slab packing (4 kernel inputs instead of ~40) ----
    patches = extract_patches(image.astype(F32)).reshape(B * P, PD)
    patch_slab = jnp.zeros((PATCH_ROWS, PD), F32)
    patch_slab = patch_slab.at[0:B * P, :].set(patches)
    patch_slab = patch_slab.at[ROW_CLS:ROW_CLS + 1, :].set(p["cls_tok"])
    patch_slab = patch_slab.astype(BF16)

    # ---- text encoder mode='text' stand-in (embedding + LayerNorm) ----
    # TODO(synk): pretrained BertModel text layers are external; embed + LN only.
    txt = jnp.take(p["tok_emb"], input_ids, axis=0) + p["pos_emb"][None]
    mu = jnp.mean(txt, -1, keepdims=True)
    var = jnp.mean((txt - mu) ** 2, -1, keepdims=True)
    text_embeds = (txt - mu) * lax.rsqrt(var + 1e-12) * p["txt_g"] + p["txt_beta"]
    text_2d = text_embeds.reshape(B * T, HID)

    # mask_pad=True (torch mutates question.attention_mask in place)
    masked_attn = attn_mask.at[:, 0].set(0)
    cmask = masked_attn.astype(F32)

    eyeB = jnp.eye(B, dtype=F32)
    qmask = jnp.einsum("bc,bt->bct", eyeB, cmask).reshape(B, BT)
    fmask = jnp.kron(eyeB, jnp.ones((T, P), F32))
    smask = jnp.kron(eyeB, jnp.ones((1, P), F32)).reshape(B, BP)

    act = jnp.zeros((ACT_ROWS, HID), F32)
    act = act.at[ACT_TXT:ACT_TXT + BT, :].set(text_2d)
    act = act.at[ACT_QMASK:ACT_QMASK + B, 0:BT].set(qmask)
    act = act.at[ACT_FMASK:ACT_FMASK + BT, 0:BP].set(fmask)
    act = act.at[ACT_SMASK:ACT_SMASK + B, 0:BP].set(smask)

    # concatenated weights split outside the kernel (order: [ctrl|qi], [ctrl|feat])
    w_cq_c, w_cq_q = p["w_cq"][:HID], p["w_cq"][HID:]
    w_ans_c, w_ans_f = p["w_ans"][:HID], p["w_ans"][HID:]

    wm = jnp.zeros((WMAT_ROWS, WMAT_COLS), F32)
    wm = _put(wm, W_PATCH, p["patch_w"])
    wm = _put(wm, W_VISN, p["visn_w"])
    wm = _put(wm, W_Q, p["wq"]); wm = _put(wm, W_K, p["wk"])
    wm = _put(wm, W_V, p["wv"]); wm = _put(wm, W_O, p["wo"])
    for s in range(STEPS):
        wm = _put(wm, W_STEP + s * HID, p["w_step"][s])
    wm = _put(wm, W_CQ_C, w_cq_c); wm = _put(wm, W_CQ_Q, w_cq_q)
    wm = _put(wm, W_FIND, p["w_find"])
    wm = _put(wm, W_T1, p["w_t1"]); wm = _put(wm, W_T2, p["w_t2"])
    wm = _put(wm, W_ANS_C, w_ans_c); wm = _put(wm, W_ANS_F, w_ans_f)
    wm = _put(wm, W_MOD, p["w_mod"])
    wm = wm.astype(BF16)

    vec = jnp.zeros((VEC_ROWS, VEC_COLS), F32)
    vec = _put(vec, V_PATCH_B, p["patch_b"])
    vec = _put(vec, V_VISN_B, p["visn_b"]); vec = _put(vec, V_VISN_G, p["visn_g"])
    vec = _put(vec, V_VISN_BETA, p["visn_beta"])
    vec = _put(vec, V_BQ, p["bq"]); vec = _put(vec, V_BK, p["bk"])
    vec = _put(vec, V_BV, p["bv"]); vec = _put(vec, V_BO, p["bo"])
    vec = _put(vec, V_FUS_G, p["fus_g"]); vec = _put(vec, V_FUS_BETA, p["fus_beta"])
    vec = _put(vec, V_INIT_CTRL, p["init_ctrl"])
    vec = _put(vec, V_B_STEP, p["b_step"])
    vec = _put(vec, V_B_CQ, p["b_cq"]); vec = _put(vec, V_B_MOD, p["b_mod"])
    vec = _put(vec, V_W_ATT, p["w_att"]); vec = _put(vec, V_B_ATT, p["b_att"])
    vec = _put(vec, V_B_T, p["b_t"]); vec = _put(vec, V_B_ANS, p["b_ans"])
    vec = _put(vec, V_VALID, jnp.tile(p["validity"], (B, 1)))
    vec = _put(vec, V_S_UP, jnp.kron(eyeB, p["s_up"]))
    vec = _put(vec, V_S_DN, jnp.kron(eyeB, p["s_dn"]))
    vec = _put(vec, V_RMAT, jnp.kron(eyeB, jnp.ones((D_STACK, 1), F32)))
    vec = _put(vec, V_CLS_SEL, jax.nn.one_hot(jnp.arange(B) * T, BT, dtype=F32))
    vec = _put(vec, V_EYE_BD, jnp.eye(BD, dtype=F32))
    vec = _put(vec, V_EYE_BP, jnp.eye(BP, dtype=F32))

    dec2d, misc, stack_out = pl.pallas_call(
        albef_fused_kernel,
        out_shape=(jax.ShapeDtypeStruct((B * DEC_STRIDE, HID), F32),
                   jax.ShapeDtypeStruct((STEPS * B, MISC_W), F32),
                   jax.ShapeDtypeStruct((STEPS * BD, BP), F32)),
    )(patch_slab, act, wm, vec)

    # ---- unpack the aligned decoder slab back to (B, T+1+P, HID) ----
    dec = dec2d.reshape(B, DEC_STRIDE, HID)
    decoder_side_input = jnp.concatenate(
        [dec[:, DEC_Q:DEC_Q + T, :],                 # question_output
         dec[:, DEC_MEM:DEC_MEM + 1, :],             # mem.unsqueeze(1)
         dec[:, DEC_IMG:DEC_IMG + P, :]], axis=1)    # planA weighted image

    # ---- unpack the per-step outputs (block-diag pieces picked per batch) ----
    misc = misc.reshape(STEPS, B, MISC_W).transpose(1, 0, 2)             # (B,STEPS,·)
    qattns = jnp.stack(
        [misc[b, :, OFF_QATTN + b * T:OFF_QATTN + (b + 1) * T] for b in range(B)], 0)
    stack_ptr = jnp.stack(
        [misc[b, :, OFF_PTR + b * D_STACK:OFF_PTR + (b + 1) * D_STACK]
         for b in range(B)], 0)
    iattns = jnp.stack(
        [misc[b, :, OFF_IATTN + b * P:OFF_IATTN + (b + 1) * P] for b in range(B)], 0)
    st = stack_out.reshape(STEPS, B, D_STACK, B, P)
    att_stack_bsdp = jnp.stack([st[:, b, :, b, :] for b in range(B)], axis=0)
    att_stack = jnp.transpose(att_stack_bsdp, (0, 1, 3, 2)).reshape(
        B, STEPS, HF, WF, D_STACK)

    outputs = {
        "qattns": qattns,
        "iattns": iattns.reshape(B, STEPS, HF, WF),
        "module_logits": misc[:, :, OFF_MLOG:OFF_MLOG + M],
        "context_mask": masked_attn,
        "att_stack": att_stack,
        "stack_ptr": stack_ptr,
    }

    image_atts = jnp.ones((B, S_IMG), jnp.int32)
    decoder_side_mask = jnp.concatenate([masked_attn, image_atts], axis=1)

    # TODO(synk): BertLMHeadModel text_decoder (answer LM loss / rank_answer /
    # open generation) is an external pretrained module; not implemented.
    return decoder_side_input, decoder_side_mask, outputs


def init_params(key):
    ks = iter(jax.random.split(key, 48))

    def lin(fan_in, fan_out):
        lim = (6.0 / (fan_in + fan_out)) ** 0.5
        return jax.random.uniform(next(ks), (fan_in, fan_out), F32, -lim, lim)

    p = {}
    p["patch_w"] = lin(PD, VISION_WIDTH)
    p["patch_b"] = jnp.zeros((1, VISION_WIDTH), F32)
    p["cls_tok"] = jax.random.normal(next(ks), (1, PD), F32) * 0.02
    p["visn_w"] = lin(VISION_WIDTH, HID)
    p["visn_b"] = jnp.zeros((1, HID), F32)
    p["visn_g"] = jnp.ones((1, HID), F32)
    p["visn_beta"] = jnp.zeros((1, HID), F32)
    p["tok_emb"] = jax.random.normal(next(ks), (VOCAB, HID), F32) * 0.02
    p["pos_emb"] = jax.random.normal(next(ks), (T, HID), F32) * 0.02
    p["txt_g"] = jnp.ones((1, HID), F32)
    p["txt_beta"] = jnp.zeros((1, HID), F32)
    for n in ["wq", "wk", "wv", "wo"]:
        p[n] = lin(HID, HID)
    for n in ["bq", "bk", "bv", "bo"]:
        p[n] = jnp.zeros((1, HID), F32)
    p["fus_g"] = jnp.ones((1, HID), F32)
    p["fus_beta"] = jnp.zeros((1, HID), F32)
    p["init_ctrl"] = jax.random.normal(next(ks), (1, HID), F32) * (1.0 / HID) ** 0.5
    p["w_step"] = jnp.stack([lin(HID, HID) for _ in range(STEPS)])
    p["b_step"] = jnp.zeros((STEPS, HID), F32)
    p["w_cq"] = lin(2 * HID, HID)
    p["b_cq"] = jnp.zeros((1, HID), F32)
    p["w_mod"] = lin(HID, M)
    p["b_mod"] = jnp.zeros((1, M), F32)
    p["w_att"] = lin(HID, 1).reshape(1, HID)
    p["b_att"] = jnp.zeros((1, 1), F32)
    p["w_find"] = lin(HID, HID)
    p["w_t1"] = lin(HID, HID)
    p["w_t2"] = lin(HID, HID)
    p["b_t"] = jnp.zeros((1, HID), F32)
    p["w_ans"] = lin(2 * HID, HID)
    p["b_ans"] = jnp.zeros((1, HID), F32)
    # module validity matrix (rows: stack position, cols: modules)
    valid = jnp.ones((D_STACK, M), F32)
    valid = valid.at[D_STACK - 1, 1].set(0.0)    # _Find needs room to push
    valid = valid.at[0, 3].set(0.0)              # _And needs >= 2 attentions
    p["validity"] = valid
    # stack-pointer shift matrices
    s_up = jnp.zeros((D_STACK, D_STACK), F32)
    s_up = s_up.at[jnp.arange(D_STACK - 1), jnp.arange(1, D_STACK)].set(1.0)
    s_up = s_up.at[D_STACK - 1, D_STACK - 1].set(1.0)
    s_dn = jnp.zeros((D_STACK, D_STACK), F32)
    s_dn = s_dn.at[jnp.arange(1, D_STACK), jnp.arange(D_STACK - 1)].set(1.0)
    s_dn = s_dn.at[0, 0].set(1.0)
    p["s_up"] = s_up
    p["s_dn"] = s_dn
    return p


# ---------------------------------- main --------------------------------------
if __name__ == "__main__":
    key = jax.random.PRNGKey(0)
    kp, ki, kq = jax.random.split(key, 3)
    params = init_params(kp)

    image = jax.random.normal(ki, (B, IMG_C, IMG_H, IMG_W), F32)     # NCHW
    input_ids = jax.random.randint(kq, (B, T), 0, VOCAB)
    attn_mask = jnp.ones((B, T), jnp.int32).at[1, T - 2:].set(0)

    fwd = jax.jit(albef_forward)
    dsi, dsm, outputs = fwd(image, input_ids, attn_mask, params)
    jax.block_until_ready(dsi)
    jax.block_until_ready(dsm)
    jax.block_until_ready(outputs["qattns"])
    jax.block_until_ready(outputs["att_stack"])

    assert dsi.shape == (B, T + 1 + P, HID)
    assert dsm.shape == (B, T + S_IMG)
    assert outputs["qattns"].shape == (B, STEPS, T)
    assert outputs["iattns"].shape == (B, STEPS, HF, WF)
    assert outputs["module_logits"].shape == (B, STEPS, M)
    assert outputs["att_stack"].shape == (B, STEPS, HF, WF, D_STACK)
    assert outputs["stack_ptr"].shape == (B, STEPS, D_STACK)
    assert bool(jnp.all(jnp.isfinite(dsi)))
    assert bool(jnp.all(jnp.isfinite(outputs["qattns"])))
    print("KERNEL_OK")
</pallas_src>

<mosaic_0001>
module attributes {stable_mosaic.version = 11 : i64} {
  func.func @albef_fused_kernel(%arg0: memref<40x48xbf16, #tpu.memory_space<vmem>>, %arg1: memref<48x32xf32, #tpu.memory_space<vmem>>, %arg2: memref<576x48xbf16, #tpu.memory_space<vmem>>, %arg3: memref<104x48xf32, #tpu.memory_space<vmem>>, %arg4: memref<64x32xf32, #tpu.memory_space<vmem>>, %arg5: memref<6x128xf32, #tpu.memory_space<vmem>>, %arg6: memref<24x32xf32, #tpu.memory_space<vmem>>) attributes {dimension_semantics = [], scalar_prefetch = 0 : i64, scratch_operands = 0 : i64, tpu.core_type = #tpu.core_type<tc>} {
    %cst = arith.constant 0.000000e+00 : f32
    %0 = vector.broadcast %cst : f32 to vector<64x32xf32>
    %c0 = arith.constant 0 : index
    %c0_0 = arith.constant 0 : index
    %1 = vector.load %arg4[%c0, %c0_0] : memref<64x32xf32, #tpu.memory_space<vmem>>, vector<64x32xf32>
    tpu.vector_store %arg4[%c0, %c0_0], %0 {strides = array<i32>} : memref<64x32xf32, #tpu.memory_space<vmem>>, vector<64x32xf32>,
    %cst_1 = arith.constant 0.000000e+00 : f32
    %2 = vector.broadcast %cst_1 : f32 to vector<6x128xf32>
    %c0_2 = arith.constant 0 : index
    %c0_3 = arith.constant 0 : index
    %3 = vector.load %arg5[%c0_2, %c0_3] : memref<6x128xf32, #tpu.memory_space<vmem>>, vector<6x128xf32>
    tpu.vector_store %arg5[%c0_2, %c0_3], %2 {strides = array<i32>} : memref<6x128xf32, #tpu.memory_space<vmem>>, vector<6x128xf32>,
    %c0_4 = arith.constant 0 : index
    %c0_5 = arith.constant 0 : index
    %4 = vector.load %arg0[%c0_4, %c0_5] : memref<40x48xbf16, #tpu.memory_space<vmem>>, vector<40x48xbf16>
    %c0_6 = arith.constant 0 : index
    %c0_7 = arith.constant 0 : index
    %5 = vector.load %arg2[%c0_6, %c0_7] : memref<576x48xbf16, #tpu.memory_space<vmem>>, vector<48x48xbf16>
    %cst_8 = arith.constant dense<0.000000e+00> : vector<40x48xf32>
    %6 = tpu.matmul %4, %5, %cst_8 {dimension_numbers = #tpu.dot_dimension_numbers<[1], [0], [0], [1], [0, 0, 1, 1], [], []>} : vector<40x48xbf16>, vector<48x48xbf16>, vector<40x48xf32> -> vector<40x48xf32>
    %c0_9 = arith.constant 0 : index
    %c0_10 = arith.constant 0 : index
    %7 = vector.load %arg3[%c0_9, %c0_10] : memref<104x48xf32, #tpu.memory_space<vmem>>, vector<1x48xf32>
    %8 = vector.broadcast %7 : vector<1x48xf32> to vector<40x48xf32>
    %9 = arith.addf %6, %8 : vector<40x48xf32>
    %10 = arith.truncf %9 : vector<40x48xf32> to vector<40x48xbf16>
    %c48 = arith.constant 48 : index
    %c0_11 = arith.constant 0 : index
    %11 = vector.load %arg2[%c48, %c0_11] : memref<576x48xbf16, #tpu.memory_space<vmem>>, vector<48x32xbf16>
    %cst_12 = arith.constant dense<0.000000e+00> : vector<40x32xf32>
    %12 = tpu.matmul %10, %11, %cst_12 {dimension_numbers = #tpu.dot_dimension_numbers<[1], [0], [0], [1], [0, 0, 1, 1], [], []>} : vector<40x48xbf16>, vector<48x32xbf16>, vector<40x32xf32> -> vector<40x32xf32>
    %c1 = arith.constant 1 : index
    %c0_13 = arith.constant 0 : index
    %13 = vector.load %arg3[%c1, %c0_13] : memref<104x48xf32, #tpu.memory_space<vmem>>, vector<1x32xf32>
    %14 = vector.broadcast %13 : vector<1x32xf32> to vector<40x32xf32>
    %15 = arith.addf %12, %14 : vector<40x32xf32>
    %c2 = arith.constant 2 : index
    %c0_14 = arith.constant 0 : index
    %16 = vector.load %arg3[%c2, %c0_14] : memref<104x48xf32, #tpu.memory_space<vmem>>, vector<1x32xf32>
    %c3 = arith.constant 3 : index
    %c0_15 = arith.constant 0 : index
    %17 = vector.load %arg3[%c3, %c0_15] : memref<104x48xf32, #tpu.memory_space<vmem>>, vector<1x32xf32>
    %cst_16 = arith.constant dense<0.000000e+00> : vector<40xf32>
    %18 = vector.multi_reduction <add>, %15, %cst_16 [1] : vector<40x32xf32> to vector<40xf32>
    %19 = vector.shape_cast %18 : vector<40xf32> to vector<40x1xf32>
    %cst_17 = arith.constant 3.200000e+01 : f32
    %20 = vector.broadcast %cst_17 : f32 to vector<40x1xf32>
    %21 = arith.divf %19, %20 : vector<40x1xf32>
    %22 = vector.broadcast %21 : vector<40x1xf32> to vector<40x32xf32>
    %23 = arith.subf %15, %22 : vector<40x32xf32>
    %24 = arith.mulf %23, %23 : vector<40x32xf32>
    %cst_18 = arith.constant dense<0.000000e+00> : vector<40xf32>
    %25 = vector.multi_reduction <add>, %24, %cst_18 [1] : vector<40x32xf32> to vector<40xf32>
    %26 = vector.shape_cast %25 : vector<40xf32> to vector<40x1xf32>
    %cst_19 = arith.constant 3.200000e+01 : f32
    %27 = vector.broadcast %cst_19 : f32 to vector<40x1xf32>
    %28 = arith.divf %26, %27 : vector<40x1xf32>
    %29 = vector.broadcast %21 : vector<40x1xf32> to vector<40x32xf32>
    %30 = arith.subf %15, %29 : vector<40x32xf32>
    %cst_20 = arith.constant 9.99999996E-13 : f32
    %31 = vector.broadcast %cst_20 : f32 to vector<40x1xf32>
    %32 = arith.addf %28, %31 : vector<40x1xf32>
    %33 = math.rsqrt %32 : vector<40x1xf32>
    %34 = vector.broadcast %33 : vector<40x1xf32> to vector<40x32xf32>
    %35 = arith.mulf %30, %34 : vector<40x32xf32>
    %36 = vector.broadcast %16 : vector<1x32xf32> to vector<40x32xf32>
    %37 = arith.mulf %35, %36 : vector<40x32xf32>
    %38 = vector.broadcast %17 : vector<1x32xf32> to vector<40x32xf32>
    %39 = arith.addf %37, %38 : vector<40x32xf32>
    %40 = vector.extract_strided_slice %39 {offsets = [0, 0], sizes = [32, 32], strides = [1, 1]} : vector<40x32xf32> to vector<32x32xf32>
    %c0_21 = arith.constant 0 : index
    %c0_22 = arith.constant 0 : index
    %41 = vector.load %arg1[%c0_21, %c0_22] : memref<48x32xf32, #tpu.memory_space<vmem>>, vector<16x32xf32>
    %42 = arith.truncf %41 : vector<16x32xf32> to vector<16x32xbf16>
    %c96 = arith.constant 96 : index
    %c0_23 = arith.constant 0 : index
    %43 = vector.load %arg2[%c96, %c0_23] : memref<576x48xbf16, #tpu.memory_space<vmem>>, vector<32x32xbf16>
    %cst_24 = arith.constant dense<0.000000e+00> : vector<16x32xf32>
    %44 = tpu.matmul %42, %43, %cst_24 {dimension_numbers = #tpu.dot_dimension_numbers<[1], [0], [0], [1], [0, 0, 1, 1], [], []>} : vector<16x32xbf16>, vector<32x32xbf16>, vector<16x32xf32> -> vector<16x32xf32>
    %c4 = arith.constant 4 : index
    %c0_25 = arith.constant 0 : index
    %45 = vector.load %arg3[%c4, %c0_25] : memref<104x48xf32, #tpu.memory_space<vmem>>, vector<1x32xf32>
    %46 = vector.broadcast %45 : vector<1x32xf32> to vector<16x32xf32>
    %47 = arith.addf %44, %46 : vector<16x32xf32>
    %48 = arith.truncf %39 : vector<40x32xf32> to vector<40x32xbf16>
    %c128 = arith.constant 128 : index
    %c0_26 = arith.constant 0 : index
    %49 = vector.load %arg2[%c128, %c0_26] : memref<576x48xbf16, #tpu.memory_space<vmem>>, vector<32x32xbf16>
    %cst_27 = arith.constant dense<0.000000e+00> : vector<40x32xf32>
    %50 = tpu.matmul %48, %49, %cst_27 {dimension_numbers = #tpu.dot_dimension_numbers<[1], [0], [0], [1], [0, 0, 1, 1], [], []>} : vector<40x32xbf16>, vector<32x32xbf16>, vector<40x32xf32> -> vector<40x32xf32>
    %c5 = arith.constant 5 : index
    %c0_28 = arith.constant 0 : index
    %51 = vector.load %arg3[%c5, %c0_28] : memref<104x48xf32, #tpu.memory_space<vmem>>, vector<1x32xf32>
    %52 = vector.broadcast %51 : vector<1x32xf32> to vector<40x32xf32>
    %53 = arith.addf %50, %52 : vector<40x32xf32>
    %54 = arith.truncf %39 : vector<40x32xf32> to vector<40x32xbf16>
    %c160 = arith.constant 160 : index
    %c0_29 = arith.constant 0 : index
    %55 = vector.load %arg2[%c160, %c0_29] : memref<576x48xbf16, #tpu.memory_space<vmem>>, vector<32x32xbf16>
    %cst_30 = arith.constant dense<0.000000e+00> : vector<40x32xf32>
    %56 = tpu.matmul %54, %55, %cst_30 {dimension_numbers = #tpu.dot_dimension_numbers<[1], [0], [0], [1], [0, 0, 1, 1], [], []>} : vector<40x32xbf16>, vector<32x32xbf16>, vector<40x32xf32> -> vector<40x32xf32>
    %c6 = arith.constant 6 : index
    %c0_31 = arith.constant 0 : index
    %57 = vector.load %arg3[%c6, %c0_31] : memref<104x48xf32, #tpu.memory_space<vmem>>, vector<1x32xf32>
    %58 = vector.broadcast %57 : vector<1x32xf32> to vector<40x32xf32>
    %59 = arith.addf %56, %58 : vector<40x32xf32>
    %60 = vector.extract_strided_slice %53 {offsets = [0, 0], sizes = [32, 32], strides = [1, 1]} : vector<40x32xf32> to vector<32x32xf32>
    %61 = vector.extract_strided_slice %59 {offsets = [0, 0], sizes = [32, 32], strides = [1, 1]} : vector<40x32xf32> to vector<32x32xf32>
    %62 = vector.extract_strided_slice %53 {offsets = [32, 0], sizes = [1, 32], strides = [1, 1]} : vector<40x32xf32> to vector<1x32xf32>
    %63 = vector.extract_strided_slice %59 {offsets = [32, 0], sizes = [1, 32], strides = [1, 1]} : vector<40x32xf32> to vector<1x32xf32>
    %c24 = arith.constant 24 : index
    %c0_32 = arith.constant 0 : index
    %64 = vector.load %arg1[%c24, %c0_32] : memref<48x32xf32, #tpu.memory_space<vmem>>, vector<16x32xf32>
    %cst_33 = arith.constant 0.000000e+00 : f32
    %65 = vector.broadcast %cst_33 : f32 to vector<16x32xf32>
    %66 = arith.cmpf ogt, %64, %65 : vector<16x32xf32>
    %67 = arith.truncf %47 : vector<16x32xf32> to vector<16x32xbf16>
    %68 = arith.truncf %60 : vector<32x32xf32> to vector<32x32xbf16>
    %cst_34 = arith.constant dense<0.000000e+00> : vector<16x32xf32>
    %69 = tpu.matmul %67, %68, %cst_34 {dimension_numbers = #tpu.dot_dimension_numbers<[1], [1], [0], [0], [0, 0, 1, 0], [], []>} : vector<16x32xbf16>, vector<32x32xbf16>, vector<16x32xf32> -> vector<16x32xf32>
    %cst_35 = arith.constant 0.176776692 : f32
    %70 = vector.broadcast %cst_35 : f32 to vector<16x32xf32>
    %71 = arith.mulf %69, %70 : vector<16x32xf32>
    %cst_36 = arith.constant -1.000000e+30 : f32
    %72 = vector.broadcast %cst_36 : f32 to vector<16x32xf32>
    %73 = arith.select %66, %71, %72 : vector<16x32xi1>, vector<16x32xf32>
    %74 = vector.broadcast %62 : vector<1x32xf32> to vector<16x32xf32>
    %75 = arith.mulf %47, %74 : vector<16x32xf32>
    %cst_37 = arith.constant dense<0.000000e+00> : vector<16xf32>
    %76 = vector.multi_reduction <add>, %75, %cst_37 [1] : vector<16x32xf32> to vector<16xf32>
    %77 = vector.shape_cast %76 : vector<16xf32> to vector<16x1xf32>
    %cst_38 = arith.constant 0.176776692 : f32
    %78 = vector.broadcast %cst_38 : f32 to vector<16x1xf32>
    %79 = arith.mulf %77, %78 : vector<16x1xf32>
    %cst_39 = arith.constant dense<0xFF800000> : vector<16xf32>
    %80 = vector.multi_reduction <maximumf>, %73, %cst_39 [1] : vector<16x32xf32> to vector<16xf32>
    %81 = vector.shape_cast %80 : vector<16xf32> to vector<16x1xf32>
    %82 = arith.maximumf %81, %79 : vector<16x1xf32>
    %83 = vector.broadcast %82 : vector<16x1xf32> to vector<16x32xf32>
    %84 = arith.subf %73, %83 : vector<16x32xf32>
    %85 = math.exp %84 : vector<16x32xf32>
    %86 = arith.subf %79, %82 : vector<16x1xf32>
    %87 = math.exp %86 : vector<16x1xf32>
    %cst_40 = arith.constant dense<0.000000e+00> : vector<16xf32>
    %88 = vector.multi_reduction <add>, %85, %cst_40 [1] : vector<16x32xf32> to vector<16xf32>
    %89 = vector.shape_cast %88 : vector<16xf32> to vector<16x1xf32>
    %90 = arith.addf %89, %87 : vector<16x1xf32>
    %91 = tpu.reciprocal %90 {approx = true} : vector<16x1xf32> -> vector<16x1xf32>
    %92 = arith.truncf %85 : vector<16x32xf32> to vector<16x32xbf16>
    %93 = arith.truncf %61 : vector<32x32xf32> to vector<32x32xbf16>
    %cst_41 = arith.constant dense<0.000000e+00> : vector<16x32xf32>
    %94 = tpu.matmul %92, %93, %cst_41 {dimension_numbers = #tpu.dot_dimension_numbers<[1], [0], [0], [1], [0, 0, 1, 1], [], []>} : vector<16x32xbf16>, vector<32x32xbf16>, vector<16x32xf32> -> vector<16x32xf32>
    %95 = vector.broadcast %87 : vector<16x1xf32> to vector<16x32xf32>
    %96 = vector.broadcast %63 : vector<1x32xf32> to vector<16x32xf32>
    %97 = arith.mulf %95, %96 : vector<16x32xf32>
    %98 = arith.addf %94, %97 : vector<16x32xf32>
    %99 = vector.broadcast %91 : vector<16x1xf32> to vector<16x32xf32>
    %100 = arith.mulf %98, %99 : vector<16x32xf32>
    %101 = arith.truncf %100 : vector<16x32xf32> to vector<16x32xbf16>
    %c192 = arith.constant 192 : index
    %c0_42 = arith.constant 0 : index
    %102 = vector.load %arg2[%c192, %c0_42] : memref<576x48xbf16, #tpu.memory_space<vmem>>, vector<32x32xbf16>
    %cst_43 = arith.constant dense<0.000000e+00> : vector<16x32xf32>
    %103 = tpu.matmul %101, %102, %cst_43 {dimension_numbers = #tpu.dot_dimension_numbers<[1], [0], [0], [1], [0, 0, 1, 1], [], []>} : vector<16x32xbf16>, vector<32x32xbf16>, vector<16x32xf32> -> vector<16x32xf32>
    %104 = arith.addf %41, %103 : vector<16x32xf32>
    %c7 = arith.constant 7 : index
    %c0_44 = arith.constant 0 : index
    %105 = vector.load %arg3[%c7, %c0_44] : memref<104x48xf32, #tpu.memory_space<vmem>>, vector<1x32xf32>
    %106 = vector.broadcast %105 : vector<1x32xf32> to vector<16x32xf32>
    %107 = arith.addf %104, %106 : vector<16x32xf32>
    %c8 = arith.constant 8 : index
    %c0_45 = arith.constant 0 : index
    %108 = vector.load %arg3[%c8, %c0_45] : memref<104x48xf32, #tpu.memory_space<vmem>>, vector<1x32xf32>
    %c9 = arith.constant 9 : index
    %c0_46 = arith.constant 0 : index
    %109 = vector.load %arg3[%c9, %c0_46] : memref<104x48xf32, #tpu.memory_space<vmem>>, vector<1x32xf32>
    %cst_47 = arith.constant dense<0.000000e+00> : vector<16xf32>
    %110 = vector.multi_reduction <add>, %107, %cst_47 [1] : vector<16x32xf32> to vector<16xf32>
    %111 = vector.shape_cast %110 : vector<16xf32> to vector<16x1xf32>
    %cst_48 = arith.constant 3.200000e+01 : f32
    %112 = vector.broadcast %cst_48 : f32 to vector<16x1xf32>
    %113 = arith.divf %111, %112 : vector<16x1xf32>
    %114 = vector.broadcast %113 : vector<16x1xf32> to vector<16x32xf32>
    %115 = arith.subf %107, %114 : vector<16x32xf32>
    %116 = arith.mulf %115, %115 : vector<16x32xf32>
    %cst_49 = arith.constant dense<0.000000e+00> : vector<16xf32>
    %117 = vector.multi_reduction <add>, %116, %cst_49 [1] : vector<16x32xf32> to vector<16xf32>
    %118 = vector.shape_cast %117 : vector<16xf32> to vector<16x1xf32>
    %cst_50 = arith.constant 3.200000e+01 : f32
    %119 = vector.broadcast %cst_50 : f32 to vector<16x1xf32>
    %120 = arith.divf %118, %119 : vector<16x1xf32>
    %121 = vector.broadcast %113 : vector<16x1xf32> to vector<16x32xf32>
    %122 = arith.subf %107, %121 : vector<16x32xf32>
    %cst_51 = arith.constant 9.99999996E-13 : f32
    %123 = vector.broadcast %cst_51 : f32 to vector<16x1xf32>
    %124 = arith.addf %120, %123 : vector<16x1xf32>
    %125 = math.rsqrt %124 : vector<16x1xf32>
    %126 = vector.broadcast %125 : vector<16x1xf32> to vector<16x32xf32>
    %127 = arith.mulf %122, %126 : vector<16x32xf32>
    %128 = vector.broadcast %108 : vector<1x32xf32> to vector<16x32xf32>
    %129 = arith.mulf %127, %128 : vector<16x32xf32>
    %130 = vector.broadcast %109 : vector<1x32xf32> to vector<16x32xf32>
    %131 = arith.addf %129, %130 : vector<16x32xf32>
    %c56 = arith.constant 56 : index
    %c0_52 = arith.constant 0 : index
    %132 = vector.load %arg3[%c56, %c0_52] : memref<104x48xf32, #tpu.memory_space<vmem>>, vector<2x16xf32>
    %133 = arith.truncf %132 : vector<2x16xf32> to vector<2x16xbf16>
    %134 = arith.truncf %131 : vector<16x32xf32> to vector<16x32xbf16>
    %cst_53 = arith.constant dense<0.000000e+00> : vector<2x32xf32>
    %135 = tpu.matmul %133, %134, %cst_53 {dimension_numbers = #tpu.dot_dimension_numbers<[1], [0], [0], [1], [0, 0, 1, 1], [], []>} : vector<2x16xbf16>, vector<16x32xbf16>, vector<2x32xf32> -> vector<2x32xf32>
    %c16 = arith.constant 16 : index
    %c0_54 = arith.constant 0 : index
    %136 = vector.load %arg1[%c16, %c0_54] : memref<48x32xf32, #tpu.memory_space<vmem>>, vector<2x16xf32>
    %c40 = arith.constant 40 : index
    %c0_55 = arith.constant 0 : index
    %137 = vector.load %arg1[%c40, %c0_55] : memref<48x32xf32, #tpu.memory_space<vmem>>, vector<2x32xf32>
    %c10 = arith.constant 10 : index
    %c0_56 = arith.constant 0 : index
    %138 = vector.load %arg3[%c10, %c0_56] : memref<104x48xf32, #tpu.memory_space<vmem>>, vector<1x32xf32>
    %cst_57 = arith.constant 0.000000e+00 : f32
    %139 = vector.broadcast %cst_57 : f32 to vector<2x32xf32>
    %140 = vector.broadcast %138 : vector<1x32xf32> to vector<2x32xf32>
    %141 = arith.addf %140, %139 : vector<2x32xf32>
    %cst_58 = arith.constant 0.000000e+00 : f32
    %142 = vector.broadcast %cst_58 : f32 to vector<2x32xf32>
    %cst_59 = arith.constant 0.000000e+00 : f32
    %143 = vector.broadcast %cst_59 : f32 to vector<8x32xf32>
    %144 = tpu.iota {dimensions = array<i32: 1>} : vector<2x8xi32>
    %145 = tpu.iota {dimensions = array<i32: 0>} : vector<2x8xi32>
    %c4_i32 = arith.constant 4 : i32
    %146 = vector.broadcast %c4_i32 : i32 to vector<2x8xi32>
    %147 = arith.muli %146, %145 : vector<2x8xi32>
    %148 = arith.cmpi eq, %144, %147 : vector<2x8xi32>
    %149 = arith.extui %148 : vector<2x8xi1> to vector<2x8xi32>
    %150 = arith.sitofp %149 : vector<2x8xi32> to vector<2x8xf32>
    %151 = arith.truncf %135 : vector<2x32xf32> to vector<2x32xbf16>
    %c224 = arith.constant 224 : index
    %c0_60 = arith.constant 0 : index
    %152 = vector.load %arg2[%c224, %c0_60] : memref<576x48xbf16, #tpu.memory_space<vmem>>, vector<32x32xbf16>
    %cst_61 = arith.constant dense<0.000000e+00> : vector<2x32xf32>
    %153 = tpu.matmul %151, %152, %cst_61 {dimension_numbers = #tpu.dot_dimension_numbers<[1], [0], [0], [1], [0, 0, 1, 1], [], []>} : vector<2x32xbf16>, vector<32x32xbf16>, vector<2x32xf32> -> vector<2x32xf32>
    %c11 = arith.constant 11 : index
    %c0_62 = arith.constant 0 : index
    %154 = vector.load %arg3[%c11, %c0_62] : memref<104x48xf32, #tpu.memory_space<vmem>>, vector<1x32xf32>
    %155 = vector.broadcast %154 : vector<1x32xf32> to vector<2x32xf32>
    %156 = arith.addf %153, %155 : vector<2x32xf32>
    %157 = arith.truncf %141 : vector<2x32xf32> to vector<2x32xbf16>
    %c320 = arith.constant 320 : index
    %c0_63 = arith.constant 0 : index
    %158 = vector.load %arg2[%c320, %c0_63] : memref<576x48xbf16, #tpu.memory_space<vmem>>, vector<32x32xbf16>
    %cst_64 = arith.constant dense<0.000000e+00> : vector<2x32xf32>
    %159 = tpu.matmul %157, %158, %cst_64 {dimension_numbers = #tpu.dot_dimension_numbers<[1], [0], [0], [1], [0, 0, 1, 1], [], []>} : vector<2x32xbf16>, vector<32x32xbf16>, vector<2x32xf32> -> vector<2x32xf32>
    %160 = arith.truncf %156 : vector<2x32xf32> to vector<2x32xbf16>
    %c352 = arith.constant 352 : index
    %c0_65 = arith.constant 0 : index
    %161 = vector.load %arg2[%c352, %c0_65] : memref<576x48xbf16, #tpu.memory_space<vmem>>, vector<32x32xbf16>
    %cst_66 = arith.constant dense<0.000000e+00> : vector<2x32xf32>
    %162 = tpu.matmul %160, %161, %cst_66 {dimension_numbers = #tpu.dot_dimension_numbers<[1], [0], [0], [1], [0, 0, 1, 1], [], []>} : vector<2x32xbf16>, vector<32x32xbf16>, vector<2x32xf32> -> vector<2x32xf32>
    %163 = arith.addf %159, %162 : vector<2x32xf32>
    %c14 = arith.constant 14 : index
    %c0_67 = arith.constant 0 : index
    %164 = vector.load %arg3[%c14, %c0_67] : memref<104x48xf32, #tpu.memory_space<vmem>>, vector<1x32xf32>
    %165 = vector.broadcast %164 : vector<1x32xf32> to vector<2x32xf32>
    %166 = arith.addf %163, %165 : vector<2x32xf32>
    %167 = arith.truncf %166 : vector<2x32xf32> to vector<2x32xbf16>
    %c544 = arith.constant 544 : index
    %c0_68 = arith.constant 0 : index
    %168 = vector.load %arg2[%c544, %c0_68] : memref<576x48xbf16, #tpu.memory_space<vmem>>, vector<32x5xbf16>
    %cst_69 = arith.constant dense<0.000000e+00> : vector<2x5xf32>
    %169 = tpu.matmul %167, %168, %cst_69 {dimension_numbers = #tpu.dot_dimension_numbers<[1], [0], [0], [1], [0, 0, 1, 1], [], []>} : vector<2x32xbf16>, vector<32x5xbf16>, vector<2x5xf32> -> vector<2x5xf32>
    %c15 = arith.constant 15 : index
    %c0_70 = arith.constant 0 : index
    %170 = vector.load %arg3[%c15, %c0_70] : memref<104x48xf32, #tpu.memory_space<vmem>>, vector<1x5xf32>
    %171 = vector.broadcast %170 : vector<1x5xf32> to vector<2x5xf32>
    %172 = arith.addf %169, %171 : vector<2x5xf32>
    %cst_71 = arith.constant dense<0xFF800000> : vector<2xf32>
    %173 = vector.multi_reduction <maximumf>, %172, %cst_71 [1] : vector<2x5xf32> to vector<2xf32>
    %174 = vector.shape_cast %173 : vector<2xf32> to vector<2x1xf32>
    %175 = vector.broadcast %174 : vector<2x1xf32> to vector<2x5xf32>
    %176 = arith.subf %172, %175 : vector<2x5xf32>
    %177 = math.exp %176 : vector<2x5xf32>
    %cst_72 = arith.constant dense<0.000000e+00> : vector<2xf32>
    %178 = vector.multi_reduction <add>, %177, %cst_72 [1] : vector<2x5xf32> to vector<2xf32>
    %179 = vector.shape_cast %178 : vector<2xf32> to vector<2x1xf32>
    %180 = vector.broadcast %179 : vector<2x1xf32> to vector<2x5xf32>
    %181 = arith.divf %177, %180 : vector<2x5xf32>
    %c16_73 = arith.constant 16 : index
    %c0_74 = arith.constant 0 : index
    %182 = vector.load %arg3[%c16_73, %c0_74] : memref<104x48xf32, #tpu.memory_space<vmem>>, vector<1x32xf32>
    %183 = vector.broadcast %182 : vector<1x32xf32> to vector<2x32xf32>
    %184 = arith.mulf %166, %183 : vector<2x32xf32>
    %185 = arith.truncf %184 : vector<2x32xf32> to vector<2x32xbf16>
    %186 = arith.truncf %131 : vector<16x32xf32> to vector<16x32xbf16>
    %cst_75 = arith.constant dense<0.000000e+00> : vector<2x16xf32>
    %187 = tpu.matmul %185, %186, %cst_75 {dimension_numbers = #tpu.dot_dimension_numbers<[1], [1], [0], [0], [0, 0, 1, 0], [], []>} : vector<2x32xbf16>, vector<16x32xbf16>, vector<2x16xf32> -> vector<2x16xf32>
    %c17 = arith.constant 17 : index
    %c0_76 = arith.constant 0 : index
    %188 = vector.load %arg3[%c17, %c0_76] : memref<104x48xf32, #tpu.memory_space<vmem>>, vector<1x1xf32>
    %189 = vector.broadcast %188 : vector<1x1xf32> to vector<2x16xf32>
    %190 = arith.addf %187, %189 : vector<2x16xf32>
    %cst_77 = arith.constant 0.000000e+00 : f32
    %191 = vector.broadcast %cst_77 : f32 to vector<2x16xf32>
    %192 = arith.cmpf ogt, %136, %191 : vector<2x16xf32>
    %cst_78 = arith.constant -1.000000e+30 : f32
    %193 = vector.broadcast %cst_78 : f32 to vector<2x16xf32>
    %194 = arith.select %192, %190, %193 : vector<2x16xi1>, vector<2x16xf32>
    %cst_79 = arith.constant dense<0xFF800000> : vector<2xf32>
    %195 = vector.multi_reduction <maximumf>, %194, %cst_79 [1] : vector<2x16xf32> to vector<2xf32>
    %196 = vector.shape_cast %195 : vector<2xf32> to vector<2x1xf32>
    %197 = vector.broadcast %196 : vector<2x1xf32> to vector<2x16xf32>
    %198 = arith.subf %194, %197 : vector<2x16xf32>
    %199 = math.exp %198 : vector<2x16xf32>
    %cst_80 = arith.constant dense<0.000000e+00> : vector<2xf32>
    %200 = vector.multi_reduction <add>, %199, %cst_80 [1] : vector<2x16xf32> to vector<2xf32>
    %201 = vector.shape_cast %200 : vector<2xf32> to vector<2x1xf32>
    %202 = tpu.reciprocal %201 {approx = true} : vector<2x1xf32> -> vector<2x1xf32>
    %203 = vector.broadcast %202 : vector<2x1xf32> to vector<2x16xf32>
    %204 = arith.mulf %199, %203 : vector<2x16xf32>
    %205 = arith.truncf %204 : vector<2x16xf32> to vector<2x16xbf16>
    %206 = arith.truncf %131 : vector<16x32xf32> to vector<16x32xbf16>
    %cst_81 = arith.constant dense<0.000000e+00> : vector<2x32xf32>
    %207 = tpu.matmul %205, %206, %cst_81 {dimension_numbers = #tpu.dot_dimension_numbers<[1], [0], [0], [1], [0, 0, 1, 1], [], []>} : vector<2x16xbf16>, vector<16x32xbf16>, vector<2x32xf32> -> vector<2x32xf32>
    %c24_82 = arith.constant 24 : index
    %c0_83 = arith.constant 0 : index
    %208 = vector.load %arg3[%c24_82, %c0_83] : memref<104x48xf32, #tpu.memory_space<vmem>>, vector<8x5xf32>
    %cst_84 = arith.constant dense<0.000000e+00> : vector<2x5xf32>
    %209 = tpu.matmul %150, %208, %cst_84 {dimension_numbers = #tpu.dot_dimension_numbers<[1], [0], [0], [1], [0, 0, 1, 1], [], []>} : vector<2x8xf32>, vector<8x5xf32>, vector<2x5xf32> -> vector<2x5xf32>
    %210 = arith.mulf %181, %209 : vector<2x5xf32>
    %cst_85 = arith.constant dense<0.000000e+00> : vector<2xf32>
    %211 = vector.multi_reduction <add>, %210, %cst_85 [1] : vector<2x5xf32> to vector<2xf32>
    %212 = vector.shape_cast %211 : vector<2xf32> to vector<2x1xf32>
    %213 = vector.broadcast %212 : vector<2x1xf32> to vector<2x5xf32>
    %214 = arith.divf %210, %213 : vector<2x5xf32>
    %c64 = arith.constant 64 : index
    %c0_86 = arith.constant 0 : index
    %215 = vector.load %arg3[%c64, %c0_86] : memref<104x48xf32, #tpu.memory_space<vmem>>, vector<8x8xf32>
    %c48_87 = arith.constant 48 : index
    %c0_88 = arith.constant 0 : index
    %216 = vector.load %arg3[%c48_87, %c0_88] : memref<104x48xf32, #tpu.memory_space<vmem>>, vector<8x2xf32>
    %cst_89 = arith.constant dense<0.000000e+00> : vector<2x32xf32>
    %217 = tpu.matmul %150, %143, %cst_89 {dimension_numbers = #tpu.dot_dimension_numbers<[1], [0], [0], [1], [0, 0, 1, 1], [], []>} : vector<2x8xf32>, vector<8x32xf32>, vector<2x32xf32> -> vector<2x32xf32>
    %218 = arith.truncf %217 : vector<2x32xf32> to vector<2x32xbf16>
    %219 = arith.truncf %40 : vector<32x32xf32> to vector<32x32xbf16>
    %cst_90 = arith.constant dense<0.000000e+00> : vector<2x32xf32>
    %220 = tpu.matmul %218, %219, %cst_90 {dimension_numbers = #tpu.dot_dimension_numbers<[1], [0], [0], [1], [0, 0, 1, 1], [], []>} : vector<2x32xbf16>, vector<32x32xbf16>, vector<2x32xf32> -> vector<2x32xf32>
    %221 = arith.truncf %207 : vector<2x32xf32> to vector<2x32xbf16>
    %c384 = arith.constant 384 : index
    %c0_91 = arith.constant 0 : index
    %222 = vector.load %arg2[%c384, %c0_91] : memref<576x48xbf16, #tpu.memory_space<vmem>>, vector<32x32xbf16>
    %cst_92 = arith.constant dense<0.000000e+00> : vector<2x32xf32>
    %223 = tpu.matmul %221, %222, %cst_92 {dimension_numbers = #tpu.dot_dimension_numbers<[1], [0], [0], [1], [0, 0, 1, 1], [], []>} : vector<2x32xbf16>, vector<32x32xbf16>, vector<2x32xf32> -> vector<2x32xf32>
    %cst_93 = arith.constant 0.000000e+00 : f32
    %224 = vector.broadcast %cst_93 : f32 to vector<2x32xf32>
    %225 = arith.cmpf ogt, %137, %224 : vector<2x32xf32>
    %226 = arith.truncf %223 : vector<2x32xf32> to vector<2x32xbf16>
    %227 = arith.truncf %40 : vector<32x32xf32> to vector<32x32xbf16>
    %cst_94 = arith.constant dense<0.000000e+00> : vector<2x32xf32>
    %228 = tpu.matmul %226, %227, %cst_94 {dimension_numbers = #tpu.dot_dimension_numbers<[1], [1], [0], [0], [0, 0, 1, 0], [], []>} : vector<2x32xbf16>, vector<32x32xbf16>, vector<2x32xf32> -> vector<2x32xf32>
    %cst_95 = arith.constant -1.000000e+30 : f32
    %229 = vector.broadcast %cst_95 : f32 to vector<2x32xf32>
    %230 = arith.select %225, %228, %229 : vector<2x32xi1>, vector<2x32xf32>
    %cst_96 = arith.constant dense<0xFF800000> : vector<2xf32>
    %231 = vector.multi_reduction <maximumf>, %230, %cst_96 [1] : vector<2x32xf32> to vector<2xf32>
    %232 = vector.shape_cast %231 : vector<2xf32> to vector<2x1xf32>
    %233 = vector.broadcast %232 : vector<2x1xf32> to vector<2x32xf32>
    %234 = arith.subf %230, %233 : vector<2x32xf32>
    %235 = math.exp %234 : vector<2x32xf32>
    %cst_97 = arith.constant dense<0.000000e+00> : vector<2xf32>
    %236 = vector.multi_reduction <add>, %235, %cst_97 [1] : vector<2x32xf32> to vector<2xf32>
    %237 = vector.shape_cast %236 : vector<2xf32> to vector<2x1xf32>
    %238 = tpu.reciprocal %237 {approx = true} : vector<2x1xf32> -> vector<2x1xf32>
    %239 = vector.broadcast %238 : vector<2x1xf32> to vector<2x32xf32>
    %240 = arith.mulf %235, %239 : vector<2x32xf32>
    %c32 = arith.constant 32 : index
    %c0_98 = arith.constant 0 : index
    %241 = vector.load %arg3[%c32, %c0_98] : memref<104x48xf32, #tpu.memory_space<vmem>>, vector<8x8xf32>
    %cst_99 = arith.constant dense<0.000000e+00> : vector<2x8xf32>
    %242 = tpu.matmul %150, %241, %cst_99 {dimension_numbers = #tpu.dot_dimension_numbers<[1], [0], [0], [1], [0, 0, 1, 1], [], []>} : vector<2x8xf32>, vector<8x8xf32>, vector<2x8xf32> -> vector<2x8xf32>
    %cst_100 = arith.constant dense<0.000000e+00> : vector<8xf32>
    %243 = vector.multi_reduction <add>, %242, %cst_100 [0] : vector<2x8xf32> to vector<8xf32>
    %244 = vector.shape_cast %243 : vector<8xf32> to vector<1x8xf32>
    %245 = vector.broadcast %244 : vector<1x8xf32> to vector<8x8xf32>
    %246 = arith.mulf %215, %245 : vector<8x8xf32>
    %cst_101 = arith.constant dense<0.000000e+00> : vector<8xf32>
    %247 = vector.multi_reduction <add>, %246, %cst_101 [1] : vector<8x8xf32> to vector<8xf32>
    %248 = vector.shape_cast %247 : vector<8xf32> to vector<8x1xf32>
    %cst_102 = arith.constant dense<0.000000e+00> : vector<8x32xf32>
    %249 = tpu.matmul %216, %240, %cst_102 {dimension_numbers = #tpu.dot_dimension_numbers<[1], [0], [0], [1], [0, 0, 1, 1], [], []>} : vector<8x2xf32>, vector<2x32xf32>, vector<8x32xf32> -> vector<8x32xf32>
    %250 = arith.subf %249, %143 : vector<8x32xf32>
    %251 = vector.broadcast %248 : vector<8x1xf32> to vector<8x32xf32>
    %252 = arith.mulf %251, %250 : vector<8x32xf32>
    %253 = arith.addf %143, %252 : vector<8x32xf32>
    %254 = arith.truncf %220 : vector<2x32xf32> to vector<2x32xbf16>
    %c416 = arith.constant 416 : index
    %c0_103 = arith.constant 0 : index
    %255 = vector.load %arg2[%c416, %c0_103] : memref<576x48xbf16, #tpu.memory_space<vmem>>, vector<32x32xbf16>
    %cst_104 = arith.constant dense<0.000000e+00> : vector<2x32xf32>
    %256 = tpu.matmul %254, %255, %cst_104 {dimension_numbers = #tpu.dot_dimension_numbers<[1], [0], [0], [1], [0, 0, 1, 1], [], []>} : vector<2x32xbf16>, vector<32x32xbf16>, vector<2x32xf32> -> vector<2x32xf32>
    %257 = arith.truncf %207 : vector<2x32xf32> to vector<2x32xbf16>
    %c448 = arith.constant 448 : index
    %c0_105 = arith.constant 0 : index
    %258 = vector.load %arg2[%c448, %c0_105] : memref<576x48xbf16, #tpu.memory_space<vmem>>, vector<32x32xbf16>
    %cst_106 = arith.constant dense<0.000000e+00> : vector<2x32xf32>
    %259 = tpu.matmul %257, %258, %cst_106 {dimension_numbers = #tpu.dot_dimension_numbers<[1], [0], [0], [1], [0, 0, 1, 1], [], []>} : vector<2x32xbf16>, vector<32x32xbf16>, vector<2x32xf32> -> vector<2x32xf32>
    %260 = arith.addf %256, %259 : vector<2x32xf32>
    %c18 = arith.constant 18 : index
    %c0_107 = arith.constant 0 : index
    %261 = vector.load %arg3[%c18, %c0_107] : memref<104x48xf32, #tpu.memory_space<vmem>>, vector<1x32xf32>
    %262 = vector.broadcast %261 : vector<1x32xf32> to vector<2x32xf32>
    %263 = arith.addf %260, %262 : vector<2x32xf32>
    %cst_108 = arith.constant 0.000000e+00 : f32
    %264 = vector.broadcast %cst_108 : f32 to vector<2x32xf32>
    %265 = arith.cmpf ogt, %137, %264 : vector<2x32xf32>
    %266 = arith.truncf %263 : vector<2x32xf32> to vector<2x32xbf16>
    %267 = arith.truncf %40 : vector<32x32xf32> to vector<32x32xbf16>
    %cst_109 = arith.constant dense<0.000000e+00> : vector<2x32xf32>
    %268 = tpu.matmul %266, %267, %cst_109 {dimension_numbers = #tpu.dot_dimension_numbers<[1], [1], [0], [0], [0, 0, 1, 0], [], []>} : vector<2x32xbf16>, vector<32x32xbf16>, vector<2x32xf32> -> vector<2x32xf32>
    %cst_110 = arith.constant -1.000000e+30 : f32
    %269 = vector.broadcast %cst_110 : f32 to vector<2x32xf32>
    %270 = arith.select %265, %268, %269 : vector<2x32xi1>, vector<2x32xf32>
    %cst_111 = arith.constant dense<0xFF800000> : vector<2xf32>
    %271 = vector.multi_reduction <maximumf>, %270, %cst_111 [1] : vector<2x32xf32> to vector<2xf32>
    %272 = vector.shape_cast %271 : vector<2xf32> to vector<2x1xf32>
    %273 = vector.broadcast %272 : vector<2x1xf32> to vector<2x32xf32>
    %274 = arith.subf %270, %273 : vector<2x32xf32>
    %275 = math.exp %274 : vector<2x32xf32>
    %cst_112 = arith.constant dense<0.000000e+00> : vector<2xf32>
    %276 = vector.multi_reduction <add>, %275, %cst_112 [1] : vector<2x32xf32> to vector<2xf32>
    %277 = vector.shape_cast %276 : vector<2xf32> to vector<2x1xf32>
    %278 = tpu.reciprocal %277 {approx = true} : vector<2x1xf32> -> vector<2x1xf32>
    %279 = vector.broadcast %278 : vector<2x1xf32> to vector<2x32xf32>
    %280 = arith.mulf %275, %279 : vector<2x32xf32>
    %cst_113 = arith.constant dense<0.000000e+00> : vector<8xf32>
    %281 = vector.multi_reduction <add>, %150, %cst_113 [0] : vector<2x8xf32> to vector<8xf32>
    %282 = vector.shape_cast %281 : vector<8xf32> to vector<1x8xf32>
    %283 = vector.broadcast %282 : vector<1x8xf32> to vector<8x8xf32>
    %284 = arith.mulf %215, %283 : vector<8x8xf32>
    %cst_114 = arith.constant dense<0.000000e+00> : vector<8xf32>
    %285 = vector.multi_reduction <add>, %284, %cst_114 [1] : vector<8x8xf32> to vector<8xf32>
    %286 = vector.shape_cast %285 : vector<8xf32> to vector<8x1xf32>
    %cst_115 = arith.constant dense<0.000000e+00> : vector<8x32xf32>
    %287 = tpu.matmul %216, %280, %cst_115 {dimension_numbers = #tpu.dot_dimension_numbers<[1], [0], [0], [1], [0, 0, 1, 1], [], []>} : vector<8x2xf32>, vector<2x32xf32>, vector<8x32xf32> -> vector<8x32xf32>
    %288 = arith.subf %287, %143 : vector<8x32xf32>
    %289 = vector.broadcast %286 : vector<8x1xf32> to vector<8x32xf32>
    %290 = arith.mulf %289, %288 : vector<8x32xf32>
    %291 = arith.addf %143, %290 : vector<8x32xf32>
    %c40_116 = arith.constant 40 : index
    %c0_117 = arith.constant 0 : index
    %292 = vector.load %arg3[%c40_116, %c0_117] : memref<104x48xf32, #tpu.memory_space<vmem>>, vector<8x8xf32>
    %cst_118 = arith.constant dense<0.000000e+00> : vector<2x8xf32>
    %293 = tpu.matmul %150, %292, %cst_118 {dimension_numbers = #tpu.dot_dimension_numbers<[1], [0], [0], [1], [0, 0, 1, 1], [], []>} : vector<2x8xf32>, vector<8x8xf32>, vector<2x8xf32> -> vector<2x8xf32>
    %cst_119 = arith.constant dense<0.000000e+00> : vector<2x32xf32>
    %294 = tpu.matmul %293, %143, %cst_119 {dimension_numbers = #tpu.dot_dimension_numbers<[1], [0], [0], [1], [0, 0, 1, 1], [], []>} : vector<2x8xf32>, vector<8x32xf32>, vector<2x32xf32> -> vector<2x32xf32>
    %cst_120 = arith.constant dense<0.000000e+00> : vector<8xf32>
    %295 = vector.multi_reduction <add>, %293, %cst_120 [0] : vector<2x8xf32> to vector<8xf32>
    %296 = vector.shape_cast %295 : vector<8xf32> to vector<1x8xf32>
    %297 = vector.broadcast %296 : vector<1x8xf32> to vector<8x8xf32>
    %298 = arith.mulf %215, %297 : vector<8x8xf32>
    %cst_121 = arith.constant dense<0.000000e+00> : vector<8xf32>
    %299 = vector.multi_reduction <add>, %298, %cst_121 [1] : vector<8x8xf32> to vector<8xf32>
    %300 = vector.shape_cast %299 : vector<8xf32> to vector<8x1xf32>
    %301 = arith.minimumf %217, %294 : vector<2x32xf32>
    %cst_122 = arith.constant dense<0.000000e+00> : vector<8x32xf32>
    %302 = tpu.matmul %216, %301, %cst_122 {dimension_numbers = #tpu.dot_dimension_numbers<[1], [0], [0], [1], [0, 0, 1, 1], [], []>} : vector<8x2xf32>, vector<2x32xf32>, vector<8x32xf32> -> vector<8x32xf32>
    %303 = arith.subf %302, %143 : vector<8x32xf32>
    %304 = vector.broadcast %300 : vector<8x1xf32> to vector<8x32xf32>
    %305 = arith.mulf %304, %303 : vector<8x32xf32>
    %306 = arith.addf %143, %305 : vector<8x32xf32>
    %307 = arith.truncf %207 : vector<2x32xf32> to vector<2x32xbf16>
    %c480 = arith.constant 480 : index
    %c0_123 = arith.constant 0 : index
    %308 = vector.load %arg2[%c480, %c0_123] : memref<576x48xbf16, #tpu.memory_space<vmem>>, vector<32x32xbf16>
    %cst_124 = arith.constant dense<0.000000e+00> : vector<2x32xf32>
    %309 = tpu.matmul %307, %308, %cst_124 {dimension_numbers = #tpu.dot_dimension_numbers<[1], [0], [0], [1], [0, 0, 1, 1], [], []>} : vector<2x32xbf16>, vector<32x32xbf16>, vector<2x32xf32> -> vector<2x32xf32>
    %310 = arith.truncf %220 : vector<2x32xf32> to vector<2x32xbf16>
    %c512 = arith.constant 512 : index
    %c0_125 = arith.constant 0 : index
    %311 = vector.load %arg2[%c512, %c0_125] : memref<576x48xbf16, #tpu.memory_space<vmem>>, vector<32x32xbf16>
    %cst_126 = arith.constant dense<0.000000e+00> : vector<2x32xf32>
    %312 = tpu.matmul %310, %311, %cst_126 {dimension_numbers = #tpu.dot_dimension_numbers<[1], [0], [0], [1], [0, 0, 1, 1], [], []>} : vector<2x32xbf16>, vector<32x32xbf16>, vector<2x32xf32> -> vector<2x32xf32>
    %313 = arith.addf %309, %312 : vector<2x32xf32>
    %c19 = arith.constant 19 : index
    %c0_127 = arith.constant 0 : index
    %314 = vector.load %arg3[%c19, %c0_127] : memref<104x48xf32, #tpu.memory_space<vmem>>, vector<1x32xf32>
    %315 = vector.broadcast %314 : vector<1x32xf32> to vector<2x32xf32>
    %316 = arith.addf %313, %315 : vector<2x32xf32>
    %317 = math.tanh %316 : vector<2x32xf32>
    %318 = vector.extract_strided_slice %214 {offsets = [0, 0], sizes = [2, 1], strides = [1, 1]} : vector<2x5xf32> to vector<2x1xf32>
    %319 = vector.extract_strided_slice %214 {offsets = [0, 1], sizes = [2, 1], strides = [1, 1]} : vector<2x5xf32> to vector<2x1xf32>
    %320 = vector.extract_strided_slice %214 {offsets = [0, 2], sizes = [2, 1], strides = [1, 1]} : vector<2x5xf32> to vector<2x1xf32>
    %321 = vector.extract_strided_slice %214 {offsets = [0, 3], sizes = [2, 1], strides = [1, 1]} : vector<2x5xf32> to vector<2x1xf32>
    %322 = vector.extract_strided_slice %214 {offsets = [0, 4], sizes = [2, 1], strides = [1, 1]} : vector<2x5xf32> to vector<2x1xf32>
    %cst_128 = arith.constant dense<0.000000e+00> : vector<8x5xf32>
    %323 = tpu.matmul %216, %214, %cst_128 {dimension_numbers = #tpu.dot_dimension_numbers<[1], [0], [0], [1], [0, 0, 1, 1], [], []>} : vector<8x2xf32>, vector<2x5xf32>, vector<8x5xf32> -> vector<8x5xf32>
    %324 = vector.extract_strided_slice %323 {offsets = [0, 0], sizes = [8, 1], strides = [1, 1]} : vector<8x5xf32> to vector<8x1xf32>
    %325 = vector.extract_strided_slice %323 {offsets = [0, 4], sizes = [8, 1], strides = [1, 1]} : vector<8x5xf32> to vector<8x1xf32>
    %326 = arith.addf %324, %325 : vector<8x1xf32>
    %327 = vector.broadcast %326 : vector<8x1xf32> to vector<8x32xf32>
    %328 = arith.mulf %327, %143 : vector<8x32xf32>
    %329 = vector.extract_strided_slice %323 {offsets = [0, 1], sizes = [8, 1], strides = [1, 1]} : vector<8x5xf32> to vector<8x1xf32>
    %330 = vector.broadcast %329 : vector<8x1xf32> to vector<8x32xf32>
    %331 = arith.mulf %330, %253 : vector<8x32xf32>
    %332 = arith.addf %328, %331 : vector<8x32xf32>
    %333 = vector.extract_strided_slice %323 {offsets = [0, 2], sizes = [8, 1], strides = [1, 1]} : vector<8x5xf32> to vector<8x1xf32>
    %334 = vector.broadcast %333 : vector<8x1xf32> to vector<8x32xf32>
    %335 = arith.mulf %334, %291 : vector<8x32xf32>
    %336 = arith.addf %332, %335 : vector<8x32xf32>
    %337 = vector.extract_strided_slice %323 {offsets = [0, 3], sizes = [8, 1], strides = [1, 1]} : vector<8x5xf32> to vector<8x1xf32>
    %338 = vector.broadcast %337 : vector<8x1xf32> to vector<8x32xf32>
    %339 = arith.mulf %338, %306 : vector<8x32xf32>
    %340 = arith.addf %336, %339 : vector<8x32xf32>
    %341 = arith.addf %318, %320 : vector<2x1xf32>
    %342 = arith.addf %341, %322 : vector<2x1xf32>
    %343 = vector.broadcast %342 : vector<2x1xf32> to vector<2x8xf32>
    %344 = arith.mulf %343, %150 : vector<2x8xf32>
    %345 = vector.broadcast %319 : vector<2x1xf32> to vector<2x8xf32>
    %346 = arith.mulf %345, %242 : vector<2x8xf32>
    %347 = arith.addf %344, %346 : vector<2x8xf32>
    %348 = vector.broadcast %321 : vector<2x1xf32> to vector<2x8xf32>
    %349 = arith.mulf %348, %293 : vector<2x8xf32>
    %350 = arith.addf %347, %349 : vector<2x8xf32>
    %cst_129 = arith.constant 1.000000e+00 : f32
    %351 = vector.broadcast %cst_129 : f32 to vector<2x1xf32>
    %352 = arith.subf %351, %322 : vector<2x1xf32>
    %353 = vector.broadcast %352 : vector<2x1xf32> to vector<2x32xf32>
    %354 = arith.mulf %353, %142 : vector<2x32xf32>
    %355 = vector.broadcast %322 : vector<2x1xf32> to vector<2x32xf32>
    %356 = arith.mulf %355, %317 : vector<2x32xf32>
    %357 = arith.addf %354, %356 : vector<2x32xf32>
    %cst_130 = arith.constant dense<0.000000e+00> : vector<2x32xf32>
    %358 = tpu.matmul %350, %340, %cst_130 {dimension_numbers = #tpu.dot_dimension_numbers<[1], [0], [0], [1], [0, 0, 1, 1], [], []>} : vector<2x8xf32>, vector<8x32xf32>, vector<2x32xf32> -> vector<2x32xf32>
    %c0_131 = arith.constant 0 : index
    %c0_132 = arith.constant 0 : index
    %359 = vector.load %arg5[%c0_131, %c0_132] : memref<6x128xf32, #tpu.memory_space<vmem>>, vector<2x16xf32>
    tpu.vector_store %arg5[%c0_131, %c0_132], %204 {strides = array<i32>} : memref<6x128xf32, #tpu.memory_space<vmem>>, vector<2x16xf32>,
    %c0_133 = arith.constant 0 : index
    %c16_134 = arith.constant 16 : index
    %360 = vector.load %arg5[%c0_133, %c16_134] : memref<6x128xf32, #tpu.memory_space<vmem>>, vector<2x5xf32>
    tpu.vector_store %arg5[%c0_133, %c16_134], %172 {strides = array<i32>} : memref<6x128xf32, #tpu.memory_space<vmem>>, vector<2x5xf32>,
    %c0_135 = arith.constant 0 : index
    %c24_136 = arith.constant 24 : index
    %361 = vector.load %arg5[%c0_135, %c24_136] : memref<6x128xf32, #tpu.memory_space<vmem>>, vector<2x8xf32>
    tpu.vector_store %arg5[%c0_135, %c24_136], %350 {strides = array<i32>} : memref<6x128xf32, #tpu.memory_space<vmem>>, vector<2x8xf32>,
    %c0_137 = arith.constant 0 : index
    %c32_138 = arith.constant 32 : index
    %362 = vector.load %arg5[%c0_137, %c32_138] : memref<6x128xf32, #tpu.memory_space<vmem>>, vector<2x32xf32>
    tpu.vector_store %arg5[%c0_137, %c32_138], %358 {strides = array<i32>} : memref<6x128xf32, #tpu.memory_space<vmem>>, vector<2x32xf32>,
    %c0_139 = arith.constant 0 : index
    %c0_140 = arith.constant 0 : index
    %363 = vector.load %arg6[%c0_139, %c0_140] : memref<24x32xf32, #tpu.memory_space<vmem>>, vector<8x32xf32>
    tpu.vector_store %arg6[%c0_139, %c0_140], %340 {strides = array<i32>} : memref<24x32xf32, #tpu.memory_space<vmem>>, vector<8x32xf32>,
    %364 = arith.truncf %135 : vector<2x32xf32> to vector<2x32xbf16>
    %c256 = arith.constant 256 : index
    %c0_141 = arith.constant 0 : index
    %365 = vector.load %arg2[%c256, %c0_141] : memref<576x48xbf16, #tpu.memory_space<vmem>>, vector<32x32xbf16>
    %cst_142 = arith.constant dense<0.000000e+00> : vector<2x32xf32>
    %366 = tpu.matmul %364, %365, %cst_142 {dimension_numbers = #tpu.dot_dimension_numbers<[1], [0], [0], [1], [0, 0, 1, 1], [], []>} : vector<2x32xbf16>, vector<32x32xbf16>, vector<2x32xf32> -> vector<2x32xf32>
    %c12 = arith.constant 12 : index
    %c0_143 = arith.constant 0 : index
    %367 = vector.load %arg3[%c12, %c0_143] : memref<104x48xf32, #tpu.memory_space<vmem>>, vector<1x32xf32>
    %368 = vector.broadcast %367 : vector<1x32xf32> to vector<2x32xf32>
    %369 = arith.addf %366, %368 : vector<2x32xf32>
    %370 = arith.truncf %207 : vector<2x32xf32> to vector<2x32xbf16>
    %c320_144 = arith.constant 320 : index
    %c0_145 = arith.constant 0 : index
    %371 = vector.load %arg2[%c320_144, %c0_145] : memref<576x48xbf16, #tpu.memory_space<vmem>>, vector<32x32xbf16>
    %cst_146 = arith.constant dense<0.000000e+00> : vector<2x32xf32>
    %372 = tpu.matmul %370, %371, %cst_146 {dimension_numbers = #tpu.dot_dimension_numbers<[1], [0], [0], [1], [0, 0, 1, 1], [], []>} : vector<2x32xbf16>, vector<32x32xbf16>, vector<2x32xf32> -> vector<2x32xf32>
    %373 = arith.truncf %369 : vector<2x32xf32> to vector<2x32xbf16>
    %c352_147 = arith.constant 352 : index
    %c0_148 = arith.constant 0 : index
    %374 = vector.load %arg2[%c352_147, %c0_148] : memref<576x48xbf16, #tpu.memory_space<vmem>>, vector<32x32xbf16>
    %cst_149 = arith.constant dense<0.000000e+00> : vector<2x32xf32>
    %375 = tpu.matmul %373, %374, %cst_149 {dimension_numbers = #tpu.dot_dimension_numbers<[1], [0], [0], [1], [0, 0, 1, 1], [], []>} : vector<2x32xbf16>, vector<32x32xbf16>, vector<2x32xf32> -> vector<2x32xf32>
    %376 = arith.addf %372, %375 : vector<2x32xf32>
    %c14_150 = arith.constant 14 : index
    %c0_151 = arith.constant 0 : index
    %377 = vector.load %arg3[%c14_150, %c0_151] : memref<104x48xf32, #tpu.memory_space<vmem>>, vector<1x32xf32>
    %378 = vector.broadcast %377 : vector<1x32xf32> to vector<2x32xf32>
    %379 = arith.addf %376, %378 : vector<2x32xf32>
    %380 = arith.truncf %379 : vector<2x32xf32> to vector<2x32xbf16>
    %c544_152 = arith.constant 544 : index
    %c0_153 = arith.constant 0 : index
    %381 = vector.load %arg2[%c544_152, %c0_153] : memref<576x48xbf16, #tpu.memory_space<vmem>>, vector<32x5xbf16>
    %cst_154 = arith.constant dense<0.000000e+00> : vector<2x5xf32>
    %382 = tpu.matmul %380, %381, %cst_154 {dimension_numbers = #tpu.dot_dimension_numbers<[1], [0], [0], [1], [0, 0, 1, 1], [], []>} : vector<2x32xbf16>, vector<32x5xbf16>, vector<2x5xf32> -> vector<2x5xf32>
    %c15_155 = arith.constant 15 : index
    %c0_156 = arith.constant 0 : index
    %383 = vector.load %arg3[%c15_155, %c0_156] : memref<104x48xf32, #tpu.memory_space<vmem>>, vector<1x5xf32>
    %384 = vector.broadcast %383 : vector<1x5xf32> to vector<2x5xf32>
    %385 = arith.addf %382, %384 : vector<2x5xf32>
    %cst_157 = arith.constant dense<0xFF800000> : vector<2xf32>
    %386 = vector.multi_reduction <maximumf>, %385, %cst_157 [1] : vector<2x5xf32> to vector<2xf32>
    %387 = vector.shape_cast %386 : vector<2xf32> to vector<2x1xf32>
    %388 = vector.broadcast %387 : vector<2x1xf32> to vector<2x5xf32>
    %389 = arith.subf %385, %388 : vector<2x5xf32>
    %390 = math.exp %389 : vector<2x5xf32>
    %cst_158 = arith.constant dense<0.000000e+00> : vector<2xf32>
    %391 = vector.multi_reduction <add>, %390, %cst_158 [1] : vector<2x5xf32> to vector<2xf32>
    %392 = vector.shape_cast %391 : vector<2xf32> to vector<2x1xf32>
    %393 = vector.broadcast %392 : vector<2x1xf32> to vector<2x5xf32>
    %394 = arith.divf %390, %393 : vector<2x5xf32>
    %c16_159 = arith.constant 16 : index
    %c0_160 = arith.constant 0 : index
    %395 = vector.load %arg3[%c16_159, %c0_160] : memref<104x48xf32, #tpu.memory_space<vmem>>, vector<1x32xf32>
    %396 = vector.broadcast %395 : vector<1x32xf32> to vector<2x32xf32>
    %397 = arith.mulf %379, %396 : vector<2x32xf32>
    %398 = arith.truncf %397 : vector<2x32xf32> to vector<2x32xbf16>
    %399 = arith.truncf %131 : vector<16x32xf32> to vector<16x32xbf16>
    %cst_161 = arith.constant dense<0.000000e+00> : vector<2x16xf32>
    %400 = tpu.matmul %398, %399, %cst_161 {dimension_numbers = #tpu.dot_dimension_numbers<[1], [1], [0], [0], [0, 0, 1, 0], [], []>} : vector<2x32xbf16>, vector<16x32xbf16>, vector<2x16xf32> -> vector<2x16xf32>
    %c17_162 = arith.constant 17 : index
    %c0_163 = arith.constant 0 : index
    %401 = vector.load %arg3[%c17_162, %c0_163] : memref<104x48xf32, #tpu.memory_space<vmem>>, vector<1x1xf32>
    %402 = vector.broadcast %401 : vector<1x1xf32> to vector<2x16xf32>
    %403 = arith.addf %400, %402 : vector<2x16xf32>
    %cst_164 = arith.constant 0.000000e+00 : f32
    %404 = vector.broadcast %cst_164 : f32 to vector<2x16xf32>
    %405 = arith.cmpf ogt, %136, %404 : vector<2x16xf32>
    %cst_165 = arith.constant -1.000000e+30 : f32
    %406 = vector.broadcast %cst_165 : f32 to vector<2x16xf32>
    %407 = arith.select %405, %403, %406 : vector<2x16xi1>, vector<2x16xf32>
    %cst_166 = arith.constant dense<0xFF800000> : vector<2xf32>
    %408 = vector.multi_reduction <maximumf>, %407, %cst_166 [1] : vector<2x16xf32> to vector<2xf32>
    %409 = vector.shape_cast %408 : vector<2xf32> to vector<2x1xf32>
    %410 = vector.broadcast %409 : vector<2x1xf32> to vector<2x16xf32>
    %411 = arith.subf %407, %410 : vector<2x16xf32>
    %412 = math.exp %411 : vector<2x16xf32>
    %cst_167 = arith.constant dense<0.000000e+00> : vector<2xf32>
    %413 = vector.multi_reduction <add>, %412, %cst_167 [1] : vector<2x16xf32> to vector<2xf32>
    %414 = vector.shape_cast %413 : vector<2xf32> to vector<2x1xf32>
    %415 = tpu.reciprocal %414 {approx = true} : vector<2x1xf32> -> vector<2x1xf32>
    %416 = vector.broadcast %415 : vector<2x1xf32> to vector<2x16xf32>
    %417 = arith.mulf %412, %416 : vector<2x16xf32>
    %418 = arith.truncf %417 : vector<2x16xf32> to vector<2x16xbf16>
    %419 = arith.truncf %131 : vector<16x32xf32> to vector<16x32xbf16>
    %cst_168 = arith.constant dense<0.000000e+00> : vector<2x32xf32>
    %420 = tpu.matmul %418, %419, %cst_168 {dimension_numbers = #tpu.dot_dimension_numbers<[1], [0], [0], [1], [0, 0, 1, 1], [], []>} : vector<2x16xbf16>, vector<16x32xbf16>, vector<2x32xf32> -> vector<2x32xf32>
    %c24_169 = arith.constant 24 : index
    %c0_170 = arith.constant 0 : index
    %421 = vector.load %arg3[%c24_169, %c0_170] : memref<104x48xf32, #tpu.memory_space<vmem>>, vector<8x5xf32>
    %cst_171 = arith.constant dense<0.000000e+00> : vector<2x5xf32>
    %422 = tpu.matmul %350, %421, %cst_171 {dimension_numbers = #tpu.dot_dimension_numbers<[1], [0], [0], [1], [0, 0, 1, 1], [], []>} : vector<2x8xf32>, vector<8x5xf32>, vector<2x5xf32> -> vector<2x5xf32>
    %423 = arith.mulf %394, %422 : vector<2x5xf32>
    %cst_172 = arith.constant dense<0.000000e+00> : vector<2xf32>
    %424 = vector.multi_reduction <add>, %423, %cst_172 [1] : vector<2x5xf32> to vector<2xf32>
    %425 = vector.shape_cast %424 : vector<2xf32> to vector<2x1xf32>
    %426 = vector.broadcast %425 : vector<2x1xf32> to vector<2x5xf32>
    %427 = arith.divf %423, %426 : vector<2x5xf32>
    %c64_173 = arith.constant 64 : index
    %c0_174 = arith.constant 0 : index
    %428 = vector.load %arg3[%c64_173, %c0_174] : memref<104x48xf32, #tpu.memory_space<vmem>>, vector<8x8xf32>
    %c48_175 = arith.constant 48 : index
    %c0_176 = arith.constant 0 : index
    %429 = vector.load %arg3[%c48_175, %c0_176] : memref<104x48xf32, #tpu.memory_space<vmem>>, vector<8x2xf32>
    %cst_177 = arith.constant dense<0.000000e+00> : vector<2x32xf32>
    %430 = tpu.matmul %350, %340, %cst_177 {dimension_numbers = #tpu.dot_dimension_numbers<[1], [0], [0], [1], [0, 0, 1, 1], [], []>} : vector<2x8xf32>, vector<8x32xf32>, vector<2x32xf32> -> vector<2x32xf32>
    %431 = arith.truncf %430 : vector<2x32xf32> to vector<2x32xbf16>
    %432 = arith.truncf %40 : vector<32x32xf32> to vector<32x32xbf16>
    %cst_178 = arith.constant dense<0.000000e+00> : vector<2x32xf32>
    %433 = tpu.matmul %431, %432, %cst_178 {dimension_numbers = #tpu.dot_dimension_numbers<[1], [0], [0], [1], [0, 0, 1, 1], [], []>} : vector<2x32xbf16>, vector<32x32xbf16>, vector<2x32xf32> -> vector<2x32xf32>
    %434 = arith.truncf %420 : vector<2x32xf32> to vector<2x32xbf16>
    %c384_179 = arith.constant 384 : index
    %c0_180 = arith.constant 0 : index
    %435 = vector.load %arg2[%c384_179, %c0_180] : memref<576x48xbf16, #tpu.memory_space<vmem>>, vector<32x32xbf16>
    %cst_181 = arith.constant dense<0.000000e+00> : vector<2x32xf32>
    %436 = tpu.matmul %434, %435, %cst_181 {dimension_numbers = #tpu.dot_dimension_numbers<[1], [0], [0], [1], [0, 0, 1, 1], [], []>} : vector<2x32xbf16>, vector<32x32xbf16>, vector<2x32xf32> -> vector<2x32xf32>
    %cst_182 = arith.constant 0.000000e+00 : f32
    %437 = vector.broadcast %cst_182 : f32 to vector<2x32xf32>
    %438 = arith.cmpf ogt, %137, %437 : vector<2x32xf32>
    %439 = arith.truncf %436 : vector<2x32xf32> to vector<2x32xbf16>
    %440 = arith.truncf %40 : vector<32x32xf32> to vector<32x32xbf16>
    %cst_183 = arith.constant dense<0.000000e+00> : vector<2x32xf32>
    %441 = tpu.matmul %439, %440, %cst_183 {dimension_numbers = #tpu.dot_dimension_numbers<[1], [1], [0], [0], [0, 0, 1, 0], [], []>} : vector<2x32xbf16>, vector<32x32xbf16>, vector<2x32xf32> -> vector<2x32xf32>
    %cst_184 = arith.constant -1.000000e+30 : f32
    %442 = vector.broadcast %cst_184 : f32 to vector<2x32xf32>
    %443 = arith.select %438, %441, %442 : vector<2x32xi1>, vector<2x32xf32>
    %cst_185 = arith.constant dense<0xFF800000> : vector<2xf32>
    %444 = vector.multi_reduction <maximumf>, %443, %cst_185 [1] : vector<2x32xf32> to vector<2xf32>
    %445 = vector.shape_cast %444 : vector<2xf32> to vector<2x1xf32>
    %446 = vector.broadcast %445 : vector<2x1xf32> to vector<2x32xf32>
    %447 = arith.subf %443, %446 : vector<2x32xf32>
    %448 = math.exp %447 : vector<2x32xf32>
    %cst_186 = arith.constant dense<0.000000e+00> : vector<2xf32>
    %449 = vector.multi_reduction <add>, %448, %cst_186 [1] : vector<2x32xf32> to vector<2xf32>
    %450 = vector.shape_cast %449 : vector<2xf32> to vector<2x1xf32>
    %451 = tpu.reciprocal %450 {approx = true} : vector<2x1xf32> -> vector<2x1xf32>
    %452 = vector.broadcast %451 : vector<2x1xf32> to vector<2x32xf32>
    %453 = arith.mulf %448, %452 : vector<2x32xf32>
    %c32_187 = arith.constant 32 : index
    %c0_188 = arith.constant 0 : index
    %454 = vector.load %arg3[%c32_187, %c0_188] : memref<104x48xf32, #tpu.memory_space<vmem>>, vector<8x8xf32>
    %cst_189 = arith.constant dense<0.000000e+00> : vector<2x8xf32>
    %455 = tpu.matmul %350, %454, %cst_189 {dimension_numbers = #tpu.dot_dimension_numbers<[1], [0], [0], [1], [0, 0, 1, 1], [], []>} : vector<2x8xf32>, vector<8x8xf32>, vector<2x8xf32> -> vector<2x8xf32>
    %cst_190 = arith.constant dense<0.000000e+00> : vector<8xf32>
    %456 = vector.multi_reduction <add>, %455, %cst_190 [0] : vector<2x8xf32> to vector<8xf32>
    %457 = vector.shape_cast %456 : vector<8xf32> to vector<1x8xf32>
    %458 = vector.broadcast %457 : vector<1x8xf32> to vector<8x8xf32>
    %459 = arith.mulf %428, %458 : vector<8x8xf32>
    %cst_191 = arith.constant dense<0.000000e+00> : vector<8xf32>
    %460 = vector.multi_reduction <add>, %459, %cst_191 [1] : vector<8x8xf32> to vector<8xf32>
    %461 = vector.shape_cast %460 : vector<8xf32> to vector<8x1xf32>
    %cst_192 = arith.constant dense<0.000000e+00> : vector<8x32xf32>
    %462 = tpu.matmul %429, %453, %cst_192 {dimension_numbers = #tpu.dot_dimension_numbers<[1], [0], [0], [1], [0, 0, 1, 1], [], []>} : vector<8x2xf32>, vector<2x32xf32>, vector<8x32xf32> -> vector<8x32xf32>
    %463 = arith.subf %462, %340 : vector<8x32xf32>
    %464 = vector.broadcast %461 : vector<8x1xf32> to vector<8x32xf32>
    %465 = arith.mulf %464, %463 : vector<8x32xf32>
    %466 = arith.addf %340, %465 : vector<8x32xf32>
    %467 = arith.truncf %433 : vector<2x32xf32> to vector<2x32xbf16>
    %c416_193 = arith.constant 416 : index
    %c0_194 = arith.constant 0 : index
    %468 = vector.load %arg2[%c416_193, %c0_194] : memref<576x48xbf16, #tpu.memory_space<vmem>>, vector<32x32xbf16>
    %cst_195 = arith.constant dense<0.000000e+00> : vector<2x32xf32>
    %469 = tpu.matmul %467, %468, %cst_195 {dimension_numbers = #tpu.dot_dimension_numbers<[1], [0], [0], [1], [0, 0, 1, 1], [], []>} : vector<2x32xbf16>, vector<32x32xbf16>, vector<2x32xf32> -> vector<2x32xf32>
    %470 = arith.truncf %420 : vector<2x32xf32> to vector<2x32xbf16>
    %c448_196 = arith.constant 448 : index
    %c0_197 = arith.constant 0 : index
    %471 = vector.load %arg2[%c448_196, %c0_197] : memref<576x48xbf16, #tpu.memory_space<vmem>>, vector<32x32xbf16>
    %cst_198 = arith.constant dense<0.000000e+00> : vector<2x32xf32>
    %472 = tpu.matmul %470, %471, %cst_198 {dimension_numbers = #tpu.dot_dimension_numbers<[1], [0], [0], [1], [0, 0, 1, 1], [], []>} : vector<2x32xbf16>, vector<32x32xbf16>, vector<2x32xf32> -> vector<2x32xf32>
    %473 = arith.addf %469, %472 : vector<2x32xf32>
    %c18_199 = arith.constant 18 : index
    %c0_200 = arith.constant 0 : index
    %474 = vector.load %arg3[%c18_199, %c0_200] : memref<104x48xf32, #tpu.memory_space<vmem>>, vector<1x32xf32>
    %475 = vector.broadcast %474 : vector<1x32xf32> to vector<2x32xf32>
    %476 = arith.addf %473, %475 : vector<2x32xf32>
    %cst_201 = arith.constant 0.000000e+00 : f32
    %477 = vector.broadcast %cst_201 : f32 to vector<2x32xf32>
    %478 = arith.cmpf ogt, %137, %477 : vector<2x32xf32>
    %479 = arith.truncf %476 : vector<2x32xf32> to vector<2x32xbf16>
    %480 = arith.truncf %40 : vector<32x32xf32> to vector<32x32xbf16>
    %cst_202 = arith.constant dense<0.000000e+00> : vector<2x32xf32>
    %481 = tpu.matmul %479, %480, %cst_202 {dimension_numbers = #tpu.dot_dimension_numbers<[1], [1], [0], [0], [0, 0, 1, 0], [], []>} : vector<2x32xbf16>, vector<32x32xbf16>, vector<2x32xf32> -> vector<2x32xf32>
    %cst_203 = arith.constant -1.000000e+30 : f32
    %482 = vector.broadcast %cst_203 : f32 to vector<2x32xf32>
    %483 = arith.select %478, %481, %482 : vector<2x32xi1>, vector<2x32xf32>
    %cst_204 = arith.constant dense<0xFF800000> : vector<2xf32>
    %484 = vector.multi_reduction <maximumf>, %483, %cst_204 [1] : vector<2x32xf32> to vector<2xf32>
    %485 = vector.shape_cast %484 : vector<2xf32> to vector<2x1xf32>
    %486 = vector.broadcast %485 : vector<2x1xf32> to vector<2x32xf32>
    %487 = arith.subf %483, %486 : vector<2x32xf32>
    %488 = math.exp %487 : vector<2x32xf32>
    %cst_205 = arith.constant dense<0.000000e+00> : vector<2xf32>
    %489 = vector.multi_reduction <add>, %488, %cst_205 [1] : vector<2x32xf32> to vector<2xf32>
    %490 = vector.shape_cast %489 : vector<2xf32> to vector<2x1xf32>
    %491 = tpu.reciprocal %490 {approx = true} : vector<2x1xf32> -> vector<2x1xf32>
    %492 = vector.broadcast %491 : vector<2x1xf32> to vector<2x32xf32>
    %493 = arith.mulf %488, %492 : vector<2x32xf32>
    %cst_206 = arith.constant dense<0.000000e+00> : vector<8xf32>
    %494 = vector.multi_reduction <add>, %350, %cst_206 [0] : vector<2x8xf32> to vector<8xf32>
    %495 = vector.shape_cast %494 : vector<8xf32> to vector<1x8xf32>
    %496 = vector.broadcast %495 : vector<1x8xf32> to vector<8x8xf32>
    %497 = arith.mulf %428, %496 : vector<8x8xf32>
    %cst_207 = arith.constant dense<0.000000e+00> : vector<8xf32>
    %498 = vector.multi_reduction <add>, %497, %cst_207 [1] : vector<8x8xf32> to vector<8xf32>
    %499 = vector.shape_cast %498 : vector<8xf32> to vector<8x1xf32>
    %cst_208 = arith.constant dense<0.000000e+00> : vector<8x32xf32>
    %500 = tpu.matmul %429, %493, %cst_208 {dimension_numbers = #tpu.dot_dimension_numbers<[1], [0], [0], [1], [0, 0, 1, 1], [], []>} : vector<8x2xf32>, vector<2x32xf32>, vector<8x32xf32> -> vector<8x32xf32>
    %501 = arith.subf %500, %340 : vector<8x32xf32>
    %502 = vector.broadcast %499 : vector<8x1xf32> to vector<8x32xf32>
    %503 = arith.mulf %502, %501 : vector<8x32xf32>
    %504 = arith.addf %340, %503 : vector<8x32xf32>
    %c40_209 = arith.constant 40 : index
    %c0_210 = arith.constant 0 : index
    %505 = vector.load %arg3[%c40_209, %c0_210] : memref<104x48xf32, #tpu.memory_space<vmem>>, vector<8x8xf32>
    %cst_211 = arith.constant dense<0.000000e+00> : vector<2x8xf32>
    %506 = tpu.matmul %350, %505, %cst_211 {dimension_numbers = #tpu.dot_dimension_numbers<[1], [0], [0], [1], [0, 0, 1, 1], [], []>} : vector<2x8xf32>, vector<8x8xf32>, vector<2x8xf32> -> vector<2x8xf32>
    %cst_212 = arith.constant dense<0.000000e+00> : vector<2x32xf32>
    %507 = tpu.matmul %506, %340, %cst_212 {dimension_numbers = #tpu.dot_dimension_numbers<[1], [0], [0], [1], [0, 0, 1, 1], [], []>} : vector<2x8xf32>, vector<8x32xf32>, vector<2x32xf32> -> vector<2x32xf32>
    %cst_213 = arith.constant dense<0.000000e+00> : vector<8xf32>
    %508 = vector.multi_reduction <add>, %506, %cst_213 [0] : vector<2x8xf32> to vector<8xf32>
    %509 = vector.shape_cast %508 : vector<8xf32> to vector<1x8xf32>
    %510 = vector.broadcast %509 : vector<1x8xf32> to vector<8x8xf32>
    %511 = arith.mulf %428, %510 : vector<8x8xf32>
    %cst_214 = arith.constant dense<0.000000e+00> : vector<8xf32>
    %512 = vector.multi_reduction <add>, %511, %cst_214 [1] : vector<8x8xf32> to vector<8xf32>
    %513 = vector.shape_cast %512 : vector<8xf32> to vector<8x1xf32>
    %514 = arith.minimumf %430, %507 : vector<2x32xf32>
    %cst_215 = arith.constant dense<0.000000e+00> : vector<8x32xf32>
    %515 = tpu.matmul %429, %514, %cst_215 {dimension_numbers = #tpu.dot_dimension_numbers<[1], [0], [0], [1], [0, 0, 1, 1], [], []>} : vector<8x2xf32>, vector<2x32xf32>, vector<8x32xf32> -> vector<8x32xf32>
    %516 = arith.subf %515, %340 : vector<8x32xf32>
    %517 = vector.broadcast %513 : vector<8x1xf32> to vector<8x32xf32>
    %518 = arith.mulf %517, %516 : vector<8x32xf32>
    %519 = arith.addf %340, %518 : vector<8x32xf32>
    %520 = arith.truncf %420 : vector<2x32xf32> to vector<2x32xbf16>
    %c480_216 = arith.constant 480 : index
    %c0_217 = arith.constant 0 : index
    %521 = vector.load %arg2[%c480_216, %c0_217] : memref<576x48xbf16, #tpu.memory_space<vmem>>, vector<32x32xbf16>
    %cst_218 = arith.constant dense<0.000000e+00> : vector<2x32xf32>
    %522 = tpu.matmul %520, %521, %cst_218 {dimension_numbers = #tpu.dot_dimension_numbers<[1], [0], [0], [1], [0, 0, 1, 1], [], []>} : vector<2x32xbf16>, vector<32x32xbf16>, vector<2x32xf32> -> vector<2x32xf32>
    %523 = arith.truncf %433 : vector<2x32xf32> to vector<2x32xbf16>
    %c512_219 = arith.constant 512 : index
    %c0_220 = arith.constant 0 : index
    %524 = vector.load %arg2[%c512_219, %c0_220] : memref<576x48xbf16, #tpu.memory_space<vmem>>, vector<32x32xbf16>
    %cst_221 = arith.constant dense<0.000000e+00> : vector<2x32xf32>
    %525 = tpu.matmul %523, %524, %cst_221 {dimension_numbers = #tpu.dot_dimension_numbers<[1], [0], [0], [1], [0, 0, 1, 1], [], []>} : vector<2x32xbf16>, vector<32x32xbf16>, vector<2x32xf32> -> vector<2x32xf32>
    %526 = arith.addf %522, %525 : vector<2x32xf32>
    %c19_222 = arith.constant 19 : index
    %c0_223 = arith.constant 0 : index
    %527 = vector.load %arg3[%c19_222, %c0_223] : memref<104x48xf32, #tpu.memory_space<vmem>>, vector<1x32xf32>
    %528 = vector.broadcast %527 : vector<1x32xf32> to vector<2x32xf32>
    %529 = arith.addf %526, %528 : vector<2x32xf32>
    %530 = math.tanh %529 : vector<2x32xf32>
    %531 = vector.extract_strided_slice %427 {offsets = [0, 0], sizes = [2, 1], strides = [1, 1]} : vector<2x5xf32> to vector<2x1xf32>
    %532 = vector.extract_strided_slice %427 {offsets = [0, 1], sizes = [2, 1], strides = [1, 1]} : vector<2x5xf32> to vector<2x1xf32>
    %533 = vector.extract_strided_slice %427 {offsets = [0, 2], sizes = [2, 1], strides = [1, 1]} : vector<2x5xf32> to vector<2x1xf32>
    %534 = vector.extract_strided_slice %427 {offsets = [0, 3], sizes = [2, 1], strides = [1, 1]} : vector<2x5xf32> to vector<2x1xf32>
    %535 = vector.extract_strided_slice %427 {offsets = [0, 4], sizes = [2, 1], strides = [1, 1]} : vector<2x5xf32> to vector<2x1xf32>
    %cst_224 = arith.constant dense<0.000000e+00> : vector<8x5xf32>
    %536 = tpu.matmul %429, %427, %cst_224 {dimension_numbers = #tpu.dot_dimension_numbers<[1], [0], [0], [1], [0, 0, 1, 1], [], []>} : vector<8x2xf32>, vector<2x5xf32>, vector<8x5xf32> -> vector<8x5xf32>
    %537 = vector.extract_strided_slice %536 {offsets = [0, 0], sizes = [8, 1], strides = [1, 1]} : vector<8x5xf32> to vector<8x1xf32>
    %538 = vector.extract_strided_slice %536 {offsets = [0, 4], sizes = [8, 1], strides = [1, 1]} : vector<8x5xf32> to vector<8x1xf32>
    %539 = arith.addf %537, %538 : vector<8x1xf32>
    %540 = vector.broadcast %539 : vector<8x1xf32> to vector<8x32xf32>
    %541 = arith.mulf %540, %340 : vector<8x32xf32>
    %542 = vector.extract_strided_slice %536 {offsets = [0, 1], sizes = [8, 1], strides = [1, 1]} : vector<8x5xf32> to vector<8x1xf32>
    %543 = vector.broadcast %542 : vector<8x1xf32> to vector<8x32xf32>
    %544 = arith.mulf %543, %466 : vector<8x32xf32>
    %545 = arith.addf %541, %544 : vector<8x32xf32>
    %546 = vector.extract_strided_slice %536 {offsets = [0, 2], sizes = [8, 1], strides = [1, 1]} : vector<8x5xf32> to vector<8x1xf32>
    %547 = vector.broadcast %546 : vector<8x1xf32> to vector<8x32xf32>
    %548 = arith.mulf %547, %504 : vector<8x32xf32>
    %549 = arith.addf %545, %548 : vector<8x32xf32>
    %550 = vector.extract_strided_slice %536 {offsets = [0, 3], sizes = [8, 1], strides = [1, 1]} : vector<8x5xf32> to vector<8x1xf32>
    %551 = vector.broadcast %550 : vector<8x1xf32> to vector<8x32xf32>
    %552 = arith.mulf %551, %519 : vector<8x32xf32>
    %553 = arith.addf %549, %552 : vector<8x32xf32>
    %554 = arith.addf %531, %533 : vector<2x1xf32>
    %555 = arith.addf %554, %535 : vector<2x1xf32>
    %556 = vector.broadcast %555 : vector<2x1xf32> to vector<2x8xf32>
    %557 = arith.mulf %556, %350 : vector<2x8xf32>
    %558 = vector.broadcast %532 : vector<2x1xf32> to vector<2x8xf32>
    %559 = arith.mulf %558, %455 : vector<2x8xf32>
    %560 = arith.addf %557, %559 : vector<2x8xf32>
    %561 = vector.broadcast %534 : vector<2x1xf32> to vector<2x8xf32>
    %562 = arith.mulf %561, %506 : vector<2x8xf32>
    %563 = arith.addf %560, %562 : vector<2x8xf32>
    %cst_225 = arith.constant 1.000000e+00 : f32
    %564 = vector.broadcast %cst_225 : f32 to vector<2x1xf32>
    %565 = arith.subf %564, %535 : vector<2x1xf32>
    %566 = vector.broadcast %565 : vector<2x1xf32> to vector<2x32xf32>
    %567 = arith.mulf %566, %357 : vector<2x32xf32>
    %568 = vector.broadcast %535 : vector<2x1xf32> to vector<2x32xf32>
    %569 = arith.mulf %568, %530 : vector<2x32xf32>
    %570 = arith.addf %567, %569 : vector<2x32xf32>
    %cst_226 = arith.constant dense<0.000000e+00> : vector<2x32xf32>
    %571 = tpu.matmul %563, %553, %cst_226 {dimension_numbers = #tpu.dot_dimension_numbers<[1], [0], [0], [1], [0, 0, 1, 1], [], []>} : vector<2x8xf32>, vector<8x32xf32>, vector<2x32xf32> -> vector<2x32xf32>
    %c2_227 = arith.constant 2 : index
    %c0_228 = arith.constant 0 : index
    %572 = vector.load %arg5[%c2_227, %c0_228] : memref<6x128xf32, #tpu.memory_space<vmem>>, vector<2x16xf32>
    tpu.vector_store %arg5[%c2_227, %c0_228], %417 {strides = array<i32>} : memref<6x128xf32, #tpu.memory_space<vmem>>, vector<2x16xf32>,
    %c2_229 = arith.constant 2 : index
    %c16_230 = arith.constant 16 : index
    %573 = vector.load %arg5[%c2_229, %c16_230] : memref<6x128xf32, #tpu.memory_space<vmem>>, vector<2x5xf32>
    tpu.vector_store %arg5[%c2_229, %c16_230], %385 {strides = array<i32>} : memref<6x128xf32, #tpu.memory_space<vmem>>, vector<2x5xf32>,
    %c2_231 = arith.constant 2 : index
    %c24_232 = arith.constant 24 : index
    %574 = vector.load %arg5[%c2_231, %c24_232] : memref<6x128xf32, #tpu.memory_space<vmem>>, vector<2x8xf32>
    tpu.vector_store %arg5[%c2_231, %c24_232], %563 {strides = array<i32>} : memref<6x128xf32, #tpu.memory_space<vmem>>, vector<2x8xf32>,
    %c2_233 = arith.constant 2 : index
    %c32_234 = arith.constant 32 : index
    %575 = vector.load %arg5[%c2_233, %c32_234] : memref<6x128xf32, #tpu.memory_space<vmem>>, vector<2x32xf32>
    tpu.vector_store %arg5[%c2_233, %c32_234], %571 {strides = array<i32>} : memref<6x128xf32, #tpu.memory_space<vmem>>, vector<2x32xf32>,
    %c8_235 = arith.constant 8 : index
    %c0_236 = arith.constant 0 : index
    %576 = vector.load %arg6[%c8_235, %c0_236] : memref<24x32xf32, #tpu.memory_space<vmem>>, vector<8x32xf32>
    tpu.vector_store %arg6[%c8_235, %c0_236], %553 {strides = array<i32>} : memref<24x32xf32, #tpu.memory_space<vmem>>, vector<8x32xf32>,
    %577 = arith.truncf %135 : vector<2x32xf32> to vector<2x32xbf16>
    %c288 = arith.constant 288 : index
    %c0_237 = arith.constant 0 : index
    %578 = vector.load %arg2[%c288, %c0_237] : memref<576x48xbf16, #tpu.memory_space<vmem>>, vector<32x32xbf16>
    %cst_238 = arith.constant dense<0.000000e+00> : vector<2x32xf32>
    %579 = tpu.matmul %577, %578, %cst_238 {dimension_numbers = #tpu.dot_dimension_numbers<[1], [0], [0], [1], [0, 0, 1, 1], [], []>} : vector<2x32xbf16>, vector<32x32xbf16>, vector<2x32xf32> -> vector<2x32xf32>
    %c13 = arith.constant 13 : index
    %c0_239 = arith.constant 0 : index
    %580 = vector.load %arg3[%c13, %c0_239] : memref<104x48xf32, #tpu.memory_space<vmem>>, vector<1x32xf32>
    %581 = vector.broadcast %580 : vector<1x32xf32> to vector<2x32xf32>
    %582 = arith.addf %579, %581 : vector<2x32xf32>
    %583 = arith.truncf %420 : vector<2x32xf32> to vector<2x32xbf16>
    %c320_240 = arith.constant 320 : index
    %c0_241 = arith.constant 0 : index
    %584 = vector.load %arg2[%c320_240, %c0_241] : memref<576x48xbf16, #tpu.memory_space<vmem>>, vector<32x32xbf16>
    %cst_242 = arith.constant dense<0.000000e+00> : vector<2x32xf32>
    %585 = tpu.matmul %583, %584, %cst_242 {dimension_numbers = #tpu.dot_dimension_numbers<[1], [0], [0], [1], [0, 0, 1, 1], [], []>} : vector<2x32xbf16>, vector<32x32xbf16>, vector<2x32xf32> -> vector<2x32xf32>
    %586 = arith.truncf %582 : vector<2x32xf32> to vector<2x32xbf16>
    %c352_243 = arith.constant 352 : index
    %c0_244 = arith.constant 0 : index
    %587 = vector.load %arg2[%c352_243, %c0_244] : memref<576x48xbf16, #tpu.memory_space<vmem>>, vector<32x32xbf16>
    %cst_245 = arith.constant dense<0.000000e+00> : vector<2x32xf32>
    %588 = tpu.matmul %586, %587, %cst_245 {dimension_numbers = #tpu.dot_dimension_numbers<[1], [0], [0], [1], [0, 0, 1, 1], [], []>} : vector<2x32xbf16>, vector<32x32xbf16>, vector<2x32xf32> -> vector<2x32xf32>
    %589 = arith.addf %585, %588 : vector<2x32xf32>
    %c14_246 = arith.constant 14 : index
    %c0_247 = arith.constant 0 : index
    %590 = vector.load %arg3[%c14_246, %c0_247] : memref<104x48xf32, #tpu.memory_space<vmem>>, vector<1x32xf32>
    %591 = vector.broadcast %590 : vector<1x32xf32> to vector<2x32xf32>
    %592 = arith.addf %589, %591 : vector<2x32xf32>
    %593 = arith.truncf %592 : vector<2x32xf32> to vector<2x32xbf16>
    %c544_248 = arith.constant 544 : index
    %c0_249 = arith.constant 0 : index
    %594 = vector.load %arg2[%c544_248, %c0_249] : memref<576x48xbf16, #tpu.memory_space<vmem>>, vector<32x5xbf16>
    %cst_250 = arith.constant dense<0.000000e+00> : vector<2x5xf32>
    %595 = tpu.matmul %593, %594, %cst_250 {dimension_numbers = #tpu.dot_dimension_numbers<[1], [0], [0], [1], [0, 0, 1, 1], [], []>} : vector<2x32xbf16>, vector<32x5xbf16>, vector<2x5xf32> -> vector<2x5xf32>
    %c15_251 = arith.constant 15 : index
    %c0_252 = arith.constant 0 : index
    %596 = vector.load %arg3[%c15_251, %c0_252] : memref<104x48xf32, #tpu.memory_space<vmem>>, vector<1x5xf32>
    %597 = vector.broadcast %596 : vector<1x5xf32> to vector<2x5xf32>
    %598 = arith.addf %595, %597 : vector<2x5xf32>
    %cst_253 = arith.constant dense<0xFF800000> : vector<2xf32>
    %599 = vector.multi_reduction <maximumf>, %598, %cst_253 [1] : vector<2x5xf32> to vector<2xf32>
    %600 = vector.shape_cast %599 : vector<2xf32> to vector<2x1xf32>
    %601 = vector.broadcast %600 : vector<2x1xf32> to vector<2x5xf32>
    %602 = arith.subf %598, %601 : vector<2x5xf32>
    %603 = math.exp %602 : vector<2x5xf32>
    %cst_254 = arith.constant dense<0.000000e+00> : vector<2xf32>
    %604 = vector.multi_reduction <add>, %603, %cst_254 [1] : vector<2x5xf32> to vector<2xf32>
    %605 = vector.shape_cast %604 : vector<2xf32> to vector<2x1xf32>
    %606 = vector.broadcast %605 : vector<2x1xf32> to vector<2x5xf32>
    %607 = arith.divf %603, %606 : vector<2x5xf32>
    %c16_255 = arith.constant 16 : index
    %c0_256 = arith.constant 0 : index
    %608 = vector.load %arg3[%c16_255, %c0_256] : memref<104x48xf32, #tpu.memory_space<vmem>>, vector<1x32xf32>
    %609 = vector.broadcast %608 : vector<1x32xf32> to vector<2x32xf32>
    %610 = arith.mulf %592, %609 : vector<2x32xf32>
    %611 = arith.truncf %610 : vector<2x32xf32> to vector<2x32xbf16>
    %612 = arith.truncf %131 : vector<16x32xf32> to vector<16x32xbf16>
    %cst_257 = arith.constant dense<0.000000e+00> : vector<2x16xf32>
    %613 = tpu.matmul %611, %612, %cst_257 {dimension_numbers = #tpu.dot_dimension_numbers<[1], [1], [0], [0], [0, 0, 1, 0], [], []>} : vector<2x32xbf16>, vector<16x32xbf16>, vector<2x16xf32> -> vector<2x16xf32>
    %c17_258 = arith.constant 17 : index
    %c0_259 = arith.constant 0 : index
    %614 = vector.load %arg3[%c17_258, %c0_259] : memref<104x48xf32, #tpu.memory_space<vmem>>, vector<1x1xf32>
    %615 = vector.broadcast %614 : vector<1x1xf32> to vector<2x16xf32>
    %616 = arith.addf %613, %615 : vector<2x16xf32>
    %cst_260 = arith.constant 0.000000e+00 : f32
    %617 = vector.broadcast %cst_260 : f32 to vector<2x16xf32>
    %618 = arith.cmpf ogt, %136, %617 : vector<2x16xf32>
    %cst_261 = arith.constant -1.000000e+30 : f32
    %619 = vector.broadcast %cst_261 : f32 to vector<2x16xf32>
    %620 = arith.select %618, %616, %619 : vector<2x16xi1>, vector<2x16xf32>
    %cst_262 = arith.constant dense<0xFF800000> : vector<2xf32>
    %621 = vector.multi_reduction <maximumf>, %620, %cst_262 [1] : vector<2x16xf32> to vector<2xf32>
    %622 = vector.shape_cast %621 : vector<2xf32> to vector<2x1xf32>
    %623 = vector.broadcast %622 : vector<2x1xf32> to vector<2x16xf32>
    %624 = arith.subf %620, %623 : vector<2x16xf32>
    %625 = math.exp %624 : vector<2x16xf32>
    %cst_263 = arith.constant dense<0.000000e+00> : vector<2xf32>
    %626 = vector.multi_reduction <add>, %625, %cst_263 [1] : vector<2x16xf32> to vector<2xf32>
    %627 = vector.shape_cast %626 : vector<2xf32> to vector<2x1xf32>
    %628 = tpu.reciprocal %627 {approx = true} : vector<2x1xf32> -> vector<2x1xf32>
    %629 = vector.broadcast %628 : vector<2x1xf32> to vector<2x16xf32>
    %630 = arith.mulf %625, %629 : vector<2x16xf32>
    %631 = arith.truncf %630 : vector<2x16xf32> to vector<2x16xbf16>
    %632 = arith.truncf %131 : vector<16x32xf32> to vector<16x32xbf16>
    %cst_264 = arith.constant dense<0.000000e+00> : vector<2x32xf32>
    %633 = tpu.matmul %631, %632, %cst_264 {dimension_numbers = #tpu.dot_dimension_numbers<[1], [0], [0], [1], [0, 0, 1, 1], [], []>} : vector<2x16xbf16>, vector<16x32xbf16>, vector<2x32xf32> -> vector<2x32xf32>
    %c24_265 = arith.constant 24 : index
    %c0_266 = arith.constant 0 : index
    %634 = vector.load %arg3[%c24_265, %c0_266] : memref<104x48xf32, #tpu.memory_space<vmem>>, vector<8x5xf32>
    %cst_267 = arith.constant dense<0.000000e+00> : vector<2x5xf32>
    %635 = tpu.matmul %563, %634, %cst_267 {dimension_numbers = #tpu.dot_dimension_numbers<[1], [0], [0], [1], [0, 0, 1, 1], [], []>} : vector<2x8xf32>, vector<8x5xf32>, vector<2x5xf32> -> vector<2x5xf32>
    %636 = arith.mulf %607, %635 : vector<2x5xf32>
    %cst_268 = arith.constant dense<0.000000e+00> : vector<2xf32>
    %637 = vector.multi_reduction <add>, %636, %cst_268 [1] : vector<2x5xf32> to vector<2xf32>
    %638 = vector.shape_cast %637 : vector<2xf32> to vector<2x1xf32>
    %639 = vector.broadcast %638 : vector<2x1xf32> to vector<2x5xf32>
    %640 = arith.divf %636, %639 : vector<2x5xf32>
    %c64_269 = arith.constant 64 : index
    %c0_270 = arith.constant 0 : index
    %641 = vector.load %arg3[%c64_269, %c0_270] : memref<104x48xf32, #tpu.memory_space<vmem>>, vector<8x8xf32>
    %c48_271 = arith.constant 48 : index
    %c0_272 = arith.constant 0 : index
    %642 = vector.load %arg3[%c48_271, %c0_272] : memref<104x48xf32, #tpu.memory_space<vmem>>, vector<8x2xf32>
    %cst_273 = arith.constant dense<0.000000e+00> : vector<2x32xf32>
    %643 = tpu.matmul %563, %553, %cst_273 {dimension_numbers = #tpu.dot_dimension_numbers<[1], [0], [0], [1], [0, 0, 1, 1], [], []>} : vector<2x8xf32>, vector<8x32xf32>, vector<2x32xf32> -> vector<2x32xf32>
    %644 = arith.truncf %643 : vector<2x32xf32> to vector<2x32xbf16>
    %645 = arith.truncf %40 : vector<32x32xf32> to vector<32x32xbf16>
    %cst_274 = arith.constant dense<0.000000e+00> : vector<2x32xf32>
    %646 = tpu.matmul %644, %645, %cst_274 {dimension_numbers = #tpu.dot_dimension_numbers<[1], [0], [0], [1], [0, 0, 1, 1], [], []>} : vector<2x32xbf16>, vector<32x32xbf16>, vector<2x32xf32> -> vector<2x32xf32>
    %647 = arith.truncf %633 : vector<2x32xf32> to vector<2x32xbf16>
    %c384_275 = arith.constant 384 : index
    %c0_276 = arith.constant 0 : index
    %648 = vector.load %arg2[%c384_275, %c0_276] : memref<576x48xbf16, #tpu.memory_space<vmem>>, vector<32x32xbf16>
    %cst_277 = arith.constant dense<0.000000e+00> : vector<2x32xf32>
    %649 = tpu.matmul %647, %648, %cst_277 {dimension_numbers = #tpu.dot_dimension_numbers<[1], [0], [0], [1], [0, 0, 1, 1], [], []>} : vector<2x32xbf16>, vector<32x32xbf16>, vector<2x32xf32> -> vector<2x32xf32>
    %cst_278 = arith.constant 0.000000e+00 : f32
    %650 = vector.broadcast %cst_278 : f32 to vector<2x32xf32>
    %651 = arith.cmpf ogt, %137, %650 : vector<2x32xf32>
    %652 = arith.truncf %649 : vector<2x32xf32> to vector<2x32xbf16>
    %653 = arith.truncf %40 : vector<32x32xf32> to vector<32x32xbf16>
    %cst_279 = arith.constant dense<0.000000e+00> : vector<2x32xf32>
    %654 = tpu.matmul %652, %653, %cst_279 {dimension_numbers = #tpu.dot_dimension_numbers<[1], [1], [0], [0], [0, 0, 1, 0], [], []>} : vector<2x32xbf16>, vector<32x32xbf16>, vector<2x32xf32> -> vector<2x32xf32>
    %cst_280 = arith.constant -1.000000e+30 : f32
    %655 = vector.broadcast %cst_280 : f32 to vector<2x32xf32>
    %656 = arith.select %651, %654, %655 : vector<2x32xi1>, vector<2x32xf32>
    %cst_281 = arith.constant dense<0xFF800000> : vector<2xf32>
    %657 = vector.multi_reduction <maximumf>, %656, %cst_281 [1] : vector<2x32xf32> to vector<2xf32>
    %658 = vector.shape_cast %657 : vector<2xf32> to vector<2x1xf32>
    %659 = vector.broadcast %658 : vector<2x1xf32> to vector<2x32xf32>
    %660 = arith.subf %656, %659 : vector<2x32xf32>
    %661 = math.exp %660 : vector<2x32xf32>
    %cst_282 = arith.constant dense<0.000000e+00> : vector<2xf32>
    %662 = vector.multi_reduction <add>, %661, %cst_282 [1] : vector<2x32xf32> to vector<2xf32>
    %663 = vector.shape_cast %662 : vector<2xf32> to vector<2x1xf32>
    %664 = tpu.reciprocal %663 {approx = true} : vector<2x1xf32> -> vector<2x1xf32>
    %665 = vector.broadcast %664 : vector<2x1xf32> to vector<2x32xf32>
    %666 = arith.mulf %661, %665 : vector<2x32xf32>
    %c32_283 = arith.constant 32 : index
    %c0_284 = arith.constant 0 : index
    %667 = vector.load %arg3[%c32_283, %c0_284] : memref<104x48xf32, #tpu.memory_space<vmem>>, vector<8x8xf32>
    %cst_285 = arith.constant dense<0.000000e+00> : vector<2x8xf32>
    %668 = tpu.matmul %563, %667, %cst_285 {dimension_numbers = #tpu.dot_dimension_numbers<[1], [0], [0], [1], [0, 0, 1, 1], [], []>} : vector<2x8xf32>, vector<8x8xf32>, vector<2x8xf32> -> vector<2x8xf32>
    %cst_286 = arith.constant dense<0.000000e+00> : vector<8xf32>
    %669 = vector.multi_reduction <add>, %668, %cst_286 [0] : vector<2x8xf32> to vector<8xf32>
    %670 = vector.shape_cast %669 : vector<8xf32> to vector<1x8xf32>
    %671 = vector.broadcast %670 : vector<1x8xf32> to vector<8x8xf32>
    %672 = arith.mulf %641, %671 : vector<8x8xf32>
    %cst_287 = arith.constant dense<0.000000e+00> : vector<8xf32>
    %673 = vector.multi_reduction <add>, %672, %cst_287 [1] : vector<8x8xf32> to vector<8xf32>
    %674 = vector.shape_cast %673 : vector<8xf32> to vector<8x1xf32>
    %cst_288 = arith.constant dense<0.000000e+00> : vector<8x32xf32>
    %675 = tpu.matmul %642, %666, %cst_288 {dimension_numbers = #tpu.dot_dimension_numbers<[1], [0], [0], [1], [0, 0, 1, 1], [], []>} : vector<8x2xf32>, vector<2x32xf32>, vector<8x32xf32> -> vector<8x32xf32>
    %676 = arith.subf %675, %553 : vector<8x32xf32>
    %677 = vector.broadcast %674 : vector<8x1xf32> to vector<8x32xf32>
    %678 = arith.mulf %677, %676 : vector<8x32xf32>
    %679 = arith.addf %553, %678 : vector<8x32xf32>
    %680 = arith.truncf %646 : vector<2x32xf32> to vector<2x32xbf16>
    %c416_289 = arith.constant 416 : index
    %c0_290 = arith.constant 0 : index
    %681 = vector.load %arg2[%c416_289, %c0_290] : memref<576x48xbf16, #tpu.memory_space<vmem>>, vector<32x32xbf16>
    %cst_291 = arith.constant dense<0.000000e+00> : vector<2x32xf32>
    %682 = tpu.matmul %680, %681, %cst_291 {dimension_numbers = #tpu.dot_dimension_numbers<[1], [0], [0], [1], [0, 0, 1, 1], [], []>} : vector<2x32xbf16>, vector<32x32xbf16>, vector<2x32xf32> -> vector<2x32xf32>
    %683 = arith.truncf %633 : vector<2x32xf32> to vector<2x32xbf16>
    %c448_292 = arith.constant 448 : index
    %c0_293 = arith.constant 0 : index
    %684 = vector.load %arg2[%c448_292, %c0_293] : memref<576x48xbf16, #tpu.memory_space<vmem>>, vector<32x32xbf16>
    %cst_294 = arith.constant dense<0.000000e+00> : vector<2x32xf32>
    %685 = tpu.matmul %683, %684, %cst_294 {dimension_numbers = #tpu.dot_dimension_numbers<[1], [0], [0], [1], [0, 0, 1, 1], [], []>} : vector<2x32xbf16>, vector<32x32xbf16>, vector<2x32xf32> -> vector<2x32xf32>
    %686 = arith.addf %682, %685 : vector<2x32xf32>
    %c18_295 = arith.constant 18 : index
    %c0_296 = arith.constant 0 : index
    %687 = vector.load %arg3[%c18_295, %c0_296] : memref<104x48xf32, #tpu.memory_space<vmem>>, vector<1x32xf32>
    %688 = vector.broadcast %687 : vector<1x32xf32> to vector<2x32xf32>
    %689 = arith.addf %686, %688 : vector<2x32xf32>
    %cst_297 = arith.constant 0.000000e+00 : f32
    %690 = vector.broadcast %cst_297 : f32 to vector<2x32xf32>
    %691 = arith.cmpf ogt, %137, %690 : vector<2x32xf32>
    %692 = arith.truncf %689 : vector<2x32xf32> to vector<2x32xbf16>
    %693 = arith.truncf %40 : vector<32x32xf32> to vector<32x32xbf16>
    %cst_298 = arith.constant dense<0.000000e+00> : vector<2x32xf32>
    %694 = tpu.matmul %692, %693, %cst_298 {dimension_numbers = #tpu.dot_dimension_numbers<[1], [1], [0], [0], [0, 0, 1, 0], [], []>} : vector<2x32xbf16>, vector<32x32xbf16>, vector<2x32xf32> -> vector<2x32xf32>
    %cst_299 = arith.constant -1.000000e+30 : f32
    %695 = vector.broadcast %cst_299 : f32 to vector<2x32xf32>
    %696 = arith.select %691, %694, %695 : vector<2x32xi1>, vector<2x32xf32>
    %cst_300 = arith.constant dense<0xFF800000> : vector<2xf32>
    %697 = vector.multi_reduction <maximumf>, %696, %cst_300 [1] : vector<2x32xf32> to vector<2xf32>
    %698 = vector.shape_cast %697 : vector<2xf32> to vector<2x1xf32>
    %699 = vector.broadcast %698 : vector<2x1xf32> to vector<2x32xf32>
    %700 = arith.subf %696, %699 : vector<2x32xf32>
    %701 = math.exp %700 : vector<2x32xf32>
    %cst_301 = arith.constant dense<0.000000e+00> : vector<2xf32>
    %702 = vector.multi_reduction <add>, %701, %cst_301 [1] : vector<2x32xf32> to vector<2xf32>
    %703 = vector.shape_cast %702 : vector<2xf32> to vector<2x1xf32>
    %704 = tpu.reciprocal %703 {approx = true} : vector<2x1xf32> -> vector<2x1xf32>
    %705 = vector.broadcast %704 : vector<2x1xf32> to vector<2x32xf32>
    %706 = arith.mulf %701, %705 : vector<2x32xf32>
    %cst_302 = arith.constant dense<0.000000e+00> : vector<8xf32>
    %707 = vector.multi_reduction <add>, %563, %cst_302 [0] : vector<2x8xf32> to vector<8xf32>
    %708 = vector.shape_cast %707 : vector<8xf32> to vector<1x8xf32>
    %709 = vector.broadcast %708 : vector<1x8xf32> to vector<8x8xf32>
    %710 = arith.mulf %641, %709 : vector<8x8xf32>
    %cst_303 = arith.constant dense<0.000000e+00> : vector<8xf32>
    %711 = vector.multi_reduction <add>, %710, %cst_303 [1] : vector<8x8xf32> to vector<8xf32>
    %712 = vector.shape_cast %711 : vector<8xf32> to vector<8x1xf32>
    %cst_304 = arith.constant dense<0.000000e+00> : vector<8x32xf32>
    %713 = tpu.matmul %642, %706, %cst_304 {dimension_numbers = #tpu.dot_dimension_numbers<[1], [0], [0], [1], [0, 0, 1, 1], [], []>} : vector<8x2xf32>, vector<2x32xf32>, vector<8x32xf32> -> vector<8x32xf32>
    %714 = arith.subf %713, %553 : vector<8x32xf32>
    %715 = vector.broadcast %712 : vector<8x1xf32> to vector<8x32xf32>
    %716 = arith.mulf %715, %714 : vector<8x32xf32>
    %717 = arith.addf %553, %716 : vector<8x32xf32>
    %c40_305 = arith.constant 40 : index
    %c0_306 = arith.constant 0 : index
    %718 = vector.load %arg3[%c40_305, %c0_306] : memref<104x48xf32, #tpu.memory_space<vmem>>, vector<8x8xf32>
    %cst_307 = arith.constant dense<0.000000e+00> : vector<2x8xf32>
    %719 = tpu.matmul %563, %718, %cst_307 {dimension_numbers = #tpu.dot_dimension_numbers<[1], [0], [0], [1], [0, 0, 1, 1], [], []>} : vector<2x8xf32>, vector<8x8xf32>, vector<2x8xf32> -> vector<2x8xf32>
    %cst_308 = arith.constant dense<0.000000e+00> : vector<2x32xf32>
    %720 = tpu.matmul %719, %553, %cst_308 {dimension_numbers = #tpu.dot_dimension_numbers<[1], [0], [0], [1], [0, 0, 1, 1], [], []>} : vector<2x8xf32>, vector<8x32xf32>, vector<2x32xf32> -> vector<2x32xf32>
    %cst_309 = arith.constant dense<0.000000e+00> : vector<8xf32>
    %721 = vector.multi_reduction <add>, %719, %cst_309 [0] : vector<2x8xf32> to vector<8xf32>
    %722 = vector.shape_cast %721 : vector<8xf32> to vector<1x8xf32>
    %723 = vector.broadcast %722 : vector<1x8xf32> to vector<8x8xf32>
    %724 = arith.mulf %641, %723 : vector<8x8xf32>
    %cst_310 = arith.constant dense<0.000000e+00> : vector<8xf32>
    %725 = vector.multi_reduction <add>, %724, %cst_310 [1] : vector<8x8xf32> to vector<8xf32>
    %726 = vector.shape_cast %725 : vector<8xf32> to vector<8x1xf32>
    %727 = arith.minimumf %643, %720 : vector<2x32xf32>
    %cst_311 = arith.constant dense<0.000000e+00> : vector<8x32xf32>
    %728 = tpu.matmul %642, %727, %cst_311 {dimension_numbers = #tpu.dot_dimension_numbers<[1], [0], [0], [1], [0, 0, 1, 1], [], []>} : vector<8x2xf32>, vector<2x32xf32>, vector<8x32xf32> -> vector<8x32xf32>
    %729 = arith.subf %728, %553 : vector<8x32xf32>
    %730 = vector.broadcast %726 : vector<8x1xf32> to vector<8x32xf32>
    %731 = arith.mulf %730, %729 : vector<8x32xf32>
    %732 = arith.addf %553, %731 : vector<8x32xf32>
    %733 = arith.truncf %633 : vector<2x32xf32> to vector<2x32xbf16>
    %c480_312 = arith.constant 480 : index
    %c0_313 = arith.constant 0 : index
    %734 = vector.load %arg2[%c480_312, %c0_313] : memref<576x48xbf16, #tpu.memory_space<vmem>>, vector<32x32xbf16>
    %cst_314 = arith.constant dense<0.000000e+00> : vector<2x32xf32>
    %735 = tpu.matmul %733, %734, %cst_314 {dimension_numbers = #tpu.dot_dimension_numbers<[1], [0], [0], [1], [0, 0, 1, 1], [], []>} : vector<2x32xbf16>, vector<32x32xbf16>, vector<2x32xf32> -> vector<2x32xf32>
    %736 = arith.truncf %646 : vector<2x32xf32> to vector<2x32xbf16>
    %c512_315 = arith.constant 512 : index
    %c0_316 = arith.constant 0 : index
    %737 = vector.load %arg2[%c512_315, %c0_316] : memref<576x48xbf16, #tpu.memory_space<vmem>>, vector<32x32xbf16>
    %cst_317 = arith.constant dense<0.000000e+00> : vector<2x32xf32>
    %738 = tpu.matmul %736, %737, %cst_317 {dimension_numbers = #tpu.dot_dimension_numbers<[1], [0], [0], [1], [0, 0, 1, 1], [], []>} : vector<2x32xbf16>, vector<32x32xbf16>, vector<2x32xf32> -> vector<2x32xf32>
    %739 = arith.addf %735, %738 : vector<2x32xf32>
    %c19_318 = arith.constant 19 : index
    %c0_319 = arith.constant 0 : index
    %740 = vector.load %arg3[%c19_318, %c0_319] : memref<104x48xf32, #tpu.memory_space<vmem>>, vector<1x32xf32>
    %741 = vector.broadcast %740 : vector<1x32xf32> to vector<2x32xf32>
    %742 = arith.addf %739, %741 : vector<2x32xf32>
    %743 = math.tanh %742 : vector<2x32xf32>
    %744 = vector.extract_strided_slice %640 {offsets = [0, 0], sizes = [2, 1], strides = [1, 1]} : vector<2x5xf32> to vector<2x1xf32>
    %745 = vector.extract_strided_slice %640 {offsets = [0, 1], sizes = [2, 1], strides = [1, 1]} : vector<2x5xf32> to vector<2x1xf32>
    %746 = vector.extract_strided_slice %640 {offsets = [0, 2], sizes = [2, 1], strides = [1, 1]} : vector<2x5xf32> to vector<2x1xf32>
    %747 = vector.extract_strided_slice %640 {offsets = [0, 3], sizes = [2, 1], strides = [1, 1]} : vector<2x5xf32> to vector<2x1xf32>
    %748 = vector.extract_strided_slice %640 {offsets = [0, 4], sizes = [2, 1], strides = [1, 1]} : vector<2x5xf32> to vector<2x1xf32>
    %cst_320 = arith.constant dense<0.000000e+00> : vector<8x5xf32>
    %749 = tpu.matmul %642, %640, %cst_320 {dimension_numbers = #tpu.dot_dimension_numbers<[1], [0], [0], [1], [0, 0, 1, 1], [], []>} : vector<8x2xf32>, vector<2x5xf32>, vector<8x5xf32> -> vector<8x5xf32>
    %750 = vector.extract_strided_slice %749 {offsets = [0, 0], sizes = [8, 1], strides = [1, 1]} : vector<8x5xf32> to vector<8x1xf32>
    %751 = vector.extract_strided_slice %749 {offsets = [0, 4], sizes = [8, 1], strides = [1, 1]} : vector<8x5xf32> to vector<8x1xf32>
    %752 = arith.addf %750, %751 : vector<8x1xf32>
    %753 = vector.broadcast %752 : vector<8x1xf32> to vector<8x32xf32>
    %754 = arith.mulf %753, %553 : vector<8x32xf32>
    %755 = vector.extract_strided_slice %749 {offsets = [0, 1], sizes = [8, 1], strides = [1, 1]} : vector<8x5xf32> to vector<8x1xf32>
    %756 = vector.broadcast %755 : vector<8x1xf32> to vector<8x32xf32>
    %757 = arith.mulf %756, %679 : vector<8x32xf32>
    %758 = arith.addf %754, %757 : vector<8x32xf32>
    %759 = vector.extract_strided_slice %749 {offsets = [0, 2], sizes = [8, 1], strides = [1, 1]} : vector<8x5xf32> to vector<8x1xf32>
    %760 = vector.broadcast %759 : vector<8x1xf32> to vector<8x32xf32>
    %761 = arith.mulf %760, %717 : vector<8x32xf32>
    %762 = arith.addf %758, %761 : vector<8x32xf32>
    %763 = vector.extract_strided_slice %749 {offsets = [0, 3], sizes = [8, 1], strides = [1, 1]} : vector<8x5xf32> to vector<8x1xf32>
    %764 = vector.broadcast %763 : vector<8x1xf32> to vector<8x32xf32>
    %765 = arith.mulf %764, %732 : vector<8x32xf32>
    %766 = arith.addf %762, %765 : vector<8x32xf32>
    %767 = arith.addf %744, %746 : vector<2x1xf32>
    %768 = arith.addf %767, %748 : vector<2x1xf32>
    %769 = vector.broadcast %768 : vector<2x1xf32> to vector<2x8xf32>
    %770 = arith.mulf %769, %563 : vector<2x8xf32>
    %771 = vector.broadcast %745 : vector<2x1xf32> to vector<2x8xf32>
    %772 = arith.mulf %771, %668 : vector<2x8xf32>
    %773 = arith.addf %770, %772 : vector<2x8xf32>
    %774 = vector.broadcast %747 : vector<2x1xf32> to vector<2x8xf32>
    %775 = arith.mulf %774, %719 : vector<2x8xf32>
    %776 = arith.addf %773, %775 : vector<2x8xf32>
    %cst_321 = arith.constant 1.000000e+00 : f32
    %777 = vector.broadcast %cst_321 : f32 to vector<2x1xf32>
    %778 = arith.subf %777, %748 : vector<2x1xf32>
    %779 = vector.broadcast %778 : vector<2x1xf32> to vector<2x32xf32>
    %780 = arith.mulf %779, %570 : vector<2x32xf32>
    %781 = vector.broadcast %748 : vector<2x1xf32> to vector<2x32xf32>
    %782 = arith.mulf %781, %743 : vector<2x32xf32>
    %783 = arith.addf %780, %782 : vector<2x32xf32>
    %cst_322 = arith.constant dense<0.000000e+00> : vector<2x32xf32>
    %784 = tpu.matmul %776, %766, %cst_322 {dimension_numbers = #tpu.dot_dimension_numbers<[1], [0], [0], [1], [0, 0, 1, 1], [], []>} : vector<2x8xf32>, vector<8x32xf32>, vector<2x32xf32> -> vector<2x32xf32>
    %c4_323 = arith.constant 4 : index
    %c0_324 = arith.constant 0 : index
    %785 = vector.load %arg5[%c4_323, %c0_324] : memref<6x128xf32, #tpu.memory_space<vmem>>, vector<2x16xf32>
    tpu.vector_store %arg5[%c4_323, %c0_324], %630 {strides = array<i32>} : memref<6x128xf32, #tpu.memory_space<vmem>>, vector<2x16xf32>,
    %c4_325 = arith.constant 4 : index
    %c16_326 = arith.constant 16 : index
    %786 = vector.load %arg5[%c4_325, %c16_326] : memref<6x128xf32, #tpu.memory_space<vmem>>, vector<2x5xf32>
    tpu.vector_store %arg5[%c4_325, %c16_326], %598 {strides = array<i32>} : memref<6x128xf32, #tpu.memory_space<vmem>>, vector<2x5xf32>,
    %c4_327 = arith.constant 4 : index
    %c24_328 = arith.constant 24 : index
    %787 = vector.load %arg5[%c4_327, %c24_328] : memref<6x128xf32, #tpu.memory_space<vmem>>, vector<2x8xf32>
    tpu.vector_store %arg5[%c4_327, %c24_328], %776 {strides = array<i32>} : memref<6x128xf32, #tpu.memory_space<vmem>>, vector<2x8xf32>,
    %c4_329 = arith.constant 4 : index
    %c32_330 = arith.constant 32 : index
    %788 = vector.load %arg5[%c4_329, %c32_330] : memref<6x128xf32, #tpu.memory_space<vmem>>, vector<2x32xf32>
    tpu.vector_store %arg5[%c4_329, %c32_330], %784 {strides = array<i32>} : memref<6x128xf32, #tpu.memory_space<vmem>>, vector<2x32xf32>,
    %c16_331 = arith.constant 16 : index
    %c0_332 = arith.constant 0 : index
    %789 = vector.load %arg6[%c16_331, %c0_332] : memref<24x32xf32, #tpu.memory_space<vmem>>, vector<8x32xf32>
    tpu.vector_store %arg6[%c16_331, %c0_332], %766 {strides = array<i32>} : memref<24x32xf32, #tpu.memory_space<vmem>>, vector<8x32xf32>,
    %cst_333 = arith.constant 0.000000e+00 : f32
    %790 = vector.broadcast %cst_333 : f32 to vector<2x32xf32>
    %791 = arith.cmpf ogt, %137, %790 : vector<2x32xf32>
    %cst_334 = arith.constant -1.000000e+30 : f32
    %792 = vector.broadcast %cst_334 : f32 to vector<2x32xf32>
    %793 = arith.select %791, %784, %792 : vector<2x32xi1>, vector<2x32xf32>
    %cst_335 = arith.constant dense<0xFF800000> : vector<2xf32>
    %794 = vector.multi_reduction <maximumf>, %793, %cst_335 [1] : vector<2x32xf32> to vector<2xf32>
    %795 = vector.shape_cast %794 : vector<2xf32> to vector<2x1xf32>
    %796 = vector.broadcast %795 : vector<2x1xf32> to vector<2x32xf32>
    %797 = arith.subf %793, %796 : vector<2x32xf32>
    %798 = math.exp %797 : vector<2x32xf32>
    %cst_336 = arith.constant dense<0.000000e+00> : vector<2xf32>
    %799 = vector.multi_reduction <add>, %798, %cst_336 [1] : vector<2x32xf32> to vector<2xf32>
    %800 = vector.shape_cast %799 : vector<2xf32> to vector<2x1xf32>
    %801 = tpu.reciprocal %800 {approx = true} : vector<2x1xf32> -> vector<2x1xf32>
    %802 = vector.broadcast %801 : vector<2x1xf32> to vector<2x32xf32>
    %803 = arith.mulf %798, %802 : vector<2x32xf32>
    %cst_337 = arith.constant dense<0.000000e+00> : vector<32xf32>
    %804 = vector.multi_reduction <add>, %803, %cst_337 [0] : vector<2x32xf32> to vector<32xf32>
    %805 = vector.shape_cast %804 : vector<32xf32> to vector<1x32xf32>
    %c72 = arith.constant 72 : index
    %c0_338 = arith.constant 0 : index
    %806 = vector.load %arg3[%c72, %c0_338] : memref<104x48xf32, #tpu.memory_space<vmem>>, vector<32x32xf32>
    %807 = vector.broadcast %805 : vector<1x32xf32> to vector<32x32xf32>
    %808 = arith.mulf %806, %807 : vector<32x32xf32>
    %cst_339 = arith.constant dense<0.000000e+00> : vector<32xf32>
    %809 = vector.multi_reduction <add>, %808, %cst_339 [1] : vector<32x32xf32> to vector<32xf32>
    %810 = vector.shape_cast %809 : vector<32xf32> to vector<32x1xf32>
    %811 = vector.broadcast %810 : vector<32x1xf32> to vector<32x32xf32>
    %812 = arith.mulf %811, %40 : vector<32x32xf32>
    %813 = vector.extract_strided_slice %131 {offsets = [0, 0], sizes = [8, 32], strides = [1, 1]} : vector<16x32xf32> to vector<8x32xf32>
    %c0_340 = arith.constant 0 : index
    %c0_341 = arith.constant 0 : index
    %814 = vector.load %arg4[%c0_340, %c0_341] : memref<64x32xf32, #tpu.memory_space<vmem>>, vector<8x32xf32>
    tpu.vector_store %arg4[%c0_340, %c0_341], %813 {strides = array<i32>} : memref<64x32xf32, #tpu.memory_space<vmem>>, vector<8x32xf32>,
    %815 = vector.extract_strided_slice %812 {offsets = [0, 0], sizes = [16, 32], strides = [1, 1]} : vector<32x32xf32> to vector<16x32xf32>
    %c8_342 = arith.constant 8 : index
    %c0_343 = arith.constant 0 : index
    %816 = vector.load %arg4[%c8_342, %c0_343] : memref<64x32xf32, #tpu.memory_space<vmem>>, vector<16x32xf32>
    tpu.vector_store %arg4[%c8_342, %c0_343], %815 {strides = array<i32>} : memref<64x32xf32, #tpu.memory_space<vmem>>, vector<16x32xf32>,
    %817 = vector.extract_strided_slice %783 {offsets = [0, 0], sizes = [1, 32], strides = [1, 1]} : vector<2x32xf32> to vector<1x32xf32>
    %c24_344 = arith.constant 24 : index
    %c0_345 = arith.constant 0 : index
    %818 = vector.load %arg4[%c24_344, %c0_345] : memref<64x32xf32, #tpu.memory_space<vmem>>, vector<1x32xf32>
    tpu.vector_store %arg4[%c24_344, %c0_345], %817 {strides = array<i32>} : memref<64x32xf32, #tpu.memory_space<vmem>>, vector<1x32xf32>,
    %819 = vector.extract_strided_slice %131 {offsets = [8, 0], sizes = [8, 32], strides = [1, 1]} : vector<16x32xf32> to vector<8x32xf32>
    %c32_346 = arith.constant 32 : index
    %c0_347 = arith.constant 0 : index
    %820 = vector.load %arg4[%c32_346, %c0_347] : memref<64x32xf32, #tpu.memory_space<vmem>>, vector<8x32xf32>
    tpu.vector_store %arg4[%c32_346, %c0_347], %819 {strides = array<i32>} : memref<64x32xf32, #tpu.memory_space<vmem>>, vector<8x32xf32>,
    %821 = vector.extract_strided_slice %812 {offsets = [16, 0], sizes = [16, 32], strides = [1, 1]} : vector<32x32xf32> to vector<16x32xf32>
    %c40_348 = arith.constant 40 : index
    %c0_349 = arith.constant 0 : index
    %822 = vector.load %arg4[%c40_348, %c0_349] : memref<64x32xf32, #tpu.memory_space<vmem>>, vector<16x32xf32>
    tpu.vector_store %arg4[%c40_348, %c0_349], %821 {strides = array<i32>} : memref<64x32xf32, #tpu.memory_space<vmem>>, vector<16x32xf32>,
    %823 = vector.extract_strided_slice %783 {offsets = [1, 0], sizes = [1, 32], strides = [1, 1]} : vector<2x32xf32> to vector<1x32xf32>
    %c56_350 = arith.constant 56 : index
    %c0_351 = arith.constant 0 : index
    %824 = vector.load %arg4[%c56_350, %c0_351] : memref<64x32xf32, #tpu.memory_space<vmem>>, vector<1x32xf32>
    tpu.vector_store %arg4[%c56_350, %c0_351], %823 {strides = array<i32>} : memref<64x32xf32, #tpu.memory_space<vmem>>, vector<1x32xf32>,
    return
  }
}

</mosaic_0001>

<bundles_post_ra>
// kernel: albef_forward.1
= control target key start
LH: loop header
LB: loop body
LE: loop exit
PB: predicated region body
PF: predicated region fallthrough
CT: control target
= control target key end

     0   :  { %vm75_vm0 = vcmask 392192   ;;  %vm21_vm1 = vcmask 261120   ;;  %v3761_v39 = vmov 32.0   ;;  %s3764_s8 = smov 126   ;;  %s4937_s2 = inlined_call_operand.vmem [shape: bf16[576,48], index: 2, kind: input, shape index: {}]   ;;  %s4938_s3 = inlined_call_operand.vmem [shape: f32[104,48], index: 3, kind: input, shape index: {}]   ;;  %s4939_s0 = inlined_call_operand.vmem [shape: bf16[40,48], index: 0, kind: input, shape index: {}]   ;;  %s4940_s1 = inlined_call_operand.vmem [shape: f32[48,32], index: 1, kind: input, shape index: {}]   ;;  %s4941_s4 = inlined_call_operand.vmem [shape: f32[64,32], index: 4, kind: output, shape index: {0}]   ;;  %s4942_s5 = inlined_call_operand.vmem [shape: f32[6,128], index: 5, kind: output, shape index: {1}]   ;;  %s4943_s6 = inlined_call_operand.vmem [shape: f32[24,32], index: 6, kind: output, shape index: {2}]  }
   0x1   :  { %v3537_v0 = vld [vmem:[%s4937_s2 + $0x10] sm:$0xff]  ;;  %v3536_v1 = vld [vmem:[%s4937_s2 + $0x8] sm:$0xff]  ;;  %v3535_v2 = vld [vmem:[%s4937_s2] sm:$0xff]  ;;  %3669 = vrcp.f32 %v3761_v39 }
   0x2   :  { %90 = vmatpush.bf16.msra.mxu0 %v3537_v0  ;;  %v3533_v3 = vld [vmem:[%s4939_s0] sm:$0xff]  ;;  %v3534_v4 = vld [vmem:[%s4939_s0 + $0x8] sm:$0xff]  ;;  %v3538_v7 = vld [vmem:[%s4937_s2 + $0x18] sm:$0xff] }
   0x3   :  { %v3540_v5 = vld [vmem:[%s4937_s2 + $0x28] sm:$0xff]  ;;  %v3539_v6 = vld [vmem:[%s4937_s2 + $0x20] sm:$0xff]  ;;  %v35_v8 = vld [vmem:[%s4939_s0 + $0x10] sm:$0xf] }
   0x4   :  { %151 = vmatpush.bf16.msra.mxu1 %v3540_v5  ;;  %v53_v9 = vunpack.c.l.b16 %v35_v8  ;;  %v3640_v12 = vld [vmem:[%s4938_s3] ss:$0 sm:$0xff]  ;;  %v3641_v26 = vld [vmem:[%s4938_s3 + $0x1] ss:$0 sm:$0xff] }
   0x5   :  { %v3887_v8 = vld [vmem:[%s4940_s1] sm:$0xff] }
   0x6   :  { %91 = vmatpush.bf16.msra.mxu0 %v3536_v1  ;;  %v56_v10 = vpack.c.b16 %v53_v9, %v53_v9  ;;  %v3892_v9 = vld [vmem:[%s4940_s1 + $0x8] sm:$0xff] }
   0x7   :  { %v3670_v40 = vpop.eup %3669 }
   0x8   :  { %152 = vmatpush.bf16.msra.mxu1 %v3539_v6  ;;  %v187_v41 = vmul.f32 32.0, %v3670_v40  ;;  %vm191_vm2 = vweird.f32 %v3670_v40  ;;  %v3542_v6 = vld [vmem:[%s4937_s2 + $0x38] sm:$0xff] }
   0x9   :  { %330 = vmatpush.bf16.msra.mxu2 %v3542_v6 }
   0xa   :  { %92 = vmatpush.bf16.msra.mxu0 %v3535_v2  ;;  %v188_v42 = vsub.f32 1.0, %v187_v41 }
   0xc   :  { %153 = vmatpush.bf16.msra.mxu1 %v3538_v7  ;;  %v189_v44 = vmul.f32 %v3670_v40, %v188_v42  ;;  %v3541_v7 = vld [vmem:[%s4937_s2 + $0x30] sm:$0xff] }
   0xd   :  { %3173 = vmatmul.msk.bf16.vlgmr.msra.gmra.mxu0 %vm75_vm0, %v3533_v3  ;;  %331 = vmatpush.bf16.msra.mxu2 %v3541_v7 }
   0xe   :  { %v190_v45 = vadd.f32 %v3670_v40, %v189_v44  ;;  %v3642_v44 = vld [vmem:[%s4938_s3 + $0x2] ss:$0 sm:$0xff] }
  0x10   :  { %v3851_v47 = vsel %vm191_vm2, %v3670_v40, %v190_v45 }
  0x1d   :  { %3174 = vmatmul.msk.bf16.gmra.mxu0 %vm75_vm0, %v3534_v4 }
  0x2d   :  { %3175 = vmatmul.msk.bf16.gmra.mxu0 %vm75_vm0, %v56_v10  ;;  %v302_v10 = vpack.c.bf16 %v3892_v9, %v3887_v8 }
  0x2f   :  { %3199 = vmatmul.msk.bf16.vlgmr.msra.gmra.mxu2 %vm21_vm1, %v302_v10 }
  0x8a   :  { %v94_v11 = vpop.f32.mrf.mxu0 }
  0x8b   :  { %v95_v14 = vadd.f32 %v3640_v12, %v94_v11  ;;  %v3544_v11 = vld [vmem:[%s4937_s2 + $0x48] sm:$0xff] }
  0x8c   :  { %374 = vmatpush.bf16.msra.mxu3 %v3544_v11 }
  0x92   :  { %v96_v13 = vpop.f32.mrf.mxu0 }
  0x93   :  { %v97_v15 = vadd.f32 %v3640_v12, %v96_v13 }
  0x95   :  { %v108_v16 = vpack.c.bf16 %v97_v15, %v95_v14  ;;  %v3543_v15 = vld [vmem:[%s4937_s2 + $0x40] sm:$0xff] }
  0x96   :  { %375 = vmatpush.bf16.msra.mxu3 %v3543_v15 }
  0x97   :  { %3188 = vmatmul.msk.bf16.vlgmr.msra.gmra.mxu1 %vm75_vm0, %v108_v16  ;;  %v3545_v16 = vld [vmem:[%s4937_s2 + $0x50] sm:$0xff] }
  0x9a   :  { %v99_v17 = vpop.f32.mrf.mxu0 }
  0x9b   :  { %v100_v19 = vadd.f32 %v3640_v12, %v99_v17 }
  0xa2   :  { %v101_v18 = vpop.f32.mrf.mxu0 }
  0xa3   :  { %v102_v20 = vadd.f32 %v3640_v12, %v101_v18 }
  0xa5   :  { %v109_v21 = vpack.c.bf16 %v102_v20, %v100_v19 }
  0xa7   :  { %3189 = vmatmul.msk.bf16.gmra.mxu1 %vm75_vm0, %v109_v21 }
  0xaa   :  { %v104_v22 = vpop.f32.mrf.mxu0 }
  0xab   :  { %v105_v23 = vadd.f32 %v3640_v12, %v104_v22  ;;  %v3546_v12 = vld [vmem:[%s4937_s2 + $0x58] sm:$0xff] }
  0xac   :  { %415 = vmatpush.bf16.msrb.mxu2 %v3546_v12 }
  0xad   :  { %v110_v24 = vpack.c.bf16 %v105_v23, %v105_v23 }
  0xb0   :  { %416 = vmatpush.bf16.msrb.mxu2 %v3545_v16 }
  0xb2   :  { %v106_v25 = vpop.f32.mrf.mxu0 }
  0xb7   :  { %3190 = vmatmul.msk.bf16.gmra.mxu1 %vm75_vm0, %v110_v24 }
 0x114   :  { %v155_v27 = vpop.f32.mrf.mxu1 }
 0x115   :  { %v156_v28 = vadd.f32 %v3641_v26, %v155_v27 }
 0x117   :  { %v171_v29 = vsel %vm21_vm1, %v156_v28, 0.0 }
 0x118   :  { %172 = vadd.xlane.f32.xlu0 %v171_v29 }
 0x11c   :  { %v157_v30 = vpop.f32.mrf.mxu1 }
 0x11d   :  { %v158_v31 = vadd.f32 %v3641_v26, %v157_v30 }
 0x11f   :  { %v174_v32 = vsel %vm21_vm1, %v158_v31, 0.0 }
 0x120   :  { %175 = vadd.xlane.f32.xlu0 %v174_v32 }
 0x124   :  { %v160_v33 = vpop.f32.mrf.mxu1 }
 0x125   :  { %v161_v34 = vadd.f32 %v3641_v26, %v160_v33 }
 0x127   :  { %v177_v35 = vsel %vm21_vm1, %v161_v34, 0.0 }
 0x128   :  { %178 = vadd.xlane.f32.xlu1 %v177_v35 }
 0x12c   :  { %v162_v36 = vpop.f32.mrf.mxu1 }
 0x12d   :  { %v163_v37 = vadd.f32 %v3641_v26, %v162_v36 }
 0x12f   :  { %v180_v38 = vsel %vm21_vm1, %v163_v37, 0.0 }
 0x130   :  { %181 = vadd.xlane.f32.xlu1 %v180_v38 }
 0x134   :  { %v165_v43 = vpop.f32.mrf.mxu1 }
 0x135   :  { %v166_v60 = vadd.f32 %v3641_v26, %v165_v43 }
 0x137   :  { %v183_v63 = vsel %vm21_vm1, %v166_v60, 0.0 }
 0x13c   :  { %v167_v46 = vpop.f32.mrf.mxu1 }
 0x18b   :  { %v173_v48 = vpop.xlane.xlu0 %172 }
 0x18c   :  { %v193_v49 = vmul.f32 %v3851_v47, %v173_v48 }
 0x18e   :  { %v3854_v50 = vsub.f32 %v156_v28, %v193_v49 }
 0x190   :  { %v203_v51 = vmul.f32 %v3854_v50, %v3854_v50 }
 0x192   :  { %v208_v52 = vsel %vm21_vm1, %v203_v51, 0.0 }
 0x193   :  { %209 = vadd.xlane.f32.xlu2 %v208_v52  ;;  %v176_v53 = vpop.xlane.xlu0 %175 }
 0x194   :  { %v194_v54 = vmul.f32 %v3851_v47, %v176_v53  ;;  %v3643_v53 = vld [vmem:[%s4938_s3 + $0x3] ss:$0 sm:$0xff] }
 0x196   :  { %v3860_v55 = vsub.f32 %v158_v31, %v194_v54 }
 0x198   :  { %v204_v56 = vmul.f32 %v3860_v55, %v3860_v55 }
 0x19a   :  { %v211_v57 = vsel %vm21_vm1, %v204_v56, 0.0 }
 0x19b   :  { %v179_v58 = vpop.xlane.xlu1 %178  ;;  %212 = vadd.xlane.f32.xlu2 %v211_v57 }
 0x19c   :  { %v195_v59 = vmul.f32 %v3851_v47, %v179_v58 }
 0x19e   :  { %v3866_v61 = vsub.f32 %v161_v34, %v195_v59 }
 0x1a0   :  { %v205_v62 = vmul.f32 %v3866_v61, %v3866_v61 }
 0x1a2   :  { %v214_v0 = vsel %vm21_vm1, %v205_v62, 0.0 }
 0x1a3   :  { %v182_v1 = vpop.xlane.xlu1 %181  ;;  %215 = vadd.xlane.f32.xlu0 %v214_v0  ;;  %184 = vadd.xlane.f32.xlu2 %v183_v63 }
 0x1a4   :  { %v196_v2 = vmul.f32 %v3851_v47, %v182_v1 }
 0x1a6   :  { %v3873_v3 = vsub.f32 %v163_v37, %v196_v2 }
 0x1a8   :  { %v206_v4 = vmul.f32 %v3873_v3, %v3873_v3 }
 0x1aa   :  { %v217_v5 = vsel %vm21_vm1, %v206_v4, 0.0 }
 0x1ab   :  { %218 = vadd.xlane.f32.xlu1 %v217_v5 }
 0x206   :  { %v210_v13 = vpop.xlane.xlu2 %209 }
 0x207   :  { %v223_v14 = vmul.f32 %v210_v13, %v3851_v47 }
 0x209   :  { %v228_v17 = vadd.f32 1e-12, %v223_v14 }
 0x20b   :  { %3671 = vrsqrt.f32 %v228_v17  ;;  %vm239_vm4 = vweird.f32 %v228_v17 }
 0x20e   :  { %v213_v18 = vpop.xlane.xlu2 %212 }
 0x20f   :  { %v224_v19 = vmul.f32 %v213_v18, %v3851_v47 }
 0x211   :  { %v3672_v20 = vpop.eup %3671  ;;  %v229_v21 = vadd.f32 1e-12, %v224_v19  ;;  %v333_v19 = vpop.f32.mrf.mxu2 }
 0x212   :  { %v234_v22 = vmul.f32 %v3672_v20, %v228_v17  ;;  %vm240_vm3 = vweird.f32 %v3672_v20 }
 0x213   :  { %3673 = vrsqrt.f32 %v229_v21  ;;  %vm241_vm5 = vmor %vm239_vm4, %vm240_vm3  ;;  %vm249_vm7 = vweird.f32 %v229_v21 }
 0x214   :  { %v235_v23 = vmul.f32 %v3672_v20, %v234_v22 }
 0x216   :  { %v236_v24 = vmul.f32 0.5, %v235_v23  ;;  %v185_v25 = vpop.xlane.xlu2 %184  ;;  %v216_v26 = vpop.xlane.xlu0 %215 }
 0x217   :  { %v197_v27 = vmul.f32 %v3851_v47, %v185_v25  ;;  %v225_v28 = vmul.f32 %v216_v26, %v3851_v47 }
 0x218   :  { %v237_v29 = vsub.f32 1.5, %v236_v24 }
 0x219   :  { %v3674_v30 = vpop.eup %3673  ;;  %v3913_v31 = vsub.f32 %v166_v60, %v197_v27  ;;  %v230_v32 = vadd.f32 1e-12, %v225_v28  ;;  %v335_v25 = vpop.f32.mrf.mxu2 }
 0x21a   :  { %v238_v33 = vmul.f32 %v3672_v20, %v237_v29  ;;  %v244_v34 = vmul.f32 %v3674_v30, %v229_v21  ;;  %vm250_vm6 = vweird.f32 %v3674_v30 }
 0x21b   :  { %3675 = vrsqrt.f32 %v230_v32  ;;  %v207_v35 = vmul.f32 %v3913_v31, %v3913_v31  ;;  %vm251_vm8 = vmor %vm249_vm7, %vm250_vm6  ;;  %vm259_vm10 = vweird.f32 %v230_v32 }
 0x21c   :  { %v245_v36 = vmul.f32 %v3674_v30, %v244_v34  ;;  %v242_v38 = vsel %vm241_vm5, %v3672_v20, %v238_v33 }
 0x21d   :  { %v220_v37 = vsel %vm21_vm1, %v207_v35, 0.0  ;;  %v283_v45 = vmul.f32 %v242_v38, %v3854_v50  ;;  %v3645_v38 = vld [vmem:[%s4938_s3 + $0x5] ss:$0 sm:$0xff] }
 0x21e   :  { %v246_v39 = vmul.f32 0.5, %v245_v36  ;;  %v219_v40 = vpop.xlane.xlu1 %218  ;;  %221 = vadd.xlane.f32.xlu0 %v220_v37 }
 0x21f   :  { %v226_v41 = vmul.f32 %v219_v40, %v3851_v47  ;;  %v289_v54 = vmul.f32 %v3642_v44, %v283_v45 }
 0x220   :  { %v247_v42 = vsub.f32 1.5, %v246_v39 }
 0x221   :  { %v3676_v43 = vpop.eup %3675  ;;  %v231_v46 = vadd.f32 1e-12, %v226_v41  ;;  %v3927_v50 = vadd.f32 %v3643_v53, %v289_v54 }
 0x222   :  { %v248_v48 = vmul.f32 %v3674_v30, %v247_v42  ;;  %v254_v49 = vmul.f32 %v3676_v43, %v230_v32  ;;  %vm260_vm9 = vweird.f32 %v3676_v43 }
 0x223   :  { %3677 = vrsqrt.f32 %v231_v46  ;;  %vm261_vm11 = vmor %vm259_vm10, %vm260_vm9  ;;  %vm269_vm13 = vweird.f32 %v231_v46 }
 0x224   :  { %v252_v51 = vsel %vm251_vm8, %v3674_v30, %v248_v48  ;;  %v255_v52 = vmul.f32 %v3676_v43, %v254_v49 }
 0x225   :  { %v284_v56 = vmul.f32 %v252_v51, %v3860_v55 }
 0x226   :  { %v256_v57 = vmul.f32 0.5, %v255_v52 }
 0x227   :  { %v290_v58 = vmul.f32 %v3642_v44, %v284_v56 }
 0x228   :  { %v257_v59 = vsub.f32 1.5, %v256_v57  ;;  %v3644_v57 = vld [vmem:[%s4938_s3 + $0x4] ss:$0 sm:$0xff] }
 0x229   :  { %v3678_v60 = vpop.eup %3677  ;;  %v3929_v62 = vadd.f32 %v3643_v53, %v290_v58 }
 0x22a   :  { %v258_v63 = vmul.f32 %v3676_v43, %v257_v59  ;;  %v264_v0 = vmul.f32 %v3678_v60, %v231_v46  ;;  %vm270_vm12 = vweird.f32 %v3678_v60  ;;  %v334_v59 = vadd.f32 %v3644_v57, %v333_v19  ;;  %v433_v19 = vld [vmem:[%s4940_s1 + $0x20] sm:$0xff] }
 0x22b   :  { %v3933_v1 = vpack.c.bf16 %v3929_v62, %v3927_v50  ;;  %vm271_vm14 = vmor %vm269_vm13, %vm270_vm12  ;;  %vm435_vm4 = vcmp.gt.f32.partialorder %v433_v19, 0.0  ;;  %vm851_vm13 = vcmask 123904  }
 0x22c   :  { %v265_v2 = vmul.f32 %v3678_v60, %v264_v0  ;;  %v262_v55 = vsel %vm261_vm11, %v3676_v43, %v258_v63  ;;  %vm627_vm11 = vcmask 130048  }
 0x22d   :  { %3208 = vmatmul.msk.bf16.vlgmr.msra.gmra.mxu3 %vm21_vm1, %v3933_v1  ;;  %3219 = vmatmul.msk.bf16.vlgmr.msrb.gmra.mxu2 %vm21_vm1, %v3933_v1  ;;  %v285_v6 = vmul.f32 %v262_v55, %v3866_v61 }
 0x22e   :  { %v266_v4 = vmul.f32 0.5, %v265_v2 }
 0x22f   :  { %v291_v11 = vmul.f32 %v3642_v44, %v285_v6 }
 0x230   :  { %v267_v5 = vsub.f32 1.5, %v266_v4 }
 0x231   :  { %v3941_v14 = vadd.f32 %v3643_v53, %v291_v11 }
 0x232   :  { %v268_v7 = vmul.f32 %v3678_v60, %v267_v5 }
 0x234   :  { %v272_v10 = vsel %vm271_vm14, %v3678_v60, %v268_v7  ;;  %v336_v60 = vadd.f32 %v3644_v57, %v335_v25 }
 0x235   :  { %v286_v12 = vmul.f32 %v272_v10, %v3873_v3 }
 0x236   :  { %v436_v63 = vpack.c.bf16 %v336_v60, %v334_v59 }
 0x237   :  { %v292_v13 = vmul.f32 %v3642_v44, %v286_v12 }
 0x239   :  { %v3943_v15 = vadd.f32 %v3643_v53, %v292_v13  ;;  %v432_v13 = vld [vmem:[%s4940_s1 + $0x18] sm:$0xff] }
 0x23a   :  { %vm434_vm3 = vcmp.gt.f32.partialorder %v432_v13, 0.0 }
 0x23b   :  { %v3947_v16 = vpack.c.bf16 %v3943_v15, %v3941_v14 }
 0x23d   :  { %3209 = vmatmul.msk.bf16.gmra.mxu3 %vm21_vm1, %v3947_v16  ;;  %3220 = vmatmul.msk.bf16.gmra.mxu2 %vm21_vm1, %v3947_v16 }
 0x291   :  { %v222_v61 = vpop.xlane.xlu0 %221 }
 0x292   :  { %v227_v17 = vmul.f32 %v222_v61, %v3851_v47 }
 0x294   :  { %v232_v18 = vadd.f32 1e-12, %v227_v17 }
 0x296   :  { %3679 = vrsqrt.f32 %v232_v18  ;;  %vm279_vm0 = vweird.f32 %v232_v18 }
 0x29c   :  { %v3680_v3 = vpop.eup %3679 }
 0x29d   :  { %v274_v20 = vmul.f32 %v3680_v3, %v232_v18  ;;  %vm280_vm15 = vweird.f32 %v3680_v3 }
 0x29e   :  { %vm281_vm2 = vmor %vm279_vm0, %vm280_vm15  ;;  %vm881_vm15 = vcmask 64512  }
 0x29f   :  { %v275_v21 = vmul.f32 %v3680_v3, %v274_v20 }
 0x2a1   :  { %v276_v22 = vmul.f32 0.5, %v275_v21 }
 0x2a3   :  { %v277_v23 = vsub.f32 1.5, %v276_v22 }
 0x2a5   :  { %v278_v24 = vmul.f32 %v3680_v3, %v277_v23 }
 0x2a7   :  { %v282_v26 = vsel %vm281_vm2, %v3680_v3, %v278_v24  ;;  %vm1015_vm2 = vcmask 254976  }
 0x2a8   :  { %v287_v27 = vmul.f32 %v282_v26, %v3913_v31  ;;  %v3963_v31 = vld [vmem:[%s4938_s3 + $0x6] ss:$0 sm:$0xff] }
 0x2aa   :  { %v293_v28 = vmul.f32 %v3642_v44, %v287_v27 }
 0x2ac   :  { %v299_v29 = vadd.f32 %v3643_v53, %v293_v28 }
 0x2ae   :  { %v340_v30 = vpack.c.bf16 %v299_v29, %v299_v29 }
 0x2b0   :  { %v377_v32 = vpop.f32.mrf.mxu3  ;;  %3210 = vmatmul.msk.bf16.gmra.mxu3 %vm21_vm1, %v340_v30  ;;  %v418_v33 = vpop.f32.mrf.mxu2  ;;  %3221 = vmatmul.msk.bf16.gmra.mxu2 %vm21_vm1, %v340_v30 }
 0x2b1   :  { %v419_v49 = vadd.f32 %v3963_v31, %v418_v33  ;;  %v378_v53 = vadd.f32 %v3645_v38, %v377_v32 }
 0x2b8   :  { %v379_v34 = vpop.f32.mrf.mxu3  ;;  %v420_v35 = vpop.f32.mrf.mxu2 }
 0x2b9   :  { %v421_v45 = vadd.f32 %v3963_v31, %v420_v35  ;;  %v380_v51 = vadd.f32 %v3645_v38, %v379_v34 }
 0x2bb   :  { %v508_v54 = vpack.c.bf16 %v421_v45, %v419_v49  ;;  %v437_v56 = vpack.c.bf16 %v380_v51, %v378_v53  ;;  %v3548_v53 = vld [vmem:[%s4937_s2 + $0x68] sm:$0xff] }
 0x2bc   :  { %558 = vmatpush.bf16.msrb.mxu1 %v3548_v53 }
 0x2bd   :  { %v443_v58 = vsel %vm21_vm1, %v437_v56, 0 }
 0x2c0   :  { %v382_v36 = vpop.f32.mrf.mxu3  ;;  %v423_v37 = vpop.f32.mrf.mxu2 }
 0x2c1   :  { %v383_v41 = vadd.f32 %v3645_v38, %v382_v36  ;;  %v424_v42 = vadd.f32 %v3963_v31, %v423_v37 }
 0x2c8   :  { %v384_v39 = vpop.f32.mrf.mxu3  ;;  %v425_v40 = vpop.f32.mrf.mxu2 }
 0x2c9   :  { %v385_v43 = vadd.f32 %v3645_v38, %v384_v39  ;;  %v426_v44 = vadd.f32 %v3963_v31, %v425_v40 }
 0x2cb   :  { %v509_v46 = vpack.c.bf16 %v426_v44, %v424_v42  ;;  %v438_v48 = vpack.c.bf16 %v385_v43, %v383_v41 }
 0x2cd   :  { %522 = vmatpush.bf16.msrb.mxu0 %v509_v46  ;;  %v446_v52 = vsel %vm21_vm1, %v438_v48, 0 }
 0x2ce   :  { %454 = vmatpush.bf16.xpose.msrb.mxu3 %v446_v52 }
 0x2d1   :  { %523 = vmatpush.bf16.msrb.mxu0 %v508_v54  ;;  %v3547_v54 = vld [vmem:[%s4937_s2 + $0x60] sm:$0xff] }
 0x2d2   :  { %559 = vmatpush.bf16.msrb.mxu1 %v3547_v54 }
 0x2d6   :  { %455 = vmatpush.bf16.xpose.msrb.mxu3 %v443_v58 }
 0x2dd   :  { %3222 = vmatmul.msk.bf16.vlgmr.msrb.gmra.mxu3 %vm21_vm1, %v436_v63 }
 0x333   :  { %v387_v0 = vpop.f32.mrf.mxu3  ;;  %v428_v2 = vpop.f32.mrf.mxu2 }
 0x334   :  { %v388_v55 = vadd.f32 %v3645_v38, %v387_v0  ;;  %v429_v36 = vadd.f32 %v3963_v31, %v428_v2 }
 0x336   :  { %v466_v4 = vperm.slane %v388_v55, 0  ;;  %v510_v41 = vperm.slane %v429_v36, 0  ;;  %v3549_v36 = vld [vmem:[%s4937_s2 + $0x70] sm:$0xff] }
 0x338   :  { %v468_v5 = vmul.f32 %v466_v4, %v336_v60  ;;  %v467_v6 = vmul.f32 %v466_v4, %v334_v59 }
 0x33a   :  { %v472_v7 = vsel %vm21_vm1, %v468_v5, 0.0  ;;  %v469_v10 = vsel %vm21_vm1, %v467_v6, 0.0 }
 0x33b   :  { %v389_v11 = vpop.f32.mrf.mxu3  ;;  %v430_v12 = vpop.f32.mrf.mxu2  ;;  %473 = vadd.xlane.f32.xlu2 %v472_v7  ;;  %470 = vadd.xlane.f32.xlu1 %v469_v10  ;;  %v3647_v10 = vld [vmem:[%s4938_s3 + $0x7] ss:$0 sm:$0xff] }
 0x360   :  { %v457_v61 = vpop.f32.mrf.mxu3 }
 0x361   :  { %v462_v17 = vmul.f32 0.17677669, %v457_v61 }
 0x363   :  { %v464_v18 = vsel %vm434_vm3, %v462_v17, -1e+30  ;;  %vm796_vm3 = vcmask 33792  }
 0x364   :  { %v477_v3 = vsel %vm21_vm1, %v464_v18, -inf }
 0x365   :  { %478 = vmax.xlane.f32.xlu0 %v477_v3 }
 0x368   :  { %v459_v20 = vpop.f32.mrf.mxu3 }
 0x369   :  { %v463_v21 = vmul.f32 0.17677669, %v459_v20  ;;  %v3762_v20 = vmov 0.0  }
 0x36a   :  { %22 = vst.msk [vmem:[%s4941_s4] sm:$0xff] %vm21_vm1, %v3762_v20 }
 0x36b   :  { %v465_v22 = vsel %vm435_vm4, %v463_v21, -1e+30  ;;  %23 = vst.msk [vmem:[%s4941_s4 + $0x8] sm:$0xff] %vm21_vm1, %v3762_v20  ;;  %vm1064_vm4 = vcmask 1041408  }
 0x36c   :  { %v480_v23 = vsel %vm21_vm1, %v465_v22, -inf  ;;  %24 = vst.msk [vmem:[%s4941_s4 + $0x10] sm:$0xff] %vm21_vm1, %v3762_v20 }
 0x36d   :  { %481 = vmax.xlane.f32.xlu1 %v480_v23  ;;  %25 = vst.msk [vmem:[%s4941_s4 + $0x18] sm:$0xff] %vm21_vm1, %v3762_v20 }
 0x36e   :  { %26 = vst.msk [vmem:[%s4941_s4 + $0x20] sm:$0xff] %vm21_vm1, %v3762_v20 }
 0x36f   :  { %27 = vst.msk [vmem:[%s4941_s4 + $0x28] sm:$0xff] %vm21_vm1, %v3762_v20 }
 0x370   :  { %28 = vst.msk [vmem:[%s4941_s4 + $0x30] sm:$0xff] %vm21_vm1, %v3762_v20 }
 0x371   :  { %29 = vst.msk [vmem:[%s4941_s4 + $0x38] sm:$0xff] %vm21_vm1, %v3762_v20 }
 0x372   :  { %30 = vst [vmem:[%s4942_s5] sm:$0x3f] %v3762_v20 }
 0x3ae   :  { %v471_v24 = vpop.xlane.xlu1 %470  ;;  %v474_v30 = vpop.xlane.xlu2 %473 }
 0x3af   :  { %v475_v25 = vmul.f32 0.17677669, %v471_v24  ;;  %v476_v34 = vmul.f32 0.17677669, %v474_v30 }
 0x3d8   :  { %v479_v26 = vpop.xlane.xlu0 %478 }
 0x3d9   :  { %v483_v27 = vmax.f32 %v479_v26, %v475_v25 }
 0x3db   :  { %v485_v28 = vsub.f32 %v464_v18, %v483_v27  ;;  %v491_v29 = vsub.f32 %v475_v25, %v483_v27 }
 0x3dd   :  { %v487_v32 = vmul.f32 1.442695, %v485_v28  ;;  %v493_v33 = vmul.f32 1.442695, %v491_v29 }
 0x3df   :  { %3681 = vpow2.f32 %v487_v32  ;;  %v3554_v32 = vld [vmem:[%s4937_s2 + $0xb8] sm:$0xff] }
 0x3e0   :  { %3683 = vpow2.f32 %v493_v33  ;;  %v482_v35 = vpop.xlane.xlu1 %481  ;;  %v3550_v33 = vld [vmem:[%s4937_s2 + $0x78] sm:$0xff]  ;;  %723 = vmatpush.bf16.msra.mxu0 %v3554_v32 }
 0x3e1   :  { %v484_v37 = vmax.f32 %v482_v35, %v476_v34  ;;  %685 = vmatpush.bf16.msra.mxu3 %v3550_v33  ;;  %v3553_v35 = vld [vmem:[%s4937_s2 + $0xb0] sm:$0xff] }
 0x3e3   :  { %v486_v38 = vsub.f32 %v465_v22, %v484_v37  ;;  %v492_v39 = vsub.f32 %v476_v34, %v484_v37 }
 0x3e4   :  { %724 = vmatpush.bf16.msra.mxu0 %v3553_v35 }
 0x3e5   :  { %v3682_v40 = vpop.eup %3681  ;;  %v489_v42 = vmul.f32 1.442695, %v486_v38  ;;  %v495_v43 = vmul.f32 1.442695, %v492_v39  ;;  %686 = vmatpush.bf16.msra.mxu3 %v3549_v36 }
 0x3e6   :  { %v3684_v44 = vpop.eup %3683  ;;  %v497_v45 = vsel %vm21_vm1, %v3682_v40, 0.0 }
 0x3e7   :  { %3685 = vpow2.f32 %v489_v42  ;;  %498 = vadd.xlane.f32.xlu2 %v497_v45  ;;  %v511_v46 = vmul.f32 %v3684_v44, %v510_v41 }
 0x3e8   :  { %3687 = vpow2.f32 %v495_v43 }
 0x3ed   :  { %v3686_v48 = vpop.eup %3685 }
 0x3ee   :  { %v3688_v49 = vpop.eup %3687  ;;  %v500_v51 = vsel %vm21_vm1, %v3686_v48, 0.0  ;;  %v507_v52 = vpack.c.bf16 %v3686_v48, %v3682_v40 }
 0x3ef   :  { %501 = vadd.xlane.f32.xlu0 %v500_v51  ;;  %v512_v31 = vmul.f32 %v3688_v49, %v510_v41 }
 0x3f0   :  { %3223 = vmatmul.msk.bf16.vlgmr.msrb.gmra.mxu0 %vm21_vm1, %v507_v52 }
 0x45a   :  { %v499_v56 = vpop.xlane.xlu2 %498 }
 0x45b   :  { %v503_v57 = vadd.f32 %v3684_v44, %v499_v56 }
 0x45d   :  { %3689 = vrcp.f32 %v503_v57 }
 0x462   :  { %v502_v58 = vpop.xlane.xlu0 %501 }
 0x463   :  { %v504_v59 = vadd.f32 %v3688_v49, %v502_v58  ;;  %v3690_v0 = vpop.eup %3689  ;;  %v3648_v49 = vld [vmem:[%s4938_s3 + $0x8] ss:$0 sm:$0xff] }
 0x465   :  { %3691 = vrcp.f32 %v504_v59 }
 0x46b   :  { %v3692_v5 = vpop.eup %3691 }
 0x46d   :  { %v525_v60 = vpop.f32.mrf.mxu0 }
 0x46e   :  { %v526_v63 = vadd.f32 %v525_v60, %v511_v46 }
 0x470   :  { %v530_v2 = vmul.f32 %v3690_v0, %v526_v63 }
 0x475   :  { %v527_v55 = vpop.f32.mrf.mxu0 }
 0x476   :  { %v528_v4 = vadd.f32 %v527_v55, %v512_v31  ;;  %v3556_v55 = vld [vmem:[%s4937_s2 + $0x118] sm:$0xff] }
 0x478   :  { %v531_v6 = vmul.f32 %v3692_v5, %v528_v4 }
 0x47a   :  { %v532_v7 = vpack.c.bf16 %v531_v6, %v530_v2  ;;  %v624_v2 = vld [vmem:[%s4938_s3 + $0x38] sm:$0x3] }
 0x47b   :  { %v625_v5 = vpack.c.bf16 %v624_v2, %v624_v2 }
 0x47c   :  { %3232 = vmatmul.msk.bf16.vlgmr.msrb.gmra.mxu1 %vm21_vm1, %v532_v7  ;;  %v3555_v7 = vld [vmem:[%s4937_s2 + $0x110] sm:$0xff] }
 0x4f9   :  { %v561_v11 = vpop.f32.mrf.mxu1 }
 0x4fa   :  { %v566_v12 = vadd.f32 %v561_v11, %v3887_v8 }
 0x4fc   :  { %v570_v13 = vadd.f32 %v3647_v10, %v566_v12 }
 0x4fe   :  { %v574_v61 = vsel %vm21_vm1, %v570_v13, 0.0 }
 0x4ff   :  { %575 = vadd.xlane.f32.xlu1 %v574_v61  ;;  %v3551_v61 = vld [vmem:[%s4937_s2 + $0xa0] sm:$0xff] }
 0x501   :  { %v563_v17 = vpop.f32.mrf.mxu1 }
 0x502   :  { %v567_v18 = vadd.f32 %v563_v17, %v3892_v9  ;;  %v3651_v17 = vld [vmem:[%s4938_s3 + $0xa] ss:$0 sm:$0xff] }
 0x504   :  { %v571_v3 = vadd.f32 %v3647_v10, %v567_v18  ;;  %v3552_v10 = vld [vmem:[%s4937_s2 + $0xa8] sm:$0xff]  ;;  %v692_v18 = vpack.c.bf16 %v3651_v17, %v3651_v17  ;;  %v3559_v17 = vld [vmem:[%s4937_s2 + $0xd0] sm:$0xff] }
 0x505   :  { %751 = vmatpush.bf16.msra.mxu1 %v3552_v10  ;;  %v3557_v10 = vld [vmem:[%s4937_s2 + $0xc0] sm:$0xff] }
 0x506   :  { %v577_v19 = vsel %vm21_vm1, %v571_v3, 0.0 }
 0x507   :  { %578 = vadd.xlane.f32.xlu2 %v577_v19 }
 0x509   :  { %752 = vmatpush.bf16.msra.mxu1 %v3551_v61 }
 0x50c   :  { %3261 = vmatmul.msk.bf16.vlgmr.msra.gmra.mxu1 %vm21_vm1, %v692_v18 }
 0x572   :  { %v576_v8 = vpop.xlane.xlu1 %575 }
 0x573   :  { %v580_v9 = vmul.f32 %v576_v8, %v3851_v47 }
 0x575   :  { %v582_v21 = vsub.f32 %v570_v13, %v580_v9 }
 0x577   :  { %v584_v22 = vmul.f32 %v582_v21, %v582_v21 }
 0x579   :  { %v586_v23 = vsel %vm21_vm1, %v584_v22, 0.0 }
 0x57a   :  { %587 = vadd.xlane.f32.xlu0 %v586_v23  ;;  %v579_v24 = vpop.xlane.xlu2 %578  ;;  %v4121_v23 = vsel %vm21_vm1, %v3933_v1, 0 }
 0x57b   :  { %v581_v25 = vmul.f32 %v579_v24, %v3851_v47 }
 0x57d   :  { %v583_v26 = vsub.f32 %v571_v3, %v581_v25  ;;  %v3650_v3 = vld [vmem:[%s4938_s3 + $0xb] ss:$0 sm:$0xff] }
 0x57f   :  { %v585_v27 = vmul.f32 %v583_v26, %v583_v26 }
 0x581   :  { %v589_v28 = vsel %vm21_vm1, %v585_v27, 0.0  ;;  %v3652_v27 = vld [vmem:[%s4938_s3 + $0xe] ss:$0 sm:$0xff] }
 0x582   :  { %590 = vadd.xlane.f32.xlu1 %v589_v28 }
 0x589   :  { %v754_v24 = vpop.f32.mrf.mxu1 }
 0x591   :  { %v756_v25 = vpop.f32.mrf.mxu1 }
 0x5ed   :  { %v588_v29 = vpop.xlane.xlu0 %587 }
 0x5ee   :  { %v592_v30 = vmul.f32 %v588_v29, %v3851_v47 }
 0x5f0   :  { %v594_v34 = vadd.f32 1e-12, %v592_v30  ;;  %v3653_v30 = vld [vmem:[%s4938_s3 + $0x10] ss:$0 sm:$0xff] }
 0x5f2   :  { %3693 = vrsqrt.f32 %v594_v34  ;;  %vm602_vm6 = vweird.f32 %v594_v34 }
 0x5f5   :  { %v591_v37 = vpop.xlane.xlu1 %590 }
 0x5f6   :  { %v593_v38 = vmul.f32 %v591_v37, %v3851_v47  ;;  %v3649_v47 = vld [vmem:[%s4938_s3 + $0x9] ss:$0 sm:$0xff]  ;;  %v4138_v37 = vld [vmem:[%s4940_s1 + $0x10] sm:$0x3] }
 0x5f7   :  { %vm849_vm12 = vcmp.gt.f32.partialorder %v4138_v37, 0.0  ;;  %v2622_v37 = vld [vmem:[%s4938_s3 + $0x20] sm:$0xff] }
 0x5f8   :  { %v3694_v39 = vpop.eup %3693  ;;  %v595_v40 = vadd.f32 1e-12, %v593_v38 }
 0x5f9   :  { %v597_v41 = vmul.f32 %v3694_v39, %v594_v34  ;;  %vm603_vm5 = vweird.f32 %v3694_v39 }
 0x5fa   :  { %3695 = vrsqrt.f32 %v595_v40  ;;  %vm604_vm7 = vmor %vm602_vm6, %vm603_vm5  ;;  %vm612_vm9 = vweird.f32 %v595_v40  ;;  %vm1060_vm5 = vcmask 15360  }
 0x5fb   :  { %v598_v42 = vmul.f32 %v3694_v39, %v597_v41 }
 0x5fd   :  { %v599_v43 = vmul.f32 0.5, %v598_v42 }
 0x5ff   :  { %v600_v44 = vsub.f32 1.5, %v599_v43 }
 0x600   :  { %v3696_v45 = vpop.eup %3695 }
 0x601   :  { %v601_v46 = vmul.f32 %v3694_v39, %v600_v44  ;;  %v607_v48 = vmul.f32 %v3696_v45, %v595_v40  ;;  %vm613_vm8 = vweird.f32 %v3696_v45 }
 0x602   :  { %vm614_vm10 = vmor %vm612_vm9, %vm613_vm8 }
 0x603   :  { %v605_v51 = vsel %vm604_vm7, %v3694_v39, %v601_v46  ;;  %v608_v52 = vmul.f32 %v3696_v45, %v607_v48  ;;  %v649_v46 = vlaneseq }
 0x604   :  { %v616_v31 = vmul.f32 %v605_v51, %v582_v21  ;;  %v4116_v21 = vsel %vm21_vm1, %v3947_v16, 0 }
 0x605   :  { %v609_v53 = vmul.f32 0.5, %v608_v52  ;;  %v652_v48 = vshrl.u32 %v649_v46, 7  ;;  %v4149_v52 = vld [vmem:[%s4938_s3 + $0x18] sm:$0xff] }
 0x606   :  { %v619_v54 = vmul.f32 %v3648_v49, %v616_v31  ;;  %900 = vmatpush.msrb.mxu1 %v4149_v52 }
 0x607   :  { %v610_v56 = vsub.f32 1.5, %v609_v53  ;;  %v653_v51 = vmul.u32 4, %v652_v48  ;;  %v3654_v48 = vld [vmem:[%s4938_s3 + $0xf] ss:$0 sm:$0xff] }
 0x608   :  { %v622_v57 = vadd.f32 %v3649_v47, %v619_v54  ;;  %941 = vmatpush.msra.mxu1 %v3762_v20 }
 0x609   :  { %v611_v58 = vmul.f32 %v3696_v45, %v610_v56 }
 0x60a   :  { %3131 = vst.msk [vmem:[%s4941_s4] sm:$0xff] %vm21_vm1, %v622_v57 }
 0x60b   :  { %v615_v59 = vsel %vm614_vm10, %v3696_v45, %v611_v58 }
 0x60c   :  { %v617_v60 = vmul.f32 %v615_v59, %v583_v26  ;;  %v825_v26 = vld [vmem:[%s4938_s3 + $0x11] sm:$0x1] }
 0x60d   :  { %3603 = vpush %v825_v26  ;;  %v3565_v26 = vld [vmem:[%s4937_s2 + $0x100] sm:$0xff] }
 0x60e   :  { %v620_v63 = vmul.f32 %v3648_v49, %v617_v60  ;;  %v650_v49 = vand.u32 127, %v649_v46 }
 0x610   :  { %v623_v0 = vadd.f32 %v3649_v47, %v620_v63  ;;  %vm654_vm14 = vcmp.eq.s32.totalorder %v650_v49, %v653_v51  ;;  %v3558_v63 = vld [vmem:[%s4937_s2 + $0xc8] sm:$0xff] }
 0x611   :  { %v4153_v47 = vsel %vm654_vm14, 1.0, %v3762_v20 }
 0x612   :  { %3136 = vst.msk [vmem:[%s4941_s4 + $0x20] sm:$0xff] %vm21_vm1, %v623_v0  ;;  %v4081_v4 = vpack.c.bf16 %v623_v0, %v622_v57  ;;  %3273 = vmatmul.msk.f32.vlgmr.msrb.gmra.mxu1 %vm881_vm15, %v4153_v47  ;;  %v3562_v0 = vld [vmem:[%s4937_s2 + $0xe8] sm:$0xff] }
 0x614   :  { %638 = vmatpush.bf16.msra.mxu2 %v4081_v4  ;;  %874 = vmatpush.bf16.msrb.mxu0 %v4081_v4  ;;  %v4087_v6 = vsel %vm21_vm1, %v4081_v4, 0 }
 0x615   :  { %843 = vmatpush.bf16.xpose.msrb.mxu3 %v4087_v6 }
 0x617   :  { %3233 = vmatmul.msk.bf16.vlgmr.msra.gmra.mxu2 %vm627_vm11, %v625_v5 }
 0x618   :  { %789 = vmatpush.bf16.msrb.mxu2 %v3556_v55 }
 0x61a   :  { %3274 = vmatmul.msk.f32.vlgmr.msra.gmra.mxu1 %vm881_vm15, %v4153_v47 }
 0x61c   :  { %790 = vmatpush.bf16.msrb.mxu2 %v3555_v7 }
 0x620   :  { %956 = vmatpush.bf16.msra.mxu2 %v3947_v16 }
 0x624   :  { %957 = vmatpush.bf16.msra.mxu2 %v3933_v1 }
 0x63e   :  { %s3604_s7 = spop %3603 }
 0x63f   :  { %v828_v38 = vstv %s3604_s7  ;;  %s3763_s7 = smov 124  }
 0x68f   :  { %v4165_v58 = vpop.f32.mrf.mxu1 }
 0x697   :  { %v4167_v59 = vpop.f32.mrf.mxu1 }
 0x698   :  { %v946_v60 = vpack.c.bf16 %v4167_v59, %v4167_v59 }
 0x69a   :  { %v640_v11 = vpop.f32.mrf.mxu2 }
 0x69b   :  { %v4099_v12 = vpack.c.bf16 %v640_v11, %v640_v11  ;;  %v3561_v11 = vld [vmem:[%s4937_s2 + $0xe0] sm:$0xff] }
 0x69d   :  { %3243 = vmatmul.msk.bf16.vlgmr.msra.gmra.mxu3 %vm21_vm1, %v4099_v12 }
 0x69e   :  { %989 = vmatpush.bf16.msra.mxu3 %v3558_v63 }
 0x6a2   :  { %v642_v13 = vpop.f32.mrf.mxu2  ;;  %990 = vmatpush.bf16.msra.mxu3 %v3557_v10 }
 0x6a3   :  { %v3560_v13 = vld [vmem:[%s4937_s2 + $0xd8] sm:$0xff] }
 0x720   :  { %v688_v19 = vpop.f32.mrf.mxu3 }
 0x721   :  { %v689_v8 = vadd.f32 %v3650_v3, %v688_v19 }
 0x723   :  { %v697_v9 = vpack.c.bf16 %v689_v8, %v689_v8 }
 0x725   :  { %3252 = vmatmul.msk.bf16.vlgmr.msra.gmra.mxu0 %vm21_vm1, %v697_v9 }
 0x726   :  { %1007 = vmatpush.bf16.xpose.msra.mxu0 %v4116_v21 }
 0x728   :  { %v690_v22 = vpop.f32.mrf.mxu3 }
 0x72e   :  { %1008 = vmatpush.bf16.xpose.msra.mxu0 %v4121_v23 }
 0x7a2   :  { %v726_v28 = vpop.f32.mrf.mxu0 }
 0x7a3   :  { %v755_v29 = vadd.f32 %v754_v24, %v726_v28  ;;  %v3566_v24 = vld [vmem:[%s4937_s2 + $0x108] sm:$0xff] }
 0x7a5   :  { %v760_v32 = vadd.f32 %v3652_v27, %v755_v29  ;;  %v3655_v29 = vld [vmem:[%s4938_s3 + $0x12] ss:$0 sm:$0xff] }
 0x7a7   :  { %v761_v33 = vpack.c.bf16 %v760_v32, %v760_v32  ;;  %v823_v34 = vmul.f32 %v3653_v30, %v760_v32 }
 0x7a9   :  { %v824_v35 = vpack.c.bf16 %v823_v34, %v823_v34  ;;  %3270 = vmatmul.msk.bf16.vlgmr.msrb.gmra.mxu2 %vm21_vm1, %v761_v33  ;;  %v3570_v34 = vld [vmem:[%s4937_s2 + $0xa8] sm:$0xff] }
 0x7aa   :  { %v728_v36 = vpop.f32.mrf.mxu0  ;;  %1117 = vmatpush.bf16.msrb.mxu2 %v3562_v0 }
 0x7ab   :  { %3271 = vmatmul.msk.bf16.vlgmr.msrb.gmra.mxu3 %vm21_vm1, %v824_v35  ;;  %v3569_v36 = vld [vmem:[%s4937_s2 + $0xa0] sm:$0xff] }
 0x7ac   :  { %1145 = vmatpush.bf16.msrb.mxu3 %v3560_v13 }
 0x7ae   :  { %1118 = vmatpush.bf16.msrb.mxu2 %v3561_v11 }
 0x7b0   :  { %1146 = vmatpush.bf16.msrb.mxu3 %v3559_v17 }
 0x7b9   :  { %3275 = vmatmul.msk.bf16.vlgmr.msra.gmra.mxu2 %vm21_vm1, %v946_v60 }
 0x7ba   :  { %1259 = vmatpush.msra.mxu2 %v3762_v20 }
 0x82c   :  { %v4140_v39 = vpop.f32.mrf.mxu2 }
 0x82d   :  { %v4242_v51 = vadd.f32 %v3654_v48, %v4140_v39 }
 0x82e   :  { %v845_v40 = vpop.f32.mrf.mxu3 }
 0x82f   :  { %v846_v41 = vadd.f32 %v845_v40, %v828_v38  ;;  %v4229_v40 = vld [vmem:[%s4940_s1 + $0x28] sm:$0x3] }
 0x830   :  { %vm996_vm0 = vcmp.gt.f32.partialorder %v4229_v40, 0.0 }
 0x831   :  { %v850_v42 = vsel %vm849_vm12, %v846_v41, -1e+30 }
 0x832   :  { %v852_v43 = vsel %vm851_vm13, %v850_v42, -inf }
 0x833   :  { %853 = vmax.xlane.f32.xlu2 %v852_v43 }
 0x834   :  { %v794_v44 = vpop.f32.mrf.mxu2 }
 0x836   :  { %v847_v45 = vpop.f32.mrf.mxu3 }
 0x83c   :  { %v959_v61 = vpop.f32.mrf.mxu2 }
 0x83d   :  { %v1090_v8 = vpack.c.bf16 %v959_v61, %v959_v61 }
 0x844   :  { %v961_v18 = vpop.f32.mrf.mxu2 }
 0x8a6   :  { %v854_v31 = vpop.xlane.xlu2 %853 }
 0x8a7   :  { %v855_v53 = vsub.f32 %v850_v42, %v854_v31  ;;  %v797_v31 = vsel %vm796_vm3, %v4242_v51, -inf }
 0x8a9   :  { %v856_v54 = vmul.f32 1.442695, %v855_v53 }
 0x8ab   :  { %3697 = vpow2.f32 %v856_v54 }
 0x8b1   :  { %v3698_v56 = vpop.eup %3697 }
 0x8b2   :  { %v858_v57 = vsel %vm851_vm13, %v3698_v56, 0.0 }
 0x8b3   :  { %859 = vadd.xlane.f32.xlu0 %v858_v57 }
 0x926   :  { %v860_v2 = vpop.xlane.xlu0 %859 }
 0x927   :  { %3699 = vrcp.f32 %v860_v2 }
 0x92d   :  { %v3700_v55 = vpop.eup %3699 }
 0x92e   :  { %v862_v5 = vmul.f32 %v3700_v55, %v3698_v56 }
 0x930   :  { %v863_v7 = vpack.c.bf16 %v862_v5, %v862_v5  ;;  %1477 = vst.msk [vmem:[%s4942_s5] sm:$0x3] %vm851_vm13, %v862_v5 }
 0x932   :  { %3272 = vmatmul.msk.bf16.vlgmr.msrb.gmra.mxu0 %vm627_vm11, %v863_v7 }
 0x933   :  { %1165 = vmatpush.bf16.xpose.msrb.mxu0 %v4116_v21 }
 0x93b   :  { %1166 = vmatpush.bf16.xpose.msrb.mxu0 %v4121_v23 }
 0x9af   :  { %v876_v3 = vpop.f32.mrf.mxu0 }
 0x9b0   :  { %v4198_v19 = vpack.c.bf16 %v876_v3, %v876_v3 }
 0x9b2   :  { %3284 = vmatmul.msk.bf16.vlgmr.msra.gmra.mxu3 %vm21_vm1, %v4198_v19  ;;  %3297 = vmatmul.msk.bf16.vlgmr.msrb.gmra.mxu2 %vm21_vm1, %v4198_v19 }
 0x9b7   :  { %v878_v20 = vpop.f32.mrf.mxu0 }
 0x9b8   :  { %v4257_v20 = vld [vmem:[%s4938_s3 + $0x20] sm:$0xff] }
 0x9b9   :  { %1043 = vmatpush.msrb.mxu1 %v4257_v20 }
 0x9ba   :  { %3286 = vmatmul.msk.f32.vlgmr.msrb.gmra.mxu1 %vm881_vm15, %v4153_v47 }
 0x9c2   :  { %3306 = vmatmul.msk.bf16.vlgmr.msrb.gmra.mxu3 %vm21_vm1, %v1090_v8 }
 0xa35   :  { %v992_v9 = vpop.f32.mrf.mxu3  ;;  %v1120_v22 = vpop.f32.mrf.mxu2 }
 0xa36   :  { %v997_v25 = vpack.c.bf16 %v992_v9, %v992_v9 }
 0xa38   :  { %3285 = vmatmul.msk.bf16.vlgmr.msra.gmra.mxu0 %vm21_vm1, %v997_v25 }
 0xa39   :  { %1327 = vmatpush.bf16.msra.mxu0 %v3566_v24  ;;  %v4265_v24 = vld [vmem:[%s4938_s3 + $0x30] sm:$0xff] }
 0xa3d   :  { %v994_v27 = vpop.f32.mrf.mxu3  ;;  %v1122_v28 = vpop.f32.mrf.mxu2  ;;  %1328 = vmatpush.bf16.msra.mxu0 %v3565_v26 }
 0xa45   :  { %v1148_v30 = vpop.f32.mrf.mxu3 }
 0xa46   :  { %v1149_v32 = vadd.f32 %v1148_v30, %v1120_v22  ;;  %v3564_v30 = vld [vmem:[%s4937_s2 + $0xf8] sm:$0xff] }
 0xa48   :  { %v1154_v33 = vadd.f32 %v3655_v29, %v1149_v32  ;;  %v4273_v29 = vld [vmem:[%s4938_s3 + $0x28] sm:$0xff]  ;;  %v3563_v32 = vld [vmem:[%s4937_s2 + $0xf0] sm:$0xff] }
 0xa4a   :  { %v1155_v35 = vpack.c.bf16 %v1154_v33, %v1154_v33 }
 0xa4c   :  { %3307 = vmatmul.msk.bf16.vlgmr.msrb.gmra.mxu0 %vm21_vm1, %v1155_v35  ;;  %v3574_v35 = vld [vmem:[%s4937_s2 + $0x118] sm:$0xff] }
 0xa4d   :  { %1582 = vmatpush.bf16.msrb.mxu0 %v3570_v34  ;;  %v1150_v38 = vpop.f32.mrf.mxu3 }
 0xa51   :  { %1583 = vmatpush.bf16.msrb.mxu0 %v3569_v36 }
 0xa5c   :  { %3322 = vmatmul.msk.bf16.vlgmr.msra.gmra.mxu0 %vm21_vm1, %v1090_v8 }
 0xa5d   :  { %1721 = vmatpush.msra.mxu0 %v4149_v52 }
 0xa6c   :  { %3361 = vmatmul.msk.bf16.vlgmr.msrb.gmra.mxu0 %vm21_vm1, %v4198_v19 }
 0xab5   :  { %v1010_v41 = vpop.f32.mrf.mxu0 }
 0xab6   :  { %v1014_v42 = vsel %vm996_vm0, %v1010_v41, -1e+30 }
 0xab7   :  { %v1016_v43 = vsel %vm1015_vm2, %v1014_v42, -inf }
 0xab8   :  { %1017 = vmax.xlane.f32.xlu1 %v1016_v43 }
 0xabd   :  { %v1012_v44 = vpop.f32.mrf.mxu0 }
 0xac9   :  { %v1168_v45 = vpop.f32.mrf.mxu0 }
 0xaca   :  { %v1172_v46 = vsel %vm996_vm0, %v1168_v45, -1e+30 }
 0xacb   :  { %v1173_v49 = vsel %vm1015_vm2, %v1172_v46, -inf }
 0xacc   :  { %1174 = vmax.xlane.f32.xlu2 %v1173_v49 }
 0xad1   :  { %v1170_v52 = vpop.f32.mrf.mxu0 }
 0xad4   :  { %798 = vmax.xlane.f32.xlu2 %v797_v31 }
 0xad9   :  { %v4246_v53 = vpop.f32.mrf.mxu0 }
 0xae1   :  { %v1332_v54 = vpop.f32.mrf.mxu0 }
 0xae2   :  { %v4299_v54 = vpop.f32.mrf.mxu1 }
 0xae9   :  { %v4248_v56 = vpop.f32.mrf.mxu0 }
 0xaf1   :  { %v1587_v57 = vpop.f32.mrf.mxu0 }
 0xb2b   :  { %v1018_v60 = vpop.xlane.xlu1 %1017 }
 0xb2c   :  { %v1019_v63 = vsub.f32 %v1014_v42, %v1018_v60  ;;  %v3573_v42 = vld [vmem:[%s4937_s2 + $0x110] sm:$0xff] }
 0xb2e   :  { %v1020_v0 = vmul.f32 1.442695, %v1019_v63 }
 0xb30   :  { %3701 = vpow2.f32 %v1020_v0 }
 0xb36   :  { %v3702_v2 = vpop.eup %3701 }
 0xb37   :  { %v1022_v39 = vsel %vm1015_vm2, %v3702_v2, 0.0 }
 0xb38   :  { %1023 = vadd.xlane.f32.xlu0 %v1022_v39 }
 0xb3f   :  { %v1175_v55 = vpop.xlane.xlu2 %1174 }
 0xb40   :  { %v1176_v5 = vsub.f32 %v1172_v46, %v1175_v55 }
 0xb42   :  { %v1177_v7 = vmul.f32 1.442695, %v1176_v5 }
 0xb44   :  { %3703 = vpow2.f32 %v1177_v7 }
 0xb47   :  { %v799_v10 = vpop.xlane.xlu2 %798 }
 0xb48   :  { %v800_v11 = vsub.f32 %v4242_v51, %v799_v10 }
 0xb4a   :  { %v3704_v13 = vpop.eup %3703  ;;  %v801_v61 = vmul.f32 1.442695, %v800_v11 }
 0xb4b   :  { %v1179_v17 = vsel %vm1015_vm2, %v3704_v13, 0.0 }
 0xb4c   :  { %3705 = vpow2.f32 %v801_v61  ;;  %1180 = vadd.xlane.f32.xlu1 %v1179_v17 }
 0xb52   :  { %v3706_v18 = vpop.eup %3705 }
 0xb53   :  { %v803_v3 = vsel %vm796_vm3, %v3706_v18, 0.0 }
 0xb54   :  { %804 = vadd.xlane.f32.xlu0 %v803_v3  ;;  %v3568_v3 = vld [vmem:[%s4937_s2 + $0x88] sm:$0xff] }
 0xbab   :  { %v1024_v8 = vpop.xlane.xlu0 %1023 }
 0xbac   :  { %3707 = vrcp.f32 %v1024_v8  ;;  %v3567_v8 = vld [vmem:[%s4937_s2 + $0x80] sm:$0xff] }
 0xbb2   :  { %v3708_v9 = vpop.eup %3707 }
 0xbb3   :  { %v1026_v22 = vmul.f32 %v3708_v9, %v3702_v2 }
 0xbb5   :  { %3287 = vmatpush.msk.msra.mxu1 %vm1064_vm4, %v1026_v22 }
 0xbb6   :  { %3288 = vmatmul.msk.f32.vlgmr.msra.gmra.mxu1 %vm1060_vm5, %v4265_v24 }
 0xbbf   :  { %v1181_v25 = vpop.xlane.xlu1 %1180 }
 0xbc0   :  { %3709 = vrcp.f32 %v1181_v25 }
 0xbc6   :  { %v3710_v26 = vpop.eup %3709 }
 0xbc7   :  { %v1183_v27 = vmul.f32 %v3710_v26, %v3704_v13  ;;  %v805_v28 = vpop.xlane.xlu0 %804 }
 0xbc8   :  { %3711 = vrcp.f32 %v805_v28  ;;  %v817_v38 = vand.u32 2147483648, %v805_v28  ;;  %v815_v43 = vand.u32 2147483647, %v805_v28  ;;  %vm811_vm7 = vweird.f32 %v805_v28 }
 0xbc9   :  { %3308 = vmatpush.msk.msrb.mxu1 %vm1064_vm4, %v1183_v27 }
 0xbca   :  { %3309 = vmatmul.msk.f32.vlgmr.msrb.gmra.mxu1 %vm1060_vm5, %v4265_v24  ;;  %v818_v45 = vor.u32 1.1754944e-38, %v817_v38  ;;  %vm816_vm9 = vcmp.eq.f32.partialorder %v815_v43, 8.507059e+37 }
 0xbcb   :  { %1236 = vmatpush.msra.mxu1 %v4273_v29 }
 0xbcd   :  { %1352 = vmatpush.bf16.msrb.mxu1 %v3564_v30 }
 0xbce   :  { %v3712_v33 = vpop.eup %3711 }
 0xbcf   :  { %v807_v34 = vmul.f32 %v3712_v33, %v805_v28  ;;  %vm812_vm6 = vweird.f32 %v3712_v33 }
 0xbd0   :  { %vm813_vm8 = vmor %vm811_vm7, %vm812_vm6 }
 0xbd1   :  { %1353 = vmatpush.bf16.msrb.mxu1 %v3563_v32  ;;  %v808_v36 = vsub.f32 1.0, %v807_v34 }
 0xbd2   :  { %3310 = vmatmul.msk.f32.vlgmr.msra.gmra.mxu1 %vm881_vm15, %v4153_v47 }
 0xbd3   :  { %v809_v41 = vmul.f32 %v3712_v33, %v808_v36 }
 0xbd5   :  { %1620 = vmatpush.bf16.msra.mxu1 %v3574_v35  ;;  %v810_v44 = vadd.f32 %v3712_v33, %v809_v41 }
 0xbd7   :  { %v814_v46 = vsel %vm813_vm8, %v3712_v33, %v810_v44  ;;  %vm1048_vm8 = vcmask 58368  }
 0xbd8   :  { %v819_v48 = vsel %vm816_vm9, %v818_v45, %v814_v46  ;;  %v1184_v9 = vsel %vm1048_vm8, %v4153_v47, 0.0 }
 0xbd9   :  { %1621 = vmatpush.bf16.msra.mxu1 %v3573_v42  ;;  %v820_v49 = vmul.f32 %v3706_v18, %v819_v48  ;;  %v1185_v25 = vrot.slane %v1184_v9, 4  ;;  %v4339_v42 = vld [vmem:[%s4938_s3 + $0x40] sm:$0xff]  ;;  %v3765_v48 = vmov 0  }
 0xbda   :  { %3331 = vmatmul.msk.bf16.vlgmr.msrb.gmra.mxu1 %vm21_vm1, %v4198_v19  ;;  %3621 = vset.pattern.permute.xlu0 %v3765_v48 }
 0xbdb   :  { %v905_v52 = vmul.f32 %v4165_v58, %v820_v49  ;;  %v1186_v27 = vadd.f32 %v1185_v25, %v1184_v9  ;;  %v3766_v49 = vmov 1   ;;  %v3768_v25 = vmov 3  }
 0xbdc   :  { %3623 = vset.pattern.permute.xlu1 %v3766_v49  ;;  %3622 = vset.pattern.permute.xlu2 %v3766_v49 }
 0xbdd   :  { %1757 = vmatpush.bf16.msrb.mxu1 %v3947_v16  ;;  %v906_v31 = vsel %vm796_vm3, %v905_v52, 0.0  ;;  %v1187_v30 = vrot.slane %v1186_v27, 2 }
 0xbde   :  { %907 = vadd.xlane.f32.xlu1 %v906_v31 }
 0xbdf   :  { %v1188_v33 = vadd.f32 %v1187_v30, %v1186_v27 }
 0xbe1   :  { %1758 = vmatpush.bf16.msrb.mxu1 %v3933_v1  ;;  %v1189_v35 = vrot.slane %v1188_v33, 1 }
 0xbe3   :  { %v1190_v38 = vadd.f32 %v1189_v35, %v1188_v33 }
 0xbe5   :  { %v1191_v43 = vmul.f32 %v1190_v38, %v4339_v42 }
 0xbe7   :  { %v1192_v45 = vsel %vm881_vm15, %v1191_v43, 0.0 }
 0xc33   :  { %v4301_v57 = vpop.f32.mrf.mxu1 }
 0xc47   :  { %v4303_v60 = vpop.f32.mrf.mxu1 }
 0xc4f   :  { %v4305_v63 = vpop.f32.mrf.mxu1 }
 0xc50   :  { %3311 = vmatmul.msk.f32.vlgmr.msra.gmra.mxu2 %vm881_vm15, %v4305_v63  ;;  %v1264_v22 = vsel %vm1048_vm8, %v4305_v63, 0.0 }
 0xc51   :  { %v908_v19 = vpop.xlane.xlu1 %907  ;;  %v1265_v26 = vrot.slane %v1264_v22, 4 }
 0xc52   :  { %3713 = vrcp.f32 %v908_v19  ;;  %v920_v55 = vand.u32 2147483648, %v908_v19  ;;  %v918_v7 = vand.u32 2147483647, %v908_v19  ;;  %vm914_vm14 = vweird.f32 %v908_v19 }
 0xc53   :  { %v1266_v28 = vadd.f32 %v1265_v26, %v1264_v22  ;;  %v3767_v22 = vmov 2  }
 0xc54   :  { %v921_v13 = vor.u32 1.1754944e-38, %v920_v55  ;;  %vm919_vm7 = vcmp.eq.f32.partialorder %v918_v7, 8.507059e+37 }
 0xc55   :  { %v1267_v32 = vrot.slane %v1266_v28, 2 }
 0xc57   :  { %v4309_v0 = vpop.f32.mrf.mxu1  ;;  %v1268_v34 = vadd.f32 %v1267_v32, %v1266_v28 }
 0xc58   :  { %v3714_v58 = vpop.eup %3713 }
 0xc59   :  { %v910_v2 = vmul.f32 %v3714_v58, %v908_v19  ;;  %vm915_vm10 = vweird.f32 %v3714_v58  ;;  %v1269_v36 = vrot.slane %v1268_v34, 1 }
 0xc5a   :  { %vm916_vm6 = vmor %vm914_vm14, %vm915_vm10 }
 0xc5b   :  { %v911_v39 = vsub.f32 1.0, %v910_v2  ;;  %v1270_v41 = vadd.f32 %v1269_v36, %v1268_v34 }
 0xc5d   :  { %v912_v5 = vmul.f32 %v3714_v58, %v911_v39  ;;  %v1271_v44 = vmul.f32 %v1270_v41, %v4339_v42 }
 0xc5f   :  { %v913_v10 = vadd.f32 %v3714_v58, %v912_v5  ;;  %v1357_v11 = vpop.f32.mrf.mxu1  ;;  %v1272_v46 = vsel %vm881_vm15, %v1271_v44, 0.0 }
 0xc61   :  { %v917_v61 = vsel %vm916_vm6, %v3714_v58, %v913_v10 }
 0xc62   :  { %v922_v17 = vsel %vm919_vm7, %v921_v13, %v917_v61 }
 0xc63   :  { %v4311_v18 = vmul.f32 %v922_v17, %v905_v52 }
 0xc65   :  { %1419 = vrot.lane.b32.xlu1 %v4311_v18, %s3763_s7  ;;  %1415 = vrot.lane.b32.xlu0 %v4311_v18, %s3764_s8 }
 0xc66   :  { %3332 = vmatpush.msk.msrb.mxu2 %vm1064_vm4, %v4311_v18 }
 0xc67   :  { %3333 = vmatmul.msk.f32.vlgmr.msrb.gmra.mxu2 %vm1060_vm5, %v4265_v24 }
 0xc68   :  { %1520 = vmatpush.bf16.msra.mxu2 %v3568_v3 }
 0xc6c   :  { %1521 = vmatpush.bf16.msra.mxu2 %v3567_v8 }
 0xc6f   :  { %3343 = vmatmul.msk.bf16.vlgmr.msra.gmra.mxu2 %vm21_vm1, %v4099_v12 }
 0xc70   :  { %1670 = vmatpush.bf16.xpose.msrb.mxu2 %v4087_v6 }
 0xc78   :  { %1807 = vmatpush.bf16.xpose.msra.mxu2 %v4116_v21 }
 0xc80   :  { %1808 = vmatpush.bf16.xpose.msra.mxu2 %v4121_v23 }
 0xc8f   :  { %1273 = vadd.xlane.f32.xlu1 %v1272_v46  ;;  %1193 = vadd.xlane.f32.xlu0 %v1192_v45 }
 0xcd3   :  { %v1261_v52 = vpop.f32.mrf.mxu2 }
 0xcd4   :  { %v1275_v31 = vmin.f32 %v4167_v59, %v1261_v52  ;;  %v1049_v59 = vsel %vm1048_vm8, %v4299_v54, 0.0 }
 0xcd5   :  { %v1050_v7 = vrot.slane %v1049_v59, 4 }
 0xcd6   :  { %3312 = vmatpush.msk.msra.mxu3 %vm1064_vm4, %v1275_v31 }
 0xcd7   :  { %3313 = vmatmul.msk.f32.vlgmr.msra.gmra.mxu3 %vm1060_vm5, %v4265_v24  ;;  %v1416_v19 = vpop.permute.xlu0 %1415  ;;  %v1420_v2 = vpop.permute.xlu1 %1419  ;;  %v1051_v11 = vadd.f32 %v1050_v7, %v1049_v59 }
 0xcd8   :  { %v1418_v58 = vadd.f32 %v1416_v19, %v4311_v18 }
 0xcd9   :  { %v1052_v13 = vrot.slane %v1051_v11, 2 }
 0xcda   :  { %v1422_v39 = vadd.f32 %v1420_v2, %v1418_v58 }
 0xcdb   :  { %v1053_v61 = vadd.f32 %v1052_v13, %v1051_v11  ;;  %v3572_v11 = vld [vmem:[%s4937_s2 + $0xb8] sm:$0xff] }
 0xcdc   :  { %1425 = vperm.xlu0 %3621, %v1422_v39  }
 0xcdd   :  { %v1054_v17 = vrot.slane %v1053_v61, 1 }
 0xcdf   :  { %v1055_v3 = vadd.f32 %v1054_v17, %v1053_v61  ;;  %v1655_v17 = vld [vmem:[%s4938_s3 + $0x11] sm:$0x1] }
 0xce0   :  { %3605 = vpush %v1655_v17 }
 0xce1   :  { %v1056_v8 = vmul.f32 %v1055_v3, %v4339_v42 }
 0xce3   :  { %v1057_v9 = vsel %vm881_vm15, %v1056_v8, 0.0  ;;  %v3658_v8 = vld [vmem:[%s4938_s3 + $0xe] ss:$0 sm:$0xff] }
 0xcea   :  { %v1383_v55 = vpop.f32.mrf.mxu2 }
 0xceb   :  { %1387 = vrot.lane.b32.xlu2 %v1383_v55, %s3763_s7  ;;  %1398 = vperm.xlu1 %3623, %v1383_v55  }
 0xcf2   :  { %v1523_v5 = vpop.f32.mrf.mxu2 }
 0xcf3   :  { %3625 = vset.pattern.permute.xlu1 %v3765_v48 }
 0xcfa   :  { %v1525_v10 = vpop.f32.mrf.mxu2 }
 0xd02   :  { %v1194_v32 = vpop.xlane.xlu0 %1193  ;;  %v1274_v45 = vpop.xlane.xlu1 %1273 }
 0xd11   :  { %s3606_s25 = spop %3605 }
 0xd14   :  { %1058 = vadd.xlane.f32.xlu2 %v1057_v9 }
 0xd2c   :  { %1430 = vperm.xlu2 %3622, %v4311_v18  }
 0xd34   :  { %3624 = vset.pattern.permute.xlu2 %v3767_v22 }
 0xd35   :  { %1404 = vperm.xlu2 %3624, %v1383_v55  }
 0xd3d   :  { %3627 = vset.pattern.permute.xlu2 %v3768_v25 }
 0xd3e   :  { %1436 = vperm.xlu2 %3627, %v4311_v18  }
 0xd45   :  { %v1388_v26 = vpop.permute.xlu2 %1387 }
 0xd46   :  { %v1390_v27 = vadd.f32 %v1388_v26, %v1383_v55  ;;  %3629 = vset.pattern.permute.xlu2 %v3767_v22  ;;  %v3659_v26 = vld [vmem:[%s4938_s3 + $0x10] ss:$0 sm:$0xff] }
 0xd48   :  { %1393 = vperm.xlu1 %3625, %v1390_v27  }
 0xd4e   :  { %v1426_v34 = vpop.permute.xlu0 %1425 }
 0xd4f   :  { %v1428_v36 = vmul.f32 %v4153_v47, %v1426_v34  ;;  %v1658_v34 = vstv %s3606_s25  ;;  %s3772_s25 = smov 32  }
 0xd50   :  { %3626 = vset.pattern.permute.xlu1 %v3768_v25 }
 0xd51   :  { %1410 = vperm.xlu1 %3626, %v1383_v55  }
 0xd59   :  { %3628 = vset.pattern.permute.xlu1 %v3766_v49 }
 0xd5a   :  { %v1296_v2 = vpop.f32.mrf.mxu3 }
 0xd5b   :  { %v1299_v39 = vmul.f32 %v1296_v2, %v1274_v45 }
 0xd5d   :  { %v1399_v46 = vpop.permute.xlu1 %1398 }
 0xd87   :  { %v1059_v28 = vpop.xlane.xlu2 %1058 }
 0xd88   :  { %v1088_v52 = vmul.f32 %v4301_v57, %v1059_v28  ;;  %v3657_v57 = vld [vmem:[%s4938_s3 + $0xc] ss:$0 sm:$0xff] }
 0xd89   :  { %v1524_v13 = vadd.f32 %v3657_v57, %v1523_v5  ;;  %v3575_v57 = vld [vmem:[%s4937_s2 + $0xc0] sm:$0xff] }
 0xd8a   :  { %v1401_v58 = vmul.f32 %v1399_v46, %v1088_v52 }
 0xd8b   :  { %v1531_v61 = vpack.c.bf16 %v1524_v13, %v1524_v13  ;;  %v3577_v13 = vld [vmem:[%s4937_s2 + $0xd0] sm:$0xff] }
 0xd8f   :  { %v1431_v30 = vpop.permute.xlu2 %1430 }
 0xd90   :  { %v1433_v35 = vmul.f32 %v1431_v30, %v4299_v54  ;;  %v1218_v54 = vmul.f32 %v4303_v60, %v1194_v32  ;;  %v3571_v60 = vld [vmem:[%s4937_s2 + $0xb0] sm:$0xff] }
 0xd92   :  { %v1434_v41 = vadd.f32 %v1433_v35, %v1428_v36 }
 0xd97   :  { %v1405_v33 = vpop.permute.xlu2 %1404 }
 0xd98   :  { %v1407_v55 = vmul.f32 %v1405_v33, %v1218_v54 }
 0xd9f   :  { %v1437_v38 = vpop.permute.xlu2 %1436 }
 0xda0   :  { %v1439_v43 = vmul.f32 %v1437_v38, %v4305_v63 }
 0xda2   :  { %v4369_v44 = vadd.f32 %v1439_v43, %v1434_v41 }
 0xda4   :  { %3373 = vmatmul.msk.f32.vlgmr.msra.gmra.mxu0 %vm881_vm15, %v4369_v44 }
 0xdba   :  { %v1394_v31 = vpop.permute.xlu1 %1393 }
 0xdbb   :  { %v1396_v19 = vmul.f32 0.0, %v1394_v31 }
 0xdbd   :  { %v1402_v47 = vadd.f32 %v1401_v58, %v1396_v19 }
 0xdbf   :  { %v1408_v63 = vadd.f32 %v1407_v55, %v1402_v47  ;;  %v3576_v47 = vld [vmem:[%s4937_s2 + $0xc8] sm:$0xff] }
 0xdc0   :  { %1790 = vmatpush.bf16.msrb.mxu0 %v3576_v47 }
 0xdc3   :  { %v1411_v59 = vpop.permute.xlu1 %1410 }
 0xdc4   :  { %v1413_v7 = vmul.f32 %v1411_v59, %v1299_v39  ;;  %1791 = vmatpush.bf16.msrb.mxu0 %v3575_v57 }
 0xdc6   :  { %v4375_v10 = vadd.f32 %v1413_v7, %v1408_v63  ;;  %v3580_v63 = vld [vmem:[%s4937_s2 + $0xe8] sm:$0xff] }
 0xdc8   :  { %1472 = vmatpush.msrb.mxu3 %v4375_v10  ;;  %1495 = vst.msk [vmem:[%s4943_s6] sm:$0xff] %vm21_vm1, %v4375_v10 }
 0xdc9   :  { %3334 = vmatmul.msk.f32.vlgmr.msrb.gmra.mxu3 %vm881_vm15, %v4369_v44 }
 0xdca   :  { %1557 = vmatpush.bf16.msra.mxu3 %v3572_v11  ;;  %v3579_v11 = vld [vmem:[%s4937_s2 + $0xe0] sm:$0xff] }
 0xdce   :  { %1558 = vmatpush.bf16.msra.mxu3 %v3571_v60  ;;  %v3578_v60 = vld [vmem:[%s4937_s2 + $0xd8] sm:$0xff] }
 0xdcf   :  { %1942 = vmatpush.bf16.msra.mxu0 %v3578_v60 }
 0xdd1   :  { %3352 = vmatmul.msk.bf16.vlgmr.msra.gmra.mxu3 %vm21_vm1, %v1531_v61 }
 0xdd2   :  { %1699 = vmatpush.bf16.msrb.mxu3 %v4081_v4 }
 0xdd3   :  { %1943 = vmatpush.bf16.msra.mxu0 %v3577_v13 }
 0xdd6   :  { %1842 = vmatpush.msra.mxu3 %v4257_v20 }
 0xe4c   :  { %v4400_v3 = vpop.f32.mrf.mxu3 }
 0xe54   :  { %v1560_v5 = vpop.f32.mrf.mxu3 }
 0xe55   :  { %v1586_v9 = vadd.f32 %v4248_v56, %v1560_v5  ;;  %v1747_v56 = vpack.c.bf16 %v4400_v3, %v4400_v3 }
 0xe57   :  { %v1591_v27 = vadd.f32 %v3658_v8, %v1586_v9  ;;  %v4458_v9 = vpop.f32.mrf.mxu0 }
 0xe59   :  { %v1592_v20 = vpack.c.bf16 %v1591_v27, %v1591_v27  ;;  %v1653_v28 = vmul.f32 %v3659_v26, %v1591_v27 }
 0xe5b   :  { %v1654_v30 = vpack.c.bf16 %v1653_v28, %v1653_v28  ;;  %3370 = vmatmul.msk.bf16.vlgmr.msra.gmra.mxu1 %vm21_vm1, %v1592_v20  ;;  %v3582_v20 = vld [vmem:[%s4937_s2 + $0xf8] sm:$0xff] }
 0xe5c   :  { %v1562_v32 = vpop.f32.mrf.mxu3 }
 0xe5d   :  { %3371 = vmatmul.msk.bf16.vlgmr.msrb.gmra.mxu2 %vm21_vm1, %v1654_v30  ;;  %v3581_v30 = vld [vmem:[%s4937_s2 + $0xf0] sm:$0xff] }
 0xe5e   :  { %1962 = vmatpush.bf16.xpose.msrb.mxu2 %v4116_v21 }
 0xe66   :  { %1963 = vmatpush.bf16.xpose.msrb.mxu2 %v4121_v23 }
 0xe6b   :  { %3374 = vmatmul.msk.bf16.vlgmr.msrb.gmra.mxu1 %vm21_vm1, %v1747_v56 }
 0xed8   :  { %v4416_v33 = vpop.f32.mrf.mxu1 }
 0xee0   :  { %v1625_v35 = vpop.f32.mrf.mxu1  ;;  %v1672_v36 = vpop.f32.mrf.mxu2 }
 0xee1   :  { %v1673_v38 = vadd.f32 %v1672_v36, %v1658_v34  ;;  %v3661_v35 = vld [vmem:[%s4938_s3 + $0x12] ss:$0 sm:$0xff] }
 0xee3   :  { %v1676_v41 = vsel %vm849_vm12, %v1673_v38, -1e+30 }
 0xee4   :  { %v1677_v43 = vsel %vm851_vm13, %v1676_v41, -inf }
 0xee5   :  { %1678 = vmax.xlane.f32.xlu2 %v1677_v43  ;;  %v3592_v43 = vld [vmem:[%s4937_s2 + $0x118] sm:$0xff] }
 0xee8   :  { %v1674_v45 = vpop.f32.mrf.mxu2  ;;  %v1760_v46 = vpop.f32.mrf.mxu1 }
 0xee9   :  { %v4454_v5 = vpack.c.bf16 %v1760_v46, %v1760_v46 }
 0xef0   :  { %v1762_v52 = vpop.f32.mrf.mxu1 }
 0xef1   :  { %v3591_v52 = vld [vmem:[%s4937_s2 + $0x110] sm:$0xff] }
 0xf58   :  { %v1679_v31 = vpop.xlane.xlu2 %1678 }
 0xf59   :  { %v1680_v19 = vsub.f32 %v1676_v41, %v1679_v31 }
 0xf5b   :  { %v1681_v58 = vmul.f32 1.442695, %v1680_v19 }
 0xf5d   :  { %3715 = vpow2.f32 %v1681_v58  ;;  %v3660_v58 = vld [vmem:[%s4938_s3 + $0xf] ss:$0 sm:$0xff] }
 0xf63   :  { %v3716_v2 = vpop.eup %3715 }
 0xf64   :  { %v1683_v54 = vsel %vm851_vm13, %v3716_v2, 0.0 }
 0xf65   :  { %1684 = vadd.xlane.f32.xlu0 %v1683_v54  ;;  %v4490_v54 = vadd.f32 %v3660_v58, %v4416_v33 }
 0xfd8   :  { %v1685_v39 = vpop.xlane.xlu0 %1684 }
 0xfd9   :  { %3717 = vrcp.f32 %v1685_v39 }
 0xfdf   :  { %v3718_v55 = vpop.eup %3717 }
 0xfe0   :  { %v1687_v59 = vmul.f32 %v3718_v55, %v3716_v2 }
 0xfe2   :  { %v1688_v7 = vpack.c.bf16 %v1687_v59, %v1687_v59  ;;  %2276 = vst.msk [vmem:[%s4942_s5 + $0x2] sm:$0x3] %vm851_vm13, %v1687_v59 }
 0xfe4   :  { %3372 = vmatmul.msk.bf16.vlgmr.msrb.gmra.mxu3 %vm627_vm11, %v1688_v7 }
 0xfe5   :  { %1914 = vmatpush.bf16.msrb.mxu3 %v3580_v63 }
 0xfe9   :  { %1915 = vmatpush.bf16.msrb.mxu3 %v3579_v11 }
 0xff4   :  { %3385 = vmatmul.msk.f32.vlgmr.msra.gmra.mxu3 %vm881_vm15, %v4369_v44 }
 0xff5   :  { %2057 = vmatpush.msra.mxu3 %v4375_v10 }
0x1067   :  { %v1701_v61 = vpop.f32.mrf.mxu3 }
0x1068   :  { %v4448_v17 = vpack.c.bf16 %v1701_v61, %v1701_v61 }
0x106a   :  { %3383 = vmatmul.msk.bf16.vlgmr.msrb.gmra.mxu0 %vm21_vm1, %v4448_v17  ;;  %3396 = vmatmul.msk.bf16.vlgmr.msrb.gmra.mxu3 %vm21_vm1, %v4448_v17 }
0x106f   :  { %v1703_v8 = vpop.f32.mrf.mxu3 }
0x1077   :  { %v4460_v26 = vpop.f32.mrf.mxu3 }
0x107a   :  { %3405 = vmatmul.msk.bf16.vlgmr.msra.gmra.mxu0 %vm21_vm1, %v4454_v5 }
0x10e7   :  { %v1793_v27 = vpop.f32.mrf.mxu0 }
0x10e8   :  { %v1797_v28 = vpack.c.bf16 %v1793_v27, %v1793_v27 }
0x10ea   :  { %3384 = vmatmul.msk.bf16.vlgmr.msra.gmra.mxu2 %vm21_vm1, %v1797_v28 }
0x10eb   :  { %2151 = vmatpush.bf16.msra.mxu2 %v3582_v20 }
0x10ed   :  { %v1917_v32 = vpop.f32.mrf.mxu3 }
0x10ef   :  { %v1795_v56 = vpop.f32.mrf.mxu0  ;;  %2152 = vmatpush.bf16.msra.mxu2 %v3581_v30 }
0x10f5   :  { %v1919_v34 = vpop.f32.mrf.mxu3 }
0x10f7   :  { %v1945_v36 = vpop.f32.mrf.mxu0 }
0x10f8   :  { %v1946_v38 = vadd.f32 %v1945_v36, %v1917_v32 }
0x10fa   :  { %v1951_v41 = vadd.f32 %v3661_v35, %v1946_v38 }
0x10fc   :  { %v1952_v45 = vpack.c.bf16 %v1951_v41, %v1951_v41 }
0x10fe   :  { %3406 = vmatmul.msk.bf16.vlgmr.msrb.gmra.mxu2 %vm21_vm1, %v1952_v45 }
0x10ff   :  { %v1947_v46 = vpop.f32.mrf.mxu0  ;;  %2416 = vmatpush.bf16.msrb.mxu2 %v3592_v43 }
0x1103   :  { %2417 = vmatpush.bf16.msrb.mxu2 %v3591_v52 }
0x110e   :  { %3430 = vmatmul.msk.bf16.vlgmr.msra.gmra.mxu2 %vm21_vm1, %v4448_v17 }
0x110f   :  { %2553 = vmatpush.bf16.msra.mxu2 %v3947_v16  ;;  %v1627_v16 = vsel %vm796_vm3, %v4490_v54, -inf }
0x1113   :  { %2554 = vmatpush.bf16.msra.mxu2 %v3933_v1 }
0x116d   :  { %v1810_v31 = vpop.f32.mrf.mxu2 }
0x116e   :  { %v1814_v19 = vsel %vm996_vm0, %v1810_v31, -1e+30 }
0x116f   :  { %v1815_v2 = vsel %vm1015_vm2, %v1814_v19, -inf }
0x1170   :  { %1816 = vmax.xlane.f32.xlu1 %v1815_v2 }
0x1175   :  { %v1812_v47 = vpop.f32.mrf.mxu2 }
0x1178   :  { %1628 = vmax.xlane.f32.xlu1 %v1627_v16 }
0x1181   :  { %v1965_v1 = vpop.f32.mrf.mxu2 }
0x1182   :  { %v1969_v39 = vsel %vm996_vm0, %v1965_v1, -1e+30 }
0x1183   :  { %v1970_v55 = vsel %vm1015_vm2, %v1969_v39, -inf }
0x1184   :  { %1971 = vmax.xlane.f32.xlu2 %v1970_v55 }
0x1189   :  { %v1967_v59 = vpop.f32.mrf.mxu2 }
0x1191   :  { %v4497_v63 = vpop.f32.mrf.mxu2 }
0x1199   :  { %v2156_v7 = vpop.f32.mrf.mxu2 }
0x11e3   :  { %v1817_v11 = vpop.xlane.xlu1 %1816 }
0x11e4   :  { %v1818_v57 = vsub.f32 %v1814_v19, %v1817_v11 }
0x11e6   :  { %v1819_v33 = vmul.f32 1.442695, %v1818_v57  ;;  %v3584_v57 = vld [vmem:[%s4937_s2 + $0x108] sm:$0xff] }
0x11e8   :  { %3719 = vpow2.f32 %v1819_v33 }
0x11eb   :  { %v1629_v60 = vpop.xlane.xlu1 %1628 }
0x11ec   :  { %v1630_v13 = vsub.f32 %v4490_v54, %v1629_v60  ;;  %v3583_v60 = vld [vmem:[%s4937_s2 + $0x100] sm:$0xff] }
0x11ee   :  { %v3720_v61 = vpop.eup %3719  ;;  %v1631_v8 = vmul.f32 1.442695, %v1630_v13  ;;  %v3587_v13 = vld [vmem:[%s4937_s2 + $0xa0] sm:$0xff] }
0x11ef   :  { %v1821_v27 = vsel %vm1015_vm2, %v3720_v61, 0.0 }
0x11f0   :  { %3721 = vpow2.f32 %v1631_v8  ;;  %1822 = vadd.xlane.f32.xlu0 %v1821_v27 }
0x11f6   :  { %v3722_v20 = vpop.eup %3721 }
0x11f7   :  { %v1972_v28 = vpop.xlane.xlu2 %1971  ;;  %v1633_v30 = vsel %vm796_vm3, %v3722_v20, 0.0 }
0x11f8   :  { %v1973_v32 = vsub.f32 %v1969_v39, %v1972_v28  ;;  %1634 = vadd.xlane.f32.xlu0 %v1633_v30 }
0x11fa   :  { %v1974_v56 = vmul.f32 1.442695, %v1973_v32 }
0x11fc   :  { %3723 = vpow2.f32 %v1974_v56 }
0x1202   :  { %v3724_v34 = vpop.eup %3723 }
0x1203   :  { %v1976_v35 = vsel %vm1015_vm2, %v3724_v34, 0.0 }
0x1204   :  { %1977 = vadd.xlane.f32.xlu2 %v1976_v35 }
0x1263   :  { %v1823_v36 = vpop.xlane.xlu0 %1822 }
0x1264   :  { %3725 = vrcp.f32 %v1823_v36 }
0x126a   :  { %v3726_v38 = vpop.eup %3725 }
0x126b   :  { %v1825_v41 = vmul.f32 %v3726_v38, %v3720_v61  ;;  %v1635_v43 = vpop.xlane.xlu0 %1634 }
0x126c   :  { %3727 = vrcp.f32 %v1635_v43  ;;  %v1647_v31 = vand.u32 2147483648, %v1635_v43  ;;  %v1645_v2 = vand.u32 2147483647, %v1635_v43  ;;  %vm1641_vm10 = vweird.f32 %v1635_v43 }
0x126d   :  { %3386 = vmatpush.msk.msra.mxu1 %vm1064_vm4, %v1825_v41  ;;  %v3586_v41 = vld [vmem:[%s4937_s2 + $0x98] sm:$0xff] }
0x126e   :  { %3387 = vmatmul.msk.f32.vlgmr.msra.gmra.mxu1 %vm1060_vm5, %v4265_v24  ;;  %v1648_v16 = vor.u32 1.1754944e-38, %v1647_v31  ;;  %vm1646_vm6 = vcmp.eq.f32.partialorder %v1645_v2, 8.507059e+37 }
0x1272   :  { %v3728_v45 = vpop.eup %3727 }
0x1273   :  { %v1637_v46 = vmul.f32 %v3728_v45, %v1635_v43  ;;  %vm1642_vm9 = vweird.f32 %v3728_v45  ;;  %v3585_v43 = vld [vmem:[%s4937_s2 + $0x90] sm:$0xff] }
0x1274   :  { %vm1643_vm14 = vmor %vm1641_vm10, %vm1642_vm9 }
0x1275   :  { %v1638_v52 = vsub.f32 1.0, %v1637_v46 }
0x1277   :  { %v1639_v19 = vmul.f32 %v3728_v45, %v1638_v52  ;;  %v1978_v58 = vpop.xlane.xlu2 %1977  ;;  %v1847_v52 = vsel %vm1048_vm8, %v4460_v26, 0.0 }
0x1278   :  { %3729 = vrcp.f32 %v1978_v58 }
0x1279   :  { %v1640_v47 = vadd.f32 %v3728_v45, %v1639_v19  ;;  %v1848_v19 = vrot.slane %v1847_v52, 4 }
0x127b   :  { %v1644_v1 = vsel %vm1643_vm14, %v3728_v45, %v1640_v47  ;;  %v1849_v47 = vadd.f32 %v1848_v19, %v1847_v52 }
0x127c   :  { %v1649_v39 = vsel %vm1646_vm6, %v1648_v16, %v1644_v1 }
0x127d   :  { %v1650_v55 = vmul.f32 %v3722_v20, %v1649_v39  ;;  %v1850_v1 = vrot.slane %v1849_v47, 2 }
0x127e   :  { %v3730_v59 = vpop.eup %3729 }
0x127f   :  { %v1980_v7 = vmul.f32 %v3730_v59, %v3724_v34  ;;  %v1726_v11 = vmul.f32 %v4458_v9, %v1650_v55  ;;  %v3588_v9 = vld [vmem:[%s4937_s2 + $0xa8] sm:$0xff]  ;;  %v1851_v55 = vadd.f32 %v1850_v1, %v1849_v47 }
0x1281   :  { %3407 = vmatpush.msk.msrb.mxu1 %vm1064_vm4, %v1980_v7  ;;  %v1727_v33 = vsel %vm796_vm3, %v1726_v11, 0.0  ;;  %v1852_v7 = vrot.slane %v1851_v55, 1 }
0x1282   :  { %1728 = vadd.xlane.f32.xlu2 %v1727_v33  ;;  %3408 = vmatmul.msk.f32.vlgmr.msrb.gmra.mxu1 %vm1060_vm5, %v4265_v24 }
0x1283   :  { %2034 = vmatpush.msra.mxu1 %v4273_v29  ;;  %v1853_v33 = vadd.f32 %v1852_v7, %v1851_v55 }
0x1285   :  { %2126 = vmatpush.bf16.msrb.mxu1 %v3584_v57 }
0x1289   :  { %2127 = vmatpush.bf16.msrb.mxu1 %v3583_v60 }
0x128a   :  { %3409 = vmatmul.msk.f32.vlgmr.msra.gmra.mxu1 %vm881_vm15, %v4369_v44 }
0x128d   :  { %2378 = vmatpush.bf16.msra.mxu1 %v3588_v9 }
0x1291   :  { %2379 = vmatpush.bf16.msra.mxu1 %v3587_v13 }
0x1292   :  { %3421 = vmatmul.msk.bf16.vlgmr.msrb.gmra.mxu1 %vm21_vm1, %v4454_v5 }
0x12a2   :  { %3460 = vmatmul.msk.bf16.vlgmr.msra.gmra.mxu1 %vm21_vm1, %v4448_v17 }
0x12eb   :  { %v4530_v61 = vpop.f32.mrf.mxu1 }
0x12f5   :  { %v1729_v29 = vpop.xlane.xlu2 %1728 }
0x12f6   :  { %3731 = vrcp.f32 %v1729_v29  ;;  %v1741_v30 = vand.u32 2147483648, %v1729_v29  ;;  %v1739_v56 = vand.u32 2147483647, %v1729_v29  ;;  %vm1735_vm9 = vweird.f32 %v1729_v29 }
0x12f8   :  { %v1742_v5 = vor.u32 1.1754944e-38, %v1741_v30  ;;  %vm1740_vm14 = vcmp.eq.f32.partialorder %v1739_v56, 8.507059e+37 }
0x12fc   :  { %v3732_v8 = vpop.eup %3731 }
0x12fd   :  { %v1731_v27 = vmul.f32 %v3732_v8, %v1729_v29  ;;  %vm1736_vm7 = vweird.f32 %v3732_v8 }
0x12fe   :  { %vm1737_vm10 = vmor %vm1735_vm9, %vm1736_vm7 }
0x12ff   :  { %v1732_v20 = vsub.f32 1.0, %v1731_v27  ;;  %v4532_v28 = vpop.f32.mrf.mxu1 }
0x1301   :  { %v1733_v32 = vmul.f32 %v3732_v8, %v1732_v20 }
0x1303   :  { %v1734_v34 = vadd.f32 %v3732_v8, %v1733_v32 }
0x1305   :  { %v1738_v35 = vsel %vm1737_vm10, %v3732_v8, %v1734_v34 }
0x1306   :  { %v1743_v17 = vsel %vm1740_vm14, %v1742_v5, %v1738_v35  ;;  %v1981_v5 = vsel %vm1048_vm8, %v4369_v44, 0.0 }
0x1307   :  { %v4534_v36 = vmul.f32 %v1743_v17, %v1726_v11  ;;  %v4536_v38 = vpop.f32.mrf.mxu1  ;;  %v1982_v35 = vrot.slane %v1981_v5, 4 }
0x1308   :  { %3410 = vmatmul.msk.f32.vlgmr.msra.gmra.mxu3 %vm881_vm15, %v4536_v38  ;;  %v2062_v46 = vsel %vm1048_vm8, %v4536_v38, 0.0 }
0x1309   :  { %2218 = vrot.lane.b32.xlu2 %v4534_v36, %s3763_s7  ;;  %2214 = vrot.lane.b32.xlu0 %v4534_v36, %s3764_s8  ;;  %v2063_v31 = vrot.slane %v2062_v46, 4 }
0x130a   :  { %3431 = vmatpush.msk.msrb.mxu3 %vm1064_vm4, %v4534_v36 }
0x130b   :  { %v2064_v2 = vadd.f32 %v2063_v31, %v2062_v46 }
0x130c   :  { %2316 = vmatpush.bf16.msra.mxu3 %v3586_v41  ;;  %v1983_v41 = vadd.f32 %v1982_v35, %v1981_v5 }
0x130d   :  { %v2065_v16 = vrot.slane %v2064_v2, 2 }
0x130f   :  { %v4552_v45 = vpop.f32.mrf.mxu1 }
0x1310   :  { %2317 = vmatpush.bf16.msra.mxu3 %v3585_v43  ;;  %v1984_v43 = vrot.slane %v1983_v41, 2 }
0x1311   :  { %3432 = vmatmul.msk.f32.vlgmr.msrb.gmra.mxu3 %vm1060_vm5, %v4265_v24 }
0x1314   :  { %2466 = vmatpush.bf16.xpose.msrb.mxu3 %v4087_v6  ;;  %v2066_v6 = vadd.f32 %v2065_v16, %v2064_v2 }
0x1316   :  { %v2067_v59 = vrot.slane %v2066_v6, 1 }
0x1317   :  { %v2131_v58 = vpop.f32.mrf.mxu1 }
0x1318   :  { %v2068_v57 = vadd.f32 %v2067_v59, %v2066_v6  ;;  %v1884_v59 = vsub.f32 %v4530_v61, %v4375_v10 }
0x1319   :  { %3442 = vmatmul.msk.bf16.vlgmr.msra.gmra.mxu3 %vm21_vm1, %v4099_v12  ;;  %v1854_v12 = vmul.f32 %v1853_v33, %v4339_v42 }
0x131a   :  { %v2069_v60 = vmul.f32 %v2068_v57, %v4339_v42 }
0x131b   :  { %v1855_v13 = vsel %vm881_vm15, %v1854_v12, 0.0 }
0x131c   :  { %2603 = vmatpush.bf16.xpose.msra.mxu3 %v4116_v21  ;;  %v2070_v9 = vsel %vm881_vm15, %v2069_v60, 0.0 }
0x131f   :  { %v4564_v39 = vpop.f32.mrf.mxu1 }
0x1324   :  { %2604 = vmatpush.bf16.xpose.msra.mxu3 %v4121_v23 }
0x1327   :  { %v2383_v11 = vpop.f32.mrf.mxu1 }
0x1332   :  { %2071 = vadd.xlane.f32.xlu2 %v2070_v9 }
0x1333   :  { %1856 = vadd.xlane.f32.xlu0 %v1855_v13 }
0x1363   :  { %v2219_v27 = vpop.permute.xlu2 %2218 }
0x137b   :  { %v2215_v29 = vpop.permute.xlu0 %2214 }
0x137c   :  { %v2217_v8 = vadd.f32 %v2215_v29, %v4534_v36 }
0x137e   :  { %v2221_v20 = vadd.f32 %v2219_v27, %v2217_v8 }
0x1380   :  { %2224 = vperm.xlu0 %3621, %v2221_v20  }
0x138b   :  { %v2059_v30 = vpop.f32.mrf.mxu3 }
0x138c   :  { %v2073_v32 = vmin.f32 %v4400_v3, %v2059_v30 }
0x138e   :  { %3411 = vmatpush.msk.msrb.mxu0 %vm1064_vm4, %v2073_v32  ;;  %v3590_v32 = vld [vmem:[%s4937_s2 + $0xb8] sm:$0xff] }
0x138f   :  { %3412 = vmatmul.msk.f32.vlgmr.msrb.gmra.mxu0 %vm1060_vm5, %v4265_v24  ;;  %v1985_v24 = vadd.f32 %v1984_v43, %v1983_v41  ;;  %v3589_v41 = vld [vmem:[%s4937_s2 + $0xb0] sm:$0xff] }
0x1391   :  { %v1986_v46 = vrot.slane %v1985_v24, 1 }
0x1393   :  { %v1987_v52 = vadd.f32 %v1986_v46, %v1985_v24  ;;  %v3663_v46 = vld [vmem:[%s4938_s3 + $0xd] ss:$0 sm:$0xff] }
0x1394   :  { %v2182_v56 = vpop.f32.mrf.mxu3 }
0x1395   :  { %2203 = vperm.xlu2 %3629, %v2182_v56   ;;  %2186 = vrot.lane.b32.xlu1 %v2182_v56, %s3763_s7  ;;  %v1988_v31 = vmul.f32 %v1987_v52, %v4339_v42  ;;  %v2501_v42 = vld [vmem:[%s4938_s3 + $0x18] sm:$0xff] }
0x1396   :  { %2517 = vmatpush.msrb.mxu1 %v2501_v42 }
0x1397   :  { %v1989_v19 = vsel %vm881_vm15, %v1988_v31, 0.0 }
0x139c   :  { %v4577_v34 = vpop.f32.mrf.mxu3 }
0x139d   :  { %3632 = vset.pattern.permute.xlu2 %v3768_v25 }
0x139e   :  { %2235 = vperm.xlu2 %3632, %v4534_v36  }
0x13a4   :  { %v2321_v17 = vpop.f32.mrf.mxu3 }
0x13a5   :  { %v2072_v16 = vpop.xlane.xlu2 %2071 }
0x13a6   :  { %3635 = vset.pattern.permute.xlu2 %v3765_v48  ;;  %v1857_v48 = vpop.xlane.xlu0 %1856 }
0x13a7   :  { %v1885_v7 = vmul.f32 %v1884_v59, %v1857_v48 }
0x13a9   :  { %v1886_v12 = vadd.f32 %v1885_v7, %v4375_v10 }
0x13bf   :  { %1990 = vadd.xlane.f32.xlu1 %v1989_v19 }
0x13d8   :  { %2197 = vperm.xlu1 %3628, %v2182_v56  }
0x13e0   :  { %3631 = vset.pattern.permute.xlu1 %v3768_v25 }
0x13e1   :  { %2209 = vperm.xlu1 %3631, %v2182_v56  }
0x13e9   :  { %3633 = vset.pattern.permute.xlu1 %v3766_v49 }
0x13ef   :  { %v2204_v57 = vpop.permute.xlu2 %2203 }
0x13f2   :  { %v2225_v1 = vpop.permute.xlu0 %2224 }
0x13f8   :  { %v2236_v5 = vpop.permute.xlu2 %2235 }
0x13f9   :  { %v2238_v43 = vmul.f32 %v2236_v5, %v4536_v38  ;;  %v2451_v38 = vld [vmem:[%s4938_s3 + $0x11] sm:$0x1]  ;;  %v3596_v5 = vld [vmem:[%s4937_s2 + $0xd8] sm:$0xff] }
0x13fa   :  { %3607 = vpush %v2451_v38  ;;  %v3600_v38 = vld [vmem:[%s4937_s2 + $0xf8] sm:$0xff] }
0x1407   :  { %v2187_v58 = vpop.permute.xlu1 %2186 }
0x1408   :  { %v2189_v2 = vadd.f32 %v2187_v58, %v2182_v56  ;;  %v3664_v58 = vld [vmem:[%s4938_s3 + $0xe] ss:$0 sm:$0xff] }
0x140a   :  { %2192 = vperm.xlu0 %3621, %v2189_v2  }
0x140c   :  { %v2094_v6 = vpop.f32.mrf.mxu0 }
0x1412   :  { %3630 = vset.pattern.permute.xlu0 %v3766_v49  ;;  %v2015_v49 = vsub.f32 %v4532_v28, %v4375_v10 }
0x1413   :  { %2229 = vperm.xlu0 %3630, %v4534_v36  }
0x141b   :  { %3634 = vset.pattern.permute.xlu0 %v3767_v22  ;;  %v2097_v22 = vsub.f32 %v2094_v6, %v4375_v10 }
0x141d   :  { %v2098_v33 = vmul.f32 %v2097_v22, %v2072_v16 }
0x141f   :  { %v2099_v61 = vadd.f32 %v2098_v33, %v4375_v10 }
0x142b   :  { %s3608_s10 = spop %3607 }
0x1432   :  { %v1991_v47 = vpop.xlane.xlu1 %1990 }
0x1433   :  { %v2016_v11 = vmul.f32 %v2015_v49, %v1991_v47 }
0x1435   :  { %v2017_v60 = vadd.f32 %v2016_v11, %v4375_v10 }
0x1437   :  { %v2206_v27 = vmul.f32 %v2204_v57, %v2017_v60 }
0x144a   :  { %v2198_v55 = vpop.permute.xlu1 %2197 }
0x144b   :  { %v2200_v13 = vmul.f32 %v2198_v55, %v1886_v12  ;;  %v2454_v55 = vstv %s3608_s10 }
0x1453   :  { %v2210_v8 = vpop.permute.xlu1 %2209 }
0x1454   :  { %v2212_v28 = vmul.f32 %v2210_v8, %v2099_v61 }
0x147c   :  { %v2193_v9 = vpop.permute.xlu0 %2192 }
0x147d   :  { %v2195_v29 = vmul.f32 %v2193_v9, %v4375_v10  ;;  %v2227_v10 = vmul.f32 %v2225_v1, %v4369_v44 }
0x147f   :  { %v2201_v20 = vadd.f32 %v2200_v13, %v2195_v29  ;;  %v3594_v29 = vld [vmem:[%s4937_s2 + $0xc8] sm:$0xff] }
0x1480   :  { %2586 = vmatpush.bf16.msra.mxu1 %v3594_v29 }
0x1481   :  { %v2207_v30 = vadd.f32 %v2206_v27, %v2201_v20  ;;  %v3598_v20 = vld [vmem:[%s4937_s2 + $0xe8] sm:$0xff] }
0x1483   :  { %v4606_v56 = vadd.f32 %v2212_v28, %v2207_v30  ;;  %v3597_v30 = vld [vmem:[%s4937_s2 + $0xe0] sm:$0xff] }
0x1485   :  { %2271 = vmatpush.msra.mxu0 %v4606_v56  ;;  %v2230_v35 = vpop.permute.xlu0 %2229  ;;  %2291 = vst.msk [vmem:[%s4943_s6 + $0x8] sm:$0xff] %vm21_vm1, %v4606_v56 }
0x1486   :  { %v2232_v17 = vmul.f32 %v2230_v35, %v4460_v26  ;;  %v2320_v26 = vadd.f32 %v3663_v46, %v4577_v34  ;;  %v3595_v35 = vld [vmem:[%s4937_s2 + $0xd0] sm:$0xff] }
0x1487   :  { %2353 = vmatpush.bf16.msrb.mxu0 %v3590_v32  ;;  %v3593_v32 = vld [vmem:[%s4937_s2 + $0xc0] sm:$0xff] }
0x1488   :  { %v2233_v24 = vadd.f32 %v2232_v17, %v2227_v10  ;;  %v2327_v31 = vpack.c.bf16 %v2320_v26, %v2320_v26  ;;  %2587 = vmatpush.bf16.msra.mxu1 %v3593_v32 }
0x148a   :  { %v4623_v52 = vadd.f32 %v2238_v43, %v2233_v24 }
0x148b   :  { %2354 = vmatpush.bf16.msrb.mxu0 %v3589_v41 }
0x148c   :  { %3433 = vmatmul.msk.f32.vlgmr.msra.gmra.mxu0 %vm881_vm15, %v4623_v52  ;;  %3472 = vmatmul.msk.f32.vlgmr.msrb.gmra.mxu1 %vm881_vm15, %v4623_v52 }
0x148d   :  { %2738 = vmatpush.bf16.msrb.mxu1 %v3596_v5 }
0x148f   :  { %2495 = vmatpush.bf16.msra.mxu0 %v4081_v4  ;;  %v3665_v4 = vld [vmem:[%s4938_s3 + $0x10] ss:$0 sm:$0xff] }
0x1491   :  { %2739 = vmatpush.bf16.msrb.mxu1 %v3595_v35 }
0x1494   :  { %3451 = vmatmul.msk.bf16.vlgmr.msrb.gmra.mxu0 %vm21_vm1, %v2327_v31 }
0x1495   :  { %2638 = vmatpush.msrb.mxu0 %v2622_v37 }
0x1509   :  { %v4635_v19 = vpop.f32.mrf.mxu0  ;;  %v4692_v24 = vpop.f32.mrf.mxu1 }
0x1511   :  { %v2356_v2 = vpop.f32.mrf.mxu0 }
0x1512   :  { %v2382_v42 = vadd.f32 %v4564_v39, %v2356_v2  ;;  %v2543_v39 = vpack.c.bf16 %v4635_v19, %v4635_v19  ;;  %v3599_v2 = vld [vmem:[%s4937_s2 + $0xf0] sm:$0xff] }
0x1514   :  { %v2387_v34 = vadd.f32 %v3664_v58, %v2382_v42 }
0x1516   :  { %v2388_v48 = vpack.c.bf16 %v2387_v34, %v2387_v34  ;;  %v2449_v47 = vmul.f32 %v3665_v4, %v2387_v34  ;;  %v3667_v34 = vld [vmem:[%s4938_s3 + $0x12] ss:$0 sm:$0xff] }
0x1518   :  { %v2450_v16 = vpack.c.bf16 %v2449_v47, %v2449_v47  ;;  %3469 = vmatmul.msk.bf16.vlgmr.msrb.gmra.mxu2 %vm21_vm1, %v2388_v48 }
0x1519   :  { %v2358_v1 = vpop.f32.mrf.mxu0 }
0x151a   :  { %3470 = vmatmul.msk.bf16.vlgmr.msrb.gmra.mxu3 %vm21_vm1, %v2450_v16 }
0x151b   :  { %2758 = vmatpush.bf16.xpose.msrb.mxu3 %v4116_v21 }
0x1523   :  { %2759 = vmatpush.bf16.xpose.msrb.mxu3 %v4121_v23 }
0x1528   :  { %3473 = vmatmul.msk.bf16.vlgmr.msra.gmra.mxu2 %vm21_vm1, %v2543_v39 }
0x159b   :  { %v4651_v6 = vpop.f32.mrf.mxu2 }
0x159d   :  { %v2468_v59 = vpop.f32.mrf.mxu3 }
0x159e   :  { %v2469_v49 = vadd.f32 %v2468_v59, %v2454_v55 }
0x15a0   :  { %v2472_v7 = vsel %vm849_vm12, %v2469_v49, -1e+30 }
0x15a1   :  { %v2473_v22 = vsel %vm851_vm13, %v2472_v7, -inf }
0x15a2   :  { %2474 = vmax.xlane.f32.xlu1 %v2473_v22 }
0x15a3   :  { %v2421_v21 = vpop.f32.mrf.mxu2 }
0x15a5   :  { %v2470_v11 = vpop.f32.mrf.mxu3 }
0x15a6   :  { %v3666_v11 = vld [vmem:[%s4938_s3 + $0xf] ss:$0 sm:$0xff] }
0x15ab   :  { %v2556_v23 = vpop.f32.mrf.mxu2 }
0x15ac   :  { %v4688_v43 = vpack.c.bf16 %v2556_v23, %v2556_v23 }
0x15b3   :  { %v2558_v57 = vpop.f32.mrf.mxu2 }
0x15b4   :  { %v4718_v57 = vadd.f32 %v3666_v11, %v4651_v6 }
0x1615   :  { %v2475_v33 = vpop.xlane.xlu1 %2474 }
0x1616   :  { %v2476_v60 = vsub.f32 %v2472_v7, %v2475_v33 }
0x1618   :  { %v2477_v12 = vmul.f32 1.442695, %v2476_v60  ;;  %v2423_v60 = vsel %vm796_vm3, %v4718_v57, -inf }
0x161a   :  { %3733 = vpow2.f32 %v2477_v12 }
0x1620   :  { %v3734_v9 = vpop.eup %3733 }
0x1621   :  { %v2479_v13 = vsel %vm851_vm13, %v3734_v9, 0.0 }
0x1622   :  { %2480 = vadd.xlane.f32.xlu2 %v2479_v13 }
0x1695   :  { %v2481_v8 = vpop.xlane.xlu2 %2480 }
0x1696   :  { %3735 = vrcp.f32 %v2481_v8 }
0x169c   :  { %v3736_v27 = vpop.eup %3735 }
0x169d   :  { %v2483_v61 = vmul.f32 %v3736_v27, %v3734_v9 }
0x169f   :  { %v2484_v28 = vpack.c.bf16 %v2483_v61, %v2483_v61  ;;  %3072 = vst.msk [vmem:[%s4942_s5 + $0x4] sm:$0x3] %vm851_vm13, %v2483_v61 }
0x16a1   :  { %3471 = vmatmul.msk.bf16.vlgmr.msra.gmra.mxu0 %vm627_vm11, %v2484_v28 }
0x16a2   :  { %2710 = vmatpush.bf16.msra.mxu0 %v3598_v20 }
0x16a6   :  { %2711 = vmatpush.bf16.msra.mxu0 %v3597_v30 }
0x16b1   :  { %3484 = vmatmul.msk.f32.vlgmr.msrb.gmra.mxu0 %vm881_vm15, %v4623_v52 }
0x16b2   :  { %2853 = vmatpush.msrb.mxu0 %v4606_v56 }
0x171e   :  { %v2497_v10 = vpop.f32.mrf.mxu0 }
0x171f   :  { %v2560_v17 = vpack.c.bf16 %v2497_v10, %v2497_v10 }
0x1721   :  { %3482 = vmatmul.msk.bf16.vlgmr.msra.gmra.mxu1 %vm21_vm1, %v2560_v17  ;;  %3495 = vmatmul.msk.bf16.vlgmr.msra.gmra.mxu0 %vm21_vm1, %v2560_v17 }
0x1726   :  { %v2499_v41 = vpop.f32.mrf.mxu0 }
0x172e   :  { %v4694_v46 = vpop.f32.mrf.mxu0 }
0x1731   :  { %3504 = vmatmul.msk.bf16.vlgmr.msrb.gmra.mxu1 %vm21_vm1, %v4688_v43 }
0x179e   :  { %v2589_v26 = vpop.f32.mrf.mxu1  ;;  %v2713_v31 = vpop.f32.mrf.mxu0 }
0x179f   :  { %v2593_v58 = vpack.c.bf16 %v2589_v26, %v2589_v26 }
0x17a1   :  { %3483 = vmatmul.msk.bf16.vlgmr.msra.gmra.mxu3 %vm21_vm1, %v2593_v58 }
0x17a2   :  { %2947 = vmatpush.bf16.msra.mxu3 %v3600_v38  ;;  %v4731_v38 = vld [vmem:[%s4938_s3 + $0x30] sm:$0xff] }
0x17a6   :  { %v2591_v42 = vpop.f32.mrf.mxu1  ;;  %v2715_v4 = vpop.f32.mrf.mxu0  ;;  %2948 = vmatpush.bf16.msra.mxu3 %v3599_v2 }
0x17ae   :  { %v2741_v48 = vpop.f32.mrf.mxu1 }
0x17af   :  { %v2742_v47 = vadd.f32 %v2741_v48, %v2713_v31  ;;  %v3602_v48 = vld [vmem:[%s4937_s2 + $0x108] sm:$0xff] }
0x17b1   :  { %v2747_v16 = vadd.f32 %v3667_v34, %v2742_v47  ;;  %v2814_v34 = vld [vmem:[%s4938_s3 + $0x28] sm:$0xff]  ;;  %v3601_v47 = vld [vmem:[%s4937_s2 + $0x100] sm:$0xff] }
0x17b3   :  { %v2748_v1 = vpack.c.bf16 %v2747_v16, %v2747_v16 }
0x17b5   :  { %3505 = vmatmul.msk.bf16.vlgmr.msrb.gmra.mxu3 %vm21_vm1, %v2748_v1 }
0x17b6   :  { %v2743_v39 = vpop.f32.mrf.mxu1 }
0x17c5   :  { %3529 = vmatmul.msk.bf16.vlgmr.msra.gmra.mxu3 %vm21_vm1, %v2560_v17 }
0x1824   :  { %v2606_v55 = vpop.f32.mrf.mxu3 }
0x1825   :  { %v2610_v59 = vsel %vm996_vm0, %v2606_v55, -1e+30 }
0x1826   :  { %v2611_v49 = vsel %vm1015_vm2, %v2610_v59, -inf }
0x1827   :  { %2612 = vmax.xlane.f32.xlu0 %v2611_v49 }
0x182c   :  { %v2608_v7 = vpop.f32.mrf.mxu3 }
0x1838   :  { %v2761_v22 = vpop.f32.mrf.mxu3 }
0x1839   :  { %v2765_v21 = vsel %vm996_vm0, %v2761_v22, -1e+30 }
0x183a   :  { %v2766_v23 = vsel %vm1015_vm2, %v2765_v21, -inf }
0x183b   :  { %2767 = vmax.xlane.f32.xlu1 %v2766_v23 }
0x1840   :  { %v2763_v33 = vpop.f32.mrf.mxu3 }
0x1843   :  { %2424 = vmax.xlane.f32.xlu1 %v2423_v60 }
0x1848   :  { %v4722_v12 = vpop.f32.mrf.mxu3 }
0x1850   :  { %v2952_v9 = vpop.f32.mrf.mxu3 }
0x189a   :  { %v2613_v13 = vpop.xlane.xlu0 %2612 }
0x189b   :  { %v2614_v37 = vsub.f32 %v2610_v59, %v2613_v13 }
0x189d   :  { %v2615_v29 = vmul.f32 1.442695, %v2614_v37 }
0x189f   :  { %3737 = vpow2.f32 %v2615_v29 }
0x18a5   :  { %v3738_v8 = vpop.eup %3737 }
0x18a6   :  { %v2617_v27 = vsel %vm1015_vm2, %v3738_v8, 0.0 }
0x18a7   :  { %2618 = vadd.xlane.f32.xlu2 %v2617_v27 }
0x18ae   :  { %v2768_v61 = vpop.xlane.xlu1 %2767 }
0x18af   :  { %v2769_v20 = vsub.f32 %v2765_v21, %v2768_v61 }
0x18b1   :  { %v2770_v6 = vmul.f32 1.442695, %v2769_v20 }
0x18b3   :  { %3739 = vpow2.f32 %v2770_v6 }
0x18b6   :  { %v2425_v28 = vpop.xlane.xlu1 %2424 }
0x18b7   :  { %v2426_v30 = vsub.f32 %v4718_v57, %v2425_v28 }
0x18b9   :  { %v3740_v32 = vpop.eup %3739  ;;  %v2427_v5 = vmul.f32 1.442695, %v2426_v30 }
0x18ba   :  { %v2772_v35 = vsel %vm1015_vm2, %v3740_v32, 0.0 }
0x18bb   :  { %3741 = vpow2.f32 %v2427_v5  ;;  %2773 = vadd.xlane.f32.xlu0 %v2772_v35 }
0x18c1   :  { %v3742_v10 = vpop.eup %3741 }
0x18c2   :  { %v2429_v17 = vsel %vm796_vm3, %v3742_v10, 0.0 }
0x18c3   :  { %2430 = vadd.xlane.f32.xlu2 %v2429_v17  ;;  %v2643_v17 = vsel %vm1048_vm8, %v4694_v46, 0.0 }
0x191a   :  { %v2619_v41 = vpop.xlane.xlu2 %2618 }
0x191b   :  { %3743 = vrcp.f32 %v2619_v41 }
0x1921   :  { %v3744_v26 = vpop.eup %3743 }
0x1922   :  { %v2621_v31 = vmul.f32 %v3744_v26, %v3738_v8  ;;  %v2644_v26 = vrot.slane %v2643_v17, 4 }
0x1924   :  { %3485 = vmatpush.msk.msrb.mxu2 %vm1064_vm4, %v2621_v31 }
0x1925   :  { %3486 = vmatmul.msk.f32.vlgmr.msrb.gmra.mxu2 %vm1060_vm5, %v4731_v38 }
0x192e   :  { %v2774_v58 = vpop.xlane.xlu0 %2773 }
0x192f   :  { %3745 = vrcp.f32 %v2774_v58  ;;  %v2645_v58 = vadd.f32 %v2644_v26, %v2643_v17 }
0x1935   :  { %v3746_v2 = vpop.eup %3745 }
0x1936   :  { %v2776_v42 = vmul.f32 %v3746_v2, %v3740_v32  ;;  %v2431_v4 = vpop.xlane.xlu2 %2430 }
0x1937   :  { %3747 = vrcp.f32 %v2431_v4  ;;  %v2443_v55 = vand.u32 2147483648, %v2431_v4  ;;  %v2441_v49 = vand.u32 2147483647, %v2431_v4  ;;  %vm2437_vm12 = vweird.f32 %v2431_v4 }
0x1938   :  { %3506 = vmatpush.msk.msra.mxu2 %vm1064_vm4, %v2776_v42  ;;  %v2646_v42 = vrot.slane %v2645_v58, 2 }
0x1939   :  { %3507 = vmatmul.msk.f32.vlgmr.msra.gmra.mxu2 %vm1060_vm5, %v4731_v38  ;;  %v2444_v22 = vor.u32 1.1754944e-38, %v2443_v55  ;;  %vm2442_vm6 = vcmp.eq.f32.partialorder %v2441_v49, 8.507059e+37  ;;  %v2541_v55 = vld [vmem:[%s4938_s3 + $0x40] sm:$0xff] }
0x193a   :  { %2830 = vmatpush.msrb.mxu2 %v2814_v34  ;;  %v2647_v34 = vadd.f32 %v2646_v42, %v2645_v58  ;;  %v1356_v58 = vadd.f32 %v4309_v0, %v4246_v53 }
0x193c   :  { %2922 = vmatpush.bf16.msra.mxu2 %v3602_v48 }
0x193d   :  { %v3748_v16 = vpop.eup %3747 }
0x193e   :  { %v2433_v1 = vmul.f32 %v3748_v16, %v2431_v4  ;;  %vm2438_vm11 = vweird.f32 %v3748_v16 }
0x193f   :  { %vm2439_vm13 = vmor %vm2437_vm12, %vm2438_vm11 }
0x1940   :  { %2923 = vmatpush.bf16.msra.mxu2 %v3601_v47  ;;  %v2434_v39 = vsub.f32 1.0, %v2433_v1  ;;  %v2648_v47 = vrot.slane %v2647_v34, 1 }
0x1941   :  { %3508 = vmatmul.msk.f32.vlgmr.msrb.gmra.mxu2 %vm881_vm15, %v4623_v52 }
0x1942   :  { %v2435_v59 = vmul.f32 %v3748_v16, %v2434_v39  ;;  %v2649_v1 = vadd.f32 %v2648_v47, %v2647_v34  ;;  %v3662_v34 = vld [vmem:[%s4938_s3 + $0x13] ss:$0 sm:$0xff] }
0x1944   :  { %v2436_v7 = vadd.f32 %v3748_v16, %v2435_v59  ;;  %v2650_v59 = vmul.f32 %v2649_v1, %v2541_v55 }
0x1946   :  { %v2440_v21 = vsel %vm2439_vm13, %v3748_v16, %v2436_v7  ;;  %v2651_v7 = vsel %vm881_vm15, %v2650_v59, 0.0 }
0x1947   :  { %v2445_v11 = vsel %vm2442_vm6, %v2444_v22, %v2440_v21 }
0x1948   :  { %v2446_v23 = vmul.f32 %v3742_v10, %v2445_v11 }
0x1949   :  { %3520 = vmatmul.msk.bf16.vlgmr.msra.gmra.mxu2 %vm21_vm1, %v4688_v43 }
0x194a   :  { %v2522_v33 = vmul.f32 %v4692_v24, %v2446_v23 }
0x194c   :  { %v2523_v60 = vsel %vm796_vm3, %v2522_v33, 0.0 }
0x194d   :  { %2524 = vadd.xlane.f32.xlu0 %v2523_v60 }
0x19a8   :  { %v4754_v9 = vpop.f32.mrf.mxu2 }
0x19bc   :  { %v4756_v13 = vpop.f32.mrf.mxu2 }
0x19c0   :  { %v2525_v37 = vpop.xlane.xlu0 %2524 }
0x19c1   :  { %3749 = vrcp.f32 %v2525_v37  ;;  %v2537_v43 = vand.u32 2147483648, %v2525_v37  ;;  %v2535_v24 = vand.u32 2147483647, %v2525_v37  ;;  %vm2531_vm3 = vweird.f32 %v2525_v37 }
0x19c3   :  { %v2538_v30 = vor.u32 1.1754944e-38, %v2537_v43  ;;  %vm2536_vm10 = vcmp.eq.f32.partialorder %v2535_v24, 8.507059e+37  ;;  %v2777_v43 = vsel %vm1048_vm8, %v4623_v52, 0.0 }
0x19c4   :  { %v4758_v29 = vpop.f32.mrf.mxu2 }
0x19c5   :  { %3509 = vmatmul.msk.f32.vlgmr.msrb.gmra.mxu0 %vm881_vm15, %v4758_v29  ;;  %v2858_v41 = vsel %vm1048_vm8, %v4758_v29, 0.0  ;;  %vm1493_vm8 = vcmask 517376  }
0x19c6   :  { %v2859_v31 = vrot.slane %v2858_v41, 4 }
0x19c7   :  { %v3750_v8 = vpop.eup %3749 }
0x19c8   :  { %v2527_v27 = vmul.f32 %v3750_v8, %v2525_v37  ;;  %vm2532_vm7 = vweird.f32 %v3750_v8  ;;  %v2860_v2 = vadd.f32 %v2859_v31, %v2858_v41 }
0x19c9   :  { %vm2533_vm9 = vmor %vm2531_vm3, %vm2532_vm7 }
0x19ca   :  { %v2528_v61 = vsub.f32 1.0, %v2527_v27  ;;  %v2861_v4 = vrot.slane %v2860_v2, 2  ;;  %v1441_v27 = vsub.f32 1.0, %v4311_v18 }
0x19cc   :  { %v2529_v20 = vmul.f32 %v3750_v8, %v2528_v61  ;;  %v4762_v6 = vpop.f32.mrf.mxu2  ;;  %v2862_v48 = vadd.f32 %v2861_v4, %v2860_v2  ;;  %v3769_v61 = vmov 4   ;;  %v3656_v2 = vld [vmem:[%s4938_s3 + $0x13] ss:$0 sm:$0xff] }
0x19cd   :  { %v1361_v42 = vadd.f32 %v3656_v2, %v1356_v58  ;;  %v2951_v40 = vadd.f32 %v4722_v12, %v4762_v6 }
0x19ce   :  { %v2530_v28 = vadd.f32 %v3750_v8, %v2529_v20  ;;  %v2863_v16 = vrot.slane %v2862_v48, 1  ;;  %v2778_v20 = vrot.slane %v2777_v43, 4 }
0x19cf   :  { %3751 = vtanh.f32 %v1361_v42 }
0x19d0   :  { %v2534_v32 = vsel %vm2533_vm9, %v3750_v8, %v2530_v28  ;;  %v2864_v39 = vadd.f32 %v2863_v16, %v2862_v48  ;;  %v2779_v24 = vadd.f32 %v2778_v20, %v2777_v43 }
0x19d1   :  { %v2539_v5 = vsel %vm2536_vm10, %v2538_v30, %v2534_v32 }
0x19d2   :  { %v4764_v35 = vmul.f32 %v2539_v5, %v2522_v33  ;;  %v2865_v49 = vmul.f32 %v2864_v39, %v2541_v55  ;;  %v2780_v28 = vrot.slane %v2779_v24, 2 }
0x19d4   :  { %v2927_v10 = vpop.f32.mrf.mxu2  ;;  %3014 = vrot.lane.b32.xlu0 %v4764_v35, %s3763_s7  ;;  %3010 = vrot.lane.b32.xlu2 %v4764_v35, %s3764_s8  ;;  %v2866_v22 = vsel %vm881_vm15, %v2865_v49, 0.0  ;;  %v2781_v30 = vadd.f32 %v2780_v28, %v2779_v24 }
0x19d5   :  { %3530 = vmatpush.msk.msra.mxu0 %vm1064_vm4, %v4764_v35  ;;  %v3752_v47 = vpop.eup %3751 }
0x19d6   :  { %3531 = vmatmul.msk.f32.vlgmr.msra.gmra.mxu0 %vm1060_vm5, %v4731_v38  ;;  %v2782_v32 = vrot.slane %v2781_v30, 1 }
0x19d8   :  { %v2783_v5 = vadd.f32 %v2782_v32, %v2781_v30 }
0x19da   :  { %v2784_v10 = vmul.f32 %v2783_v5, %v2541_v55 }
0x19dc   :  { %v2785_v17 = vsel %vm881_vm15, %v2784_v10, 0.0 }
0x19fd   :  { %2652 = vadd.xlane.f32.xlu2 %v2651_v7 }
0x19fe   :  { %2867 = vadd.xlane.f32.xlu0 %v2866_v22 }
0x1a2e   :  { %v3011_v21 = vpop.permute.xlu2 %3010 }
0x1a2f   :  { %v3013_v33 = vadd.f32 %v3011_v21, %v4764_v35 }
0x1a42   :  { %v2855_v11 = vpop.f32.mrf.mxu0 }
0x1a43   :  { %v2869_v23 = vmin.f32 %v4635_v19, %v2855_v11 }
0x1a45   :  { %3510 = vmatpush.msk.msra.mxu1 %vm1064_vm4, %v2869_v23  ;;  %v2680_v23 = vsub.f32 %v4754_v9, %v4606_v56  ;;  %vm1482_vm4 = vcmask 164992  }
0x1a46   :  { %v3015_v60 = vpop.permute.xlu0 %3014  ;;  %3511 = vmatmul.msk.f32.vlgmr.msra.gmra.mxu1 %vm1060_vm5, %v4731_v38  ;;  %v2240_v38 = vsub.f32 1.0, %v4534_v36  ;;  %vm1487_vm5 = vcmask 255168  }
0x1a47   :  { %v3017_v37 = vadd.f32 %v3015_v60, %v3013_v33  ;;  %v2811_v33 = vsub.f32 %v4756_v13, %v4606_v56 }
0x1a49   :  { %3020 = vperm.xlu2 %3635, %v3017_v37  }
0x1a53   :  { %v2978_v8 = vpop.f32.mrf.mxu0 }
0x1a54   :  { %2999 = vperm.xlu0 %3634, %v2978_v8   ;;  %2982 = vrot.lane.b32.xlu1 %v2978_v8, %s3763_s7  ;;  %s3770_s7 = smov 16  }
0x1a5c   :  { %3638 = vset.pattern.permute.xlu0 %v3769_v61 }
0x1a5d   :  { %1444 = vperm.xlu0 %3638, %v1441_v27  }
0x1a65   :  { %1449 = vperm.xlu0 %3638, %v4311_v18  }
0x1a6d   :  { %2243 = vperm.xlu0 %3638, %v2240_v38  }
0x1a70   :  { %v2653_v22 = vpop.xlane.xlu2 %2652 }
0x1a71   :  { %v2868_v18 = vpop.xlane.xlu0 %2867  ;;  %v2681_v60 = vmul.f32 %v2680_v23, %v2653_v22 }
0x1a75   :  { %2248 = vperm.xlu0 %3638, %v4534_v36  }
0x1a7d   :  { %3044 = vperm.xlu0 %3638, %v4764_v35  }
0x1a7e   :  { %2786 = vadd.xlane.f32.xlu1 %v2785_v17 }
0x1a97   :  { %2993 = vperm.xlu1 %3633, %v2978_v8  }
0x1a9f   :  { %3025 = vperm.xlu1 %3633, %v4764_v35  }
0x1aa3   :  { %v3021_v11 = vpop.permute.xlu2 %3020 }
0x1aa4   :  { %v3023_v17 = vmul.f32 %v3021_v11, %v4623_v52  ;;  %v3107_v11 = vld [vmem:[%s4938_s3 + $0x48] sm:$0xff] }
0x1aa7   :  { %3637 = vset.pattern.permute.xlu1 %v3768_v25 }
0x1aa8   :  { %3031 = vperm.xlu1 %3637, %v4764_v35  }
0x1ab0   :  { %2278 = vrot.lane.b32.xlu1 %v4490_v54, %s3770_s7  ;;  %v2155_v54 = vadd.f32 %v4497_v63, %v4552_v45 }
0x1ac6   :  { %v2983_v36 = vpop.permute.xlu1 %2982  ;;  %v3000_v41 = vpop.permute.xlu0 %2999 }
0x1ac7   :  { %v2985_v26 = vadd.f32 %v2983_v36, %v2978_v8 }
0x1ac9   :  { %2988 = vperm.xlu2 %3635, %v2985_v26  }
0x1acf   :  { %v1445_v31 = vpop.permute.xlu0 %1444 }
0x1ad0   :  { %v1447_v0 = vmul.f32 0.0, %v1445_v31 }
0x1ad1   :  { %3636 = vset.pattern.permute.xlu2 %v3768_v25  ;;  %v2160_v25 = vadd.f32 %v3662_v34, %v2155_v54 }
0x1ad2   :  { %3005 = vperm.xlu2 %3636, %v2978_v8   ;;  %v2890_v8 = vpop.f32.mrf.mxu1 }
0x1ad3   :  { %3753 = vtanh.f32 %v2160_v25  ;;  %v2893_v20 = vsub.f32 %v2890_v8, %v4606_v56 }
0x1ad5   :  { %v2894_v30 = vmul.f32 %v2893_v20, %v2868_v18  ;;  %v3036_v18 = vsub.f32 1.0, %v4764_v35 }
0x1ad7   :  { %v1450_v4 = vpop.permute.xlu0 %1449  ;;  %v2895_v10 = vadd.f32 %v2894_v30, %v4606_v56 }
0x1ad8   :  { %v1452_v53 = vmul.f32 %v3752_v47, %v1450_v4 }
0x1ad9   :  { %v3754_v1 = vpop.eup %3753 }
0x1ada   :  { %3639 = vset.pattern.permute.xlu2 %v3769_v61  ;;  %v1453_v16 = vadd.f32 %v1452_v53, %v1447_v0  ;;  %v2682_v61 = vadd.f32 %v2681_v60, %v4606_v56 }
0x1adf   :  { %v2244_v48 = vpop.permute.xlu0 %2243 }
0x1ae0   :  { %v2246_v55 = vmul.f32 %v2244_v48, %v1453_v16 }
0x1ae7   :  { %v2249_v39 = vpop.permute.xlu0 %2248 }
0x1ae8   :  { %v2251_v59 = vmul.f32 %v3754_v1, %v2249_v39 }
0x1aea   :  { %v2252_v49 = vadd.f32 %v2251_v59, %v2246_v55 }
0x1af1   :  { %v2787_v7 = vpop.xlane.xlu1 %2786 }
0x1af2   :  { %v2812_v37 = vmul.f32 %v2811_v33, %v2787_v7 }
0x1af4   :  { %v2813_v27 = vadd.f32 %v2812_v37, %v4606_v56 }
0x1af6   :  { %v3002_v28 = vmul.f32 %v3000_v41, %v2813_v27 }
0x1b09   :  { %v2994_v63 = vpop.permute.xlu1 %2993 }
0x1b0a   :  { %v2996_v24 = vmul.f32 %v2994_v63, %v2682_v61  ;;  %v3109_v61 = vld [vmem:[%s4938_s3 + $0x58] sm:$0xff] }
0x1b11   :  { %v3026_v45 = vpop.permute.xlu1 %3025 }
0x1b12   :  { %v3028_v5 = vmul.f32 %v3026_v45, %v4694_v46 }
0x1b14   :  { %v3029_v58 = vadd.f32 %v3028_v5, %v3023_v17 }
0x1b1a   :  { %v3032_v21 = vpop.permute.xlu1 %3031 }
0x1b1b   :  { %v3034_v36 = vmul.f32 %v3032_v21, %v4758_v29  ;;  %v3108_v21 = vld [vmem:[%s4938_s3 + $0x50] sm:$0xff] }
0x1b1d   :  { %v3035_v42 = vadd.f32 %v3034_v36, %v3029_v58 }
0x1b22   :  { %v2279_v43 = vpop.permute.xlu1 %2278 }
0x1b23   :  { %2281 = vst.msk [vmem:[%s4942_s5 + $0x2] sm:$0x3] %vm1482_vm4, %v2279_v43  ;;  %v2989_v9 = vpop.permute.xlu2 %2988 }
0x1b24   :  { %v2991_v13 = vmul.f32 %v2989_v9, %v4606_v56  ;;  %v3110_v9 = vld [vmem:[%s4938_s3 + $0x60] sm:$0xff] }
0x1b26   :  { %v2997_v38 = vadd.f32 %v2996_v24, %v2991_v13 }
0x1b28   :  { %v3003_v32 = vadd.f32 %v3002_v28, %v2997_v38 }
0x1b2c   :  { %v3006_v26 = vpop.permute.xlu2 %3005 }
0x1b2d   :  { %v3008_v31 = vmul.f32 %v3006_v26, %v2895_v10 }
0x1b2f   :  { %v3009_v2 = vadd.f32 %v3008_v31, %v3003_v32 }
0x1b31   :  { %3087 = vst.msk [vmem:[%s4943_s6 + $0x10] sm:$0xff] %vm21_vm1, %v3009_v2  ;;  %3067 = vmatpush.msrb.mxu1 %v3009_v2  ;;  %s3771_s6 = smov 24  }
0x1b32   :  { %3532 = vmatmul.msk.f32.vlgmr.msrb.gmra.mxu1 %vm881_vm15, %v3035_v42  ;;  %vm3134_vm15 = vcmask 253952  }
0x1baf   :  { %v4834_v46 = vpop.f32.mrf.mxu1 }
0x1bb0   :  { %v3088_v56 = vsel %vm996_vm0, %v4834_v46, -1e+30  ;;  %vm3139_vm0 = vcmask 254977  }
0x1bb1   :  { %v3089_v29 = vsel %vm1015_vm2, %v3088_v56, -inf }
0x1bb2   :  { %3090 = vmax.xlane.f32.xlu2 %v3089_v29 }
0x1bca   :  { %3039 = vperm.xlu2 %3639, %v3036_v18  }
0x1bd2   :  { %1479 = vrot.lane.b32.xlu2 %v4242_v51, %s3770_s7  ;;  %v3668_v51 = vld [vmem:[%s4938_s3 + $0x13] ss:$0 sm:$0xff] }
0x1bd3   :  { %v2956_v35 = vadd.f32 %v3668_v51, %v2951_v40 }
0x1bd5   :  { %3755 = vtanh.f32 %v2956_v35 }
0x1bda   :  { %3074 = vrot.lane.b32.xlu2 %v4718_v57, %s3770_s7 }
0x1bdb   :  { %v3756_v54 = vpop.eup %3755 }
0x1be2   :  { %1484 = vrot.lane.b32.xlu2 %v4369_v44, %s3771_s6  ;;  %v3045_v44 = vpop.permute.xlu0 %3044 }
0x1be3   :  { %v3047_v34 = vmul.f32 %v3756_v54, %v3045_v44 }
0x1bea   :  { %2282 = vrot.lane.b32.xlu2 %v4623_v52, %s3771_s6 }
0x1bf2   :  { %2287 = vrot.lane.b32.xlu2 %v4635_v19, %s3772_s25 }
0x1c25   :  { %v3091_v57 = vpop.xlane.xlu2 %3090 }
0x1c26   :  { %v3092_v41 = vsub.f32 %v3088_v56, %v3091_v57 }
0x1c28   :  { %v3093_v4 = vmul.f32 1.442695, %v3092_v41 }
0x1c2a   :  { %3757 = vpow2.f32 %v3093_v4 }
0x1c2d   :  { %v3040_v52 = vpop.permute.xlu2 %3039 }
0x1c2e   :  { %v3042_v25 = vmul.f32 %v3040_v52, %v2252_v49 }
0x1c30   :  { %v3758_v19 = vpop.eup %3757  ;;  %v3048_v48 = vadd.f32 %v3047_v34, %v3042_v25 }
0x1c31   :  { %v3095_v12 = vsel %vm1015_vm2, %v3758_v19, 0.0 }
0x1c32   :  { %3135 = vst.msk [vmem:[%s4941_s4 + $0x18] sm:$0x1] %vm3134_vm15, %v3048_v48  ;;  %3096 = vadd.xlane.f32.xlu1 %v3095_v12 }
0x1c33   :  { %3140 = vst.msk [vmem:[%s4941_s4 + $0x37] sm:$0x2] %vm3139_vm0, %v3048_v48 }
0x1c35   :  { %v1480_v6 = vpop.permute.xlu2 %1479 }
0x1c36   :  { %1483 = vst.msk [vmem:[%s4942_s5] sm:$0x3] %vm1482_vm4, %v1480_v6 }
0x1c3d   :  { %v3075_v47 = vpop.permute.xlu2 %3074 }
0x1c3e   :  { %3077 = vst.msk [vmem:[%s4942_s5 + $0x4] sm:$0x3] %vm1482_vm4, %v3075_v47 }
0x1c45   :  { %v1485_v53 = vpop.permute.xlu2 %1484 }
0x1c46   :  { %1488 = vst.msk [vmem:[%s4942_s5] sm:$0x3] %vm1487_vm5, %v1485_v53 }
0x1c4b   :  { %3078 = vrot.lane.b32.xlu1 %v3035_v42, %s3771_s6 }
0x1c4d   :  { %v2283_v0 = vpop.permute.xlu2 %2282 }
0x1c4e   :  { %2285 = vst.msk [vmem:[%s4942_s5 + $0x2] sm:$0x3] %vm1487_vm5, %v2283_v0 }
0x1c55   :  { %v2288_v16 = vpop.permute.xlu2 %2287 }
0x1c56   :  { %2290 = vst.msk [vmem:[%s4942_s5 + $0x2] sm:$0x3] %vm1493_vm8, %v2288_v16 }
0x1ca5   :  { %v3097_v1 = vpop.xlane.xlu1 %3096 }
0x1ca6   :  { %3759 = vrcp.f32 %v3097_v1 }
0x1cac   :  { %v3760_v39 = vpop.eup %3759 }
0x1cad   :  { %v3099_v55 = vmul.f32 %v3760_v39, %v3758_v19 }
0x1caf   :  { %v3100_v59 = vsel %vm1015_vm2, %v3099_v55, 0.0 }
0x1cb0   :  { %v3101_v49 = vrot.slane %v3100_v59, 4 }
0x1cb2   :  { %v3102_v7 = vadd.f32 %v3101_v49, %v3100_v59 }
0x1cb4   :  { %v3103_v63 = vrot.slane %v3102_v7, 2 }
0x1cb6   :  { %v3104_v45 = vadd.f32 %v3103_v63, %v3102_v7 }
0x1cb8   :  { %v3105_v22 = vrot.slane %v3104_v45, 1 }
0x1cba   :  { %v3106_v23 = vadd.f32 %v3105_v22, %v3104_v45 }
0x1cbc   :  { %v3112_v33 = vmul.f32 %v3108_v21, %v3106_v23  ;;  %v3111_v60 = vmul.f32 %v3107_v11, %v3106_v23  ;;  %v3113_v43 = vmul.f32 %v3109_v61, %v3106_v23  ;;  %v3114_v24 = vmul.f32 %v3110_v9, %v3106_v23 }
0x1cbd   :  { %v3079_v37 = vpop.permute.xlu1 %3078 }
0x1cbe   :  { %3081 = vst.msk [vmem:[%s4942_s5 + $0x4] sm:$0x3] %vm1487_vm5, %v3079_v37  ;;  %v3118_v8 = vsel %vm21_vm1, %v3112_v33, 0.0  ;;  %v3115_v27 = vsel %vm21_vm1, %v3111_v60, 0.0  ;;  %v3121_v20 = vsel %vm21_vm1, %v3113_v43, 0.0  ;;  %v3124_v13 = vsel %vm21_vm1, %v3114_v24, 0.0 }
0x1cbf   :  { %3119 = vadd.xlane.f32.xlu0 %v3118_v8  ;;  %3116 = vadd.xlane.f32.xlu1 %v3115_v27 }
0x1cc7   :  { %3122 = vadd.xlane.f32.xlu1 %v3121_v20 }
0x1ccf   :  { %3125 = vadd.xlane.f32.xlu1 %v3124_v13 }
0x1cd3   :  { %1490 = vrot.lane.b32.xlu0 %v4400_v3, %s3772_s25 }
0x1ce8   :  { %3083 = vrot.lane.b32.xlu1 %v4834_v46, %s3772_s25 }
0x1d32   :  { %v3120_v28 = vpop.xlane.xlu0 %3119  ;;  %v3117_v38 = vpop.xlane.xlu1 %3116 }
0x1d33   :  { %v3128_v30 = vmul.f32 %v3120_v28, %v3929_v62  ;;  %v3127_v32 = vmul.f32 %v3117_v38, %v3927_v50 }
0x1d35   :  { %3133 = vst.msk [vmem:[%s4941_s4 + $0x10] sm:$0xff] %vm21_vm1, %v3128_v30 }
0x1d36   :  { %3132 = vst.msk [vmem:[%s4941_s4 + $0x8] sm:$0xff] %vm21_vm1, %v3127_v32 }
0x1d3a   :  { %v3123_v3 = vpop.xlane.xlu1 %3122 }
0x1d3b   :  { %v3129_v5 = vmul.f32 %v3123_v3, %v3941_v14 }
0x1d3d   :  { %3137 = vst.msk [vmem:[%s4941_s4 + $0x28] sm:$0xff] %vm21_vm1, %v3129_v5 }
0x1d42   :  { %v3126_v62 = vpop.xlane.xlu1 %3125 }
0x1d43   :  { %v3130_v50 = vmul.f32 %v3126_v62, %v3943_v15 }
0x1d45   :  { %3138 = vst.msk [vmem:[%s4941_s4 + $0x30] sm:$0xff] %vm21_vm1, %v3130_v50  ;;  %v1491_v10 = vpop.permute.xlu0 %1490 }
0x1d46   :  { %1494 = vst.msk [vmem:[%s4942_s5] sm:$0x3] %vm1493_vm8, %v1491_v10 }
0x1d5a   :  { %v3084_v14 = vpop.permute.xlu1 %3083 }
0x1d5b   :  { %3086 = vst.msk [vmem:[%s4942_s5 + $0x4] sm:$0x3] %vm1493_vm8, %v3084_v14 }

</bundles_post_ra>
